<compile_context>
chip_gen: v7x
topology: tpu7x:2x2x1
jax: 0.10.0
libtpu: 0.0.40
codegen_flags: <defaults>
</compile_context>

<pallas_src>
import functools

import jax
import jax.numpy as jnp
from jax.experimental import pallas as pl
from jax.experimental.pallas import tpu as pltpu


TM = 256        # rows (B*A) processed per grid step (MXU-occupancy sized)
LANES = 128     # output lane padding


def grid_attention_kernel(ids_ref, sent_ref, wq1_ref, bq1_ref, wq2_ref, bq2_ref,
                          w_fold_ref, out_ref, *, num_types, n_valid):
    f32 = jnp.float32
    sent = sent_ref[...]                                               # [TM, E]

    # --- query_proj: Linear -> ReLU -> Linear (MXU matmuls, f32 accumulation)
    h = jnp.maximum(
        jnp.dot(sent, wq1_ref[...], preferred_element_type=f32) + bq1_ref[...],
        0.0)                                                           # [TM, 256]
    q = jnp.dot(h.astype(wq2_ref.dtype), wq2_ref[...],
                preferred_element_type=f32) + bq2_ref[...]             # [TM, Dm]

    # --- folded key path: qt[:, t] = Q.K_type_t / sqrt(Dm); column T = Q.bk/sqrt(Dm)
    qt = jnp.dot(q.astype(w_fold_ref.dtype), w_fold_ref[...],
                 preferred_element_type=f32)                           # [TM, T+1]

    # --- per-cell type lookup as an unrolled VPU select loop (num_types small+static)
    ids = ids_ref[...]                                                 # [TM, NP] int32
    tm, npad = ids.shape
    scores = jnp.broadcast_to(qt[:, num_types:num_types + 1], (tm, npad))  # bias term
    for t in range(num_types):
        scores = scores + jnp.where(ids == t, qt[:, t:t + 1], 0.0)

    # mask the padded lanes so they vanish in the softmax
    lane = jax.lax.broadcasted_iota(jnp.int32, (tm, npad), 1)
    scores = jnp.where(lane < n_valid, scores, -jnp.inf)

    # --- softmax over the N grid cells (f32) ---
    mx = jnp.max(scores, axis=-1, keepdims=True)
    e = jnp.exp(scores - mx)
    denom = jnp.sum(e, axis=-1, keepdims=True)
    out_ref[...] = e * pl.reciprocal(denom)


def grid_attention(grid_targets, sentence_embedding, params, *, tm=TM,
                   use_bf16=False):
    """grid_targets: [B, A, N] int; sentence_embedding: [B, A, E] float32
    returns attn_weights: [B, A, N] float32"""
    B, A, N = grid_targets.shape
    E = sentence_embedding.shape[-1]
    T, _ = params["table"].shape
    Dm = params["wk"].shape[1]

    M = B * A
    Mp = pl.cdiv(M, tm) * tm
    NP = pl.cdiv(N, LANES) * LANES

    # pad rows to Mp and the cell axis to NP lanes (fill ids with T = "no type")
    ids2 = jnp.full((Mp, NP), T, jnp.int32).at[:M, :N].set(
        grid_targets.reshape(M, N).astype(jnp.int32))
    sent2 = jnp.zeros((Mp, E), jnp.float32).at[:M].set(
        sentence_embedding.reshape(M, E).astype(jnp.float32))

    # --- parameter folding (trace-time only): key proj + embedding + 1/sqrt(Dm)
    scale = 1.0 / (Dm ** 0.5)
    w_key = params["wk"].T @ params["table"].T                       # [Dm, T]
    w_fold = jnp.concatenate([w_key, params["bk"][:, None]], axis=1) * scale  # [Dm, T+1]

    wq1, bq1 = params["wq1"], params["bq1"][None, :]
    wq2, bq2 = params["wq2"], params["bq2"][None, :]

    if use_bf16:  # bf16 MXU operands (v6e/v7x); accumulation & softmax stay f32
        sent2 = sent2.astype(jnp.bfloat16)
        wq1 = wq1.astype(jnp.bfloat16)
        wq2 = wq2.astype(jnp.bfloat16)
        w_fold = w_fold.astype(jnp.bfloat16)

    kernel = functools.partial(grid_attention_kernel, num_types=T, n_valid=N)

    def full_spec(arr):
        nd = arr.ndim
        return pl.BlockSpec(arr.shape, lambda i, _nd=nd: (0,) * _nd)

    out = pl.pallas_call(
        kernel,
        out_shape=jax.ShapeDtypeStruct((Mp, NP), jnp.float32),
        grid_spec=pltpu.PrefetchScalarGridSpec(
            num_scalar_prefetch=0,
            grid=(Mp // tm,),
            in_specs=[
                pl.BlockSpec((tm, NP), lambda i: (i, 0)),   # ids (lane-padded)
                pl.BlockSpec((tm, E), lambda i: (i, 0)),    # sentence embedding
                full_spec(wq1),
                full_spec(bq1),
                full_spec(wq2),
                full_spec(bq2),
                full_spec(w_fold),
            ],
            out_specs=pl.BlockSpec((tm, NP), lambda i: (i, 0)),
        ),
        compiler_params=pltpu.CompilerParams(
            dimension_semantics=("parallel",)),
    )(ids2, sent2, wq1, bq1, wq2, bq2, w_fold)

    return out[:M, :N].reshape(B, A, N)


def reference_grid_attention(grid_targets, sentence_embedding, params):
    """Pure-JAX reference matching the PyTorch forward."""
    emb = params["table"][grid_targets]                         # [B, A, N, D_obs]
    K = emb @ params["wk"] + params["bk"]                       # [B, A, N, Dm]
    h = jnp.maximum(sentence_embedding @ params["wq1"] + params["bq1"], 0.0)
    Q = h @ params["wq2"] + params["bq2"]                       # [B, A, Dm]
    scores = jnp.einsum("bad,band->ban", Q, K) / (K.shape[-1] ** 0.5)
    return jax.nn.softmax(scores, axis=-1)


def init_params(key, num_object_types, sentence_embedding_dim, D_obs=9, D_model=64):
    ks = jax.random.split(key, 8)
    # NOTE: value_proj exists in the PyTorch module but is unused in forward().
    return {
        "table": jax.random.normal(ks[0], (num_object_types, D_obs), jnp.float32),
        "wk": 0.2 * jax.random.normal(ks[1], (D_obs, D_model), jnp.float32),
        "bk": 0.1 * jax.random.normal(ks[2], (D_model,), jnp.float32),
        "wq1": 0.1 * jax.random.normal(ks[3], (sentence_embedding_dim, 256), jnp.float32),
        "bq1": 0.1 * jax.random.normal(ks[4], (256,), jnp.float32),
        "wq2": 0.1 * jax.random.normal(ks[5], (256, D_model), jnp.float32),
        "bq2": 0.1 * jax.random.normal(ks[6], (D_model,), jnp.float32),
    }


if __name__ == "__main__":
    key = jax.random.PRNGKey(0)
    B, A, N, E = 2, 3, 9, 32
    num_object_types, D_obs, D_model = 7, 9, 64

    k_ids, k_sent, k_par = jax.random.split(key, 3)
    grid_targets = jax.random.randint(k_ids, (B, A, N), 0, num_object_types, jnp.int32)
    sentence_embedding = jax.random.normal(k_sent, (B, A, E), jnp.float32)
    params = init_params(k_par, num_object_types, E, D_obs, D_model)

    ref = reference_grid_attention(grid_targets, sentence_embedding, params)

    # f32-operand path (exact to 1e-4 vs reference)
    attn = jax.block_until_ready(
        grid_attention(grid_targets, sentence_embedding, params))
    assert attn.shape == (B, A, N), attn.shape
    assert jnp.allclose(attn, ref, atol=1e-4, rtol=1e-4), (
        float(jnp.max(jnp.abs(attn - ref))))
    assert jnp.allclose(jnp.sum(attn, axis=-1), 1.0, atol=1e-5)

    # bf16-operand path (MXU-native on v6e/v7x); f32 accumulation & softmax
    attn_bf16 = jax.block_until_ready(
        grid_attention(grid_targets, sentence_embedding, params, use_bf16=True))
    assert jnp.allclose(attn_bf16, ref, atol=5e-2, rtol=5e-2), (
        float(jnp.max(jnp.abs(attn_bf16 - ref))))

    print("KERNEL_OK")
</pallas_src>

<mosaic_0001>
module attributes {stable_mosaic.version = 11 : i64} {
  func.func @grid_attention_kernel(%arg0: i32, %arg1: memref<256x128xi32, #tpu.memory_space<vmem>>, %arg2: memref<256x32xf32, #tpu.memory_space<vmem>>, %arg3: memref<32x256xf32, #tpu.memory_space<vmem>>, %arg4: memref<1x256xf32, #tpu.memory_space<vmem>>, %arg5: memref<256x64xf32, #tpu.memory_space<vmem>>, %arg6: memref<1x64xf32, #tpu.memory_space<vmem>>, %arg7: memref<64x8xf32, #tpu.memory_space<vmem>>, %arg8: memref<256x128xf32, #tpu.memory_space<vmem>>) attributes {dimension_semantics = [#tpu.dimension_semantics<parallel>], iteration_bounds = array<i64: 1>, scalar_prefetch = 0 : i64, scratch_operands = 0 : i64, tpu.core_type = #tpu.core_type<tc>, window_params = [{transform_indices = @transform_0, window_bounds = array<i64: 256, 128>}, {transform_indices = @transform_1, window_bounds = array<i64: 256, 32>}, {pipeline_mode = #tpu.pipeline_mode<synchronous>, transform_indices = @transform_2, window_bounds = array<i64: 32, 256>}, {pipeline_mode = #tpu.pipeline_mode<synchronous>, transform_indices = @transform_3, window_bounds = array<i64: 1, 256>}, {pipeline_mode = #tpu.pipeline_mode<synchronous>, transform_indices = @transform_4, window_bounds = array<i64: 256, 64>}, {pipeline_mode = #tpu.pipeline_mode<synchronous>, transform_indices = @transform_5, window_bounds = array<i64: 1, 64>}, {pipeline_mode = #tpu.pipeline_mode<synchronous>, transform_indices = @transform_6, window_bounds = array<i64: 64, 8>}, {transform_indices = @transform_7, window_bounds = array<i64: 256, 128>}]} {
    %c0 = arith.constant 0 : index
    %c0_0 = arith.constant 0 : index
    %0 = vector.load %arg2[%c0, %c0_0] : memref<256x32xf32, #tpu.memory_space<vmem>>, vector<256x32xf32>
    %c0_1 = arith.constant 0 : index
    %c0_2 = arith.constant 0 : index
    %1 = vector.load %arg3[%c0_1, %c0_2] : memref<32x256xf32, #tpu.memory_space<vmem>>, vector<32x256xf32>
    %cst = arith.constant dense<0.000000e+00> : vector<256x256xf32>
    %2 = tpu.matmul %0, %1, %cst {dimension_numbers = #tpu.dot_dimension_numbers<[1], [0], [0], [1], [0, 0, 1, 1], [], []>} : vector<256x32xf32>, vector<32x256xf32>, vector<256x256xf32> -> vector<256x256xf32>
    %c0_3 = arith.constant 0 : index
    %c0_4 = arith.constant 0 : index
    %3 = vector.load %arg4[%c0_3, %c0_4] : memref<1x256xf32, #tpu.memory_space<vmem>>, vector<1x256xf32>
    %4 = vector.broadcast %3 : vector<1x256xf32> to vector<256x256xf32>
    %5 = arith.addf %2, %4 : vector<256x256xf32>
    %cst_5 = arith.constant 0.000000e+00 : f32
    %6 = vector.broadcast %cst_5 : f32 to vector<256x256xf32>
    %7 = arith.maximumf %5, %6 : vector<256x256xf32>
    %c0_6 = arith.constant 0 : index
    %c0_7 = arith.constant 0 : index
    %8 = vector.load %arg5[%c0_6, %c0_7] : memref<256x64xf32, #tpu.memory_space<vmem>>, vector<256x64xf32>
    %cst_8 = arith.constant dense<0.000000e+00> : vector<256x64xf32>
    %9 = tpu.matmul %7, %8, %cst_8 {dimension_numbers = #tpu.dot_dimension_numbers<[1], [0], [0], [1], [0, 0, 1, 1], [], []>} : vector<256x256xf32>, vector<256x64xf32>, vector<256x64xf32> -> vector<256x64xf32>
    %c0_9 = arith.constant 0 : index
    %c0_10 = arith.constant 0 : index
    %10 = vector.load %arg6[%c0_9, %c0_10] : memref<1x64xf32, #tpu.memory_space<vmem>>, vector<1x64xf32>
    %11 = vector.broadcast %10 : vector<1x64xf32> to vector<256x64xf32>
    %12 = arith.addf %9, %11 : vector<256x64xf32>
    %c0_11 = arith.constant 0 : index
    %c0_12 = arith.constant 0 : index
    %13 = vector.load %arg7[%c0_11, %c0_12] : memref<64x8xf32, #tpu.memory_space<vmem>>, vector<64x8xf32>
    %cst_13 = arith.constant dense<0.000000e+00> : vector<256x8xf32>
    %14 = tpu.matmul %12, %13, %cst_13 {dimension_numbers = #tpu.dot_dimension_numbers<[1], [0], [0], [1], [0, 0, 1, 1], [], []>} : vector<256x64xf32>, vector<64x8xf32>, vector<256x8xf32> -> vector<256x8xf32>
    %c0_14 = arith.constant 0 : index
    %c0_15 = arith.constant 0 : index
    %15 = vector.load %arg1[%c0_14, %c0_15] : memref<256x128xi32, #tpu.memory_space<vmem>>, vector<256x128xi32>
    %16 = vector.extract_strided_slice %14 {offsets = [0, 7], sizes = [256, 1], strides = [1, 1]} : vector<256x8xf32> to vector<256x1xf32>
    %17 = vector.shape_cast %16 : vector<256x1xf32> to vector<256x1xf32>
    %18 = vector.broadcast %17 : vector<256x1xf32> to vector<256x128xf32>
    %c0_i32 = arith.constant 0 : i32
    %19 = vector.broadcast %c0_i32 : i32 to vector<256x128xi32>
    %20 = arith.cmpi eq, %15, %19 : vector<256x128xi32>
    %21 = vector.extract_strided_slice %14 {offsets = [0, 0], sizes = [256, 1], strides = [1, 1]} : vector<256x8xf32> to vector<256x1xf32>
    %cst_16 = arith.constant 0.000000e+00 : f32
    %22 = vector.shape_cast %21 : vector<256x1xf32> to vector<256x1xf32>
    %23 = vector.broadcast %22 : vector<256x1xf32> to vector<256x128xf32>
    %24 = vector.broadcast %cst_16 : f32 to vector<256x128xf32>
    %25 = arith.select %20, %23, %24 : vector<256x128xi1>, vector<256x128xf32>
    %26 = arith.addf %18, %25 : vector<256x128xf32>
    %c1_i32 = arith.constant 1 : i32
    %27 = vector.broadcast %c1_i32 : i32 to vector<256x128xi32>
    %28 = arith.cmpi eq, %15, %27 : vector<256x128xi32>
    %29 = vector.extract_strided_slice %14 {offsets = [0, 1], sizes = [256, 1], strides = [1, 1]} : vector<256x8xf32> to vector<256x1xf32>
    %cst_17 = arith.constant 0.000000e+00 : f32
    %30 = vector.shape_cast %29 : vector<256x1xf32> to vector<256x1xf32>
    %31 = vector.broadcast %30 : vector<256x1xf32> to vector<256x128xf32>
    %32 = vector.broadcast %cst_17 : f32 to vector<256x128xf32>
    %33 = arith.select %28, %31, %32 : vector<256x128xi1>, vector<256x128xf32>
    %34 = arith.addf %26, %33 : vector<256x128xf32>
    %c2_i32 = arith.constant 2 : i32
    %35 = vector.broadcast %c2_i32 : i32 to vector<256x128xi32>
    %36 = arith.cmpi eq, %15, %35 : vector<256x128xi32>
    %37 = vector.extract_strided_slice %14 {offsets = [0, 2], sizes = [256, 1], strides = [1, 1]} : vector<256x8xf32> to vector<256x1xf32>
    %cst_18 = arith.constant 0.000000e+00 : f32
    %38 = vector.shape_cast %37 : vector<256x1xf32> to vector<256x1xf32>
    %39 = vector.broadcast %38 : vector<256x1xf32> to vector<256x128xf32>
    %40 = vector.broadcast %cst_18 : f32 to vector<256x128xf32>
    %41 = arith.select %36, %39, %40 : vector<256x128xi1>, vector<256x128xf32>
    %42 = arith.addf %34, %41 : vector<256x128xf32>
    %c3_i32 = arith.constant 3 : i32
    %43 = vector.broadcast %c3_i32 : i32 to vector<256x128xi32>
    %44 = arith.cmpi eq, %15, %43 : vector<256x128xi32>
    %45 = vector.extract_strided_slice %14 {offsets = [0, 3], sizes = [256, 1], strides = [1, 1]} : vector<256x8xf32> to vector<256x1xf32>
    %cst_19 = arith.constant 0.000000e+00 : f32
    %46 = vector.shape_cast %45 : vector<256x1xf32> to vector<256x1xf32>
    %47 = vector.broadcast %46 : vector<256x1xf32> to vector<256x128xf32>
    %48 = vector.broadcast %cst_19 : f32 to vector<256x128xf32>
    %49 = arith.select %44, %47, %48 : vector<256x128xi1>, vector<256x128xf32>
    %50 = arith.addf %42, %49 : vector<256x128xf32>
    %c4_i32 = arith.constant 4 : i32
    %51 = vector.broadcast %c4_i32 : i32 to vector<256x128xi32>
    %52 = arith.cmpi eq, %15, %51 : vector<256x128xi32>
    %53 = vector.extract_strided_slice %14 {offsets = [0, 4], sizes = [256, 1], strides = [1, 1]} : vector<256x8xf32> to vector<256x1xf32>
    %cst_20 = arith.constant 0.000000e+00 : f32
    %54 = vector.shape_cast %53 : vector<256x1xf32> to vector<256x1xf32>
    %55 = vector.broadcast %54 : vector<256x1xf32> to vector<256x128xf32>
    %56 = vector.broadcast %cst_20 : f32 to vector<256x128xf32>
    %57 = arith.select %52, %55, %56 : vector<256x128xi1>, vector<256x128xf32>
    %58 = arith.addf %50, %57 : vector<256x128xf32>
    %c5_i32 = arith.constant 5 : i32
    %59 = vector.broadcast %c5_i32 : i32 to vector<256x128xi32>
    %60 = arith.cmpi eq, %15, %59 : vector<256x128xi32>
    %61 = vector.extract_strided_slice %14 {offsets = [0, 5], sizes = [256, 1], strides = [1, 1]} : vector<256x8xf32> to vector<256x1xf32>
    %cst_21 = arith.constant 0.000000e+00 : f32
    %62 = vector.shape_cast %61 : vector<256x1xf32> to vector<256x1xf32>
    %63 = vector.broadcast %62 : vector<256x1xf32> to vector<256x128xf32>
    %64 = vector.broadcast %cst_21 : f32 to vector<256x128xf32>
    %65 = arith.select %60, %63, %64 : vector<256x128xi1>, vector<256x128xf32>
    %66 = arith.addf %58, %65 : vector<256x128xf32>
    %c6_i32 = arith.constant 6 : i32
    %67 = vector.broadcast %c6_i32 : i32 to vector<256x128xi32>
    %68 = arith.cmpi eq, %15, %67 : vector<256x128xi32>
    %69 = vector.extract_strided_slice %14 {offsets = [0, 6], sizes = [256, 1], strides = [1, 1]} : vector<256x8xf32> to vector<256x1xf32>
    %cst_22 = arith.constant 0.000000e+00 : f32
    %70 = vector.shape_cast %69 : vector<256x1xf32> to vector<256x1xf32>
    %71 = vector.broadcast %70 : vector<256x1xf32> to vector<256x128xf32>
    %72 = vector.broadcast %cst_22 : f32 to vector<256x128xf32>
    %73 = arith.select %68, %71, %72 : vector<256x128xi1>, vector<256x128xf32>
    %74 = arith.addf %66, %73 : vector<256x128xf32>
    %75 = tpu.iota {dimensions = array<i32: 1>} : vector<256x128xi32>
    %c9_i32 = arith.constant 9 : i32
    %76 = vector.broadcast %c9_i32 : i32 to vector<256x128xi32>
    %77 = arith.cmpi slt, %75, %76 : vector<256x128xi32>
    %cst_23 = arith.constant 0xFF800000 : f32
    %78 = vector.broadcast %cst_23 : f32 to vector<256x128xf32>
    %79 = arith.select %77, %74, %78 : vector<256x128xi1>, vector<256x128xf32>
    %cst_24 = arith.constant dense<0xFF800000> : vector<256xf32>
    %80 = vector.multi_reduction <maximumf>, %79, %cst_24 [1] : vector<256x128xf32> to vector<256xf32>
    %81 = vector.shape_cast %80 : vector<256xf32> to vector<256x1xf32>
    %82 = vector.broadcast %81 : vector<256x1xf32> to vector<256x128xf32>
    %83 = arith.subf %79, %82 : vector<256x128xf32>
    %84 = math.exp %83 : vector<256x128xf32>
    %cst_25 = arith.constant dense<0.000000e+00> : vector<256xf32>
    %85 = vector.multi_reduction <add>, %84, %cst_25 [1] : vector<256x128xf32> to vector<256xf32>
    %86 = vector.shape_cast %85 : vector<256xf32> to vector<256x1xf32>
    %87 = tpu.reciprocal %86 : vector<256x1xf32> -> vector<256x1xf32>
    %88 = vector.broadcast %87 : vector<256x1xf32> to vector<256x128xf32>
    %89 = arith.mulf %84, %88 : vector<256x128xf32>
    %c0_26 = arith.constant 0 : index
    %c0_27 = arith.constant 0 : index
    %90 = vector.load %arg8[%c0_26, %c0_27] : memref<256x128xf32, #tpu.memory_space<vmem>>, vector<256x128xf32>
    tpu.vector_store %arg8[%c0_26, %c0_27], %89 {strides = array<i32>} : memref<256x128xf32, #tpu.memory_space<vmem>>, vector<256x128xf32>,
    return
  }
  func.func @transform_0(%arg0: i32) -> (i32, i32) {
    %c0_i32 = arith.constant 0 : i32
    %c0_i32_0 = arith.constant 0 : i32
    return %arg0, %c0_i32 : i32, i32
  }
  func.func @transform_1(%arg0: i32) -> (i32, i32) {
    %c0_i32 = arith.constant 0 : i32
    %c0_i32_0 = arith.constant 0 : i32
    return %arg0, %c0_i32 : i32, i32
  }
  func.func @transform_2(%arg0: i32) -> (i32, i32) {
    %c0_i32 = arith.constant 0 : i32
    %c0_i32_0 = arith.constant 0 : i32
    %c0_i32_1 = arith.constant 0 : i32
    return %c0_i32, %c0_i32_0 : i32, i32
  }
  func.func @transform_3(%arg0: i32) -> (i32, i32) {
    %c0_i32 = arith.constant 0 : i32
    %c0_i32_0 = arith.constant 0 : i32
    %c0_i32_1 = arith.constant 0 : i32
    return %c0_i32, %c0_i32_0 : i32, i32
  }
  func.func @transform_4(%arg0: i32) -> (i32, i32) {
    %c0_i32 = arith.constant 0 : i32
    %c0_i32_0 = arith.constant 0 : i32
    %c0_i32_1 = arith.constant 0 : i32
    return %c0_i32, %c0_i32_0 : i32, i32
  }
  func.func @transform_5(%arg0: i32) -> (i32, i32) {
    %c0_i32 = arith.constant 0 : i32
    %c0_i32_0 = arith.constant 0 : i32
    %c0_i32_1 = arith.constant 0 : i32
    return %c0_i32, %c0_i32_0 : i32, i32
  }
  func.func @transform_6(%arg0: i32) -> (i32, i32) {
    %c0_i32 = arith.constant 0 : i32
    %c0_i32_0 = arith.constant 0 : i32
    %c0_i32_1 = arith.constant 0 : i32
    return %c0_i32, %c0_i32_0 : i32, i32
  }
  func.func @transform_7(%arg0: i32) -> (i32, i32) {
    %c0_i32 = arith.constant 0 : i32
    %c0_i32_0 = arith.constant 0 : i32
    return %arg0, %c0_i32 : i32, i32
  }
}

</mosaic_0001>

<bundles_post_ra>
// kernel: tpu_custom_call.1
= control target key start
LH: loop header
LB: loop body
LE: loop exit
PB: predicated region body
PF: predicated region fallthrough
CT: control target
= control target key end

     0   :  { %v3893_v7 = vmov 0.0   ;;  %v3894_v8 = vmov 0.0|0.0   ;;  %vm79_vm0 = vcmask 261120   ;;  %s6726_s0 = inlined_call_operand.vmem [shape: s32[256,128], index: 0, kind: input, shape index: {}]   ;;  %s6727_s1 = inlined_call_operand.vmem [shape: f32[256,32], index: 1, kind: input, shape index: {}]   ;;  %s6728_s2 = inlined_call_operand.vmem [shape: f32[32,256], index: 2, kind: input, shape index: {}]   ;;  %s6729_s3 = inlined_call_operand.vmem [shape: f32[1,256], index: 3, kind: input, shape index: {}]   ;;  %s6730_s4 = inlined_call_operand.vmem [shape: f32[256,64], index: 4, kind: input, shape index: {}]   ;;  %s6731_s5 = inlined_call_operand.vmem [shape: f32[1,64], index: 5, kind: input, shape index: {}]   ;;  %s6732_s6 = inlined_call_operand.vmem [shape: f32[64,8], index: 6, kind: input, shape index: {}]   ;;  %s6733_s7 = inlined_call_operand.hbm [shape: f32[256,128], index: 7, kind: output, shape index: {}]  }
   0x1   :  { %v60_v0 = vld [vmem:[%s6728_s2 + $0x8] sm:$0xff]  ;;  %v62_v1 = vld [vmem:[%s6728_s2 + $0x18] sm:$0xff]  ;;  %v59_v2 = vld [vmem:[%s6728_s2] sm:$0xff]  ;;  %240 = vmatprep.mubr.f32.mxu0 %v3893_v7  ;;  %3399 = vmatprep.subr.bf16.mxu1 %v3894_v8 }
   0x2   :  { %v3391_v3 = vpack.c.bf16 %v62_v1, %v60_v0  ;;  %v61_v4 = vld [vmem:[%s6728_s2 + $0x10] sm:$0xff]  ;;  %v64_v5 = vld [vmem:[%s6728_s2 + $0x28] sm:$0xff]  ;;  %v66_v6 = vld [vmem:[%s6728_s2 + $0x38] sm:$0xff] }
   0x3   :  { %v3393_v9 = vpack.c.bf16 %v61_v4, %v59_v2  ;;  %v3395_v10 = vpack.c.bf16 %v66_v6, %v64_v5  ;;  %v63_v11 = vld [vmem:[%s6728_s2 + $0x20] sm:$0xff]  ;;  %v65_v12 = vld [vmem:[%s6728_s2 + $0x30] sm:$0xff]  ;;  %v498_v15 = vld [vmem:[%s6730_s4 + $0x8] sm:$0xff] }
   0x4   :  { %3392 = vmatprep.subr.bf16.mxu0 %v3391_v3  ;;  %v3397_v13 = vpack.c.bf16 %v65_v12, %v63_v11  ;;  %v497_v14 = vld [vmem:[%s6730_s4] sm:$0xff]  ;;  %v499_v16 = vld [vmem:[%s6730_s4 + $0x10] sm:$0xff]  ;;  %v500_v18 = vld [vmem:[%s6730_s4 + $0x18] sm:$0xff] }
   0x5   :  { %3394 = vmatpush1.bf16.msra.mxu0 %v3393_v9  ;;  %v3400_v17 = vpack.c.bf16 %v498_v15, %v497_v14  ;;  %v27_v19 = vld [vmem:[%s6727_s1] sm:$0xff]  ;;  %v3403_v20 = vpack.c.bf16 %v500_v18, %v499_v16  ;;  %v502_v22 = vld [vmem:[%s6730_s4 + $0x28] sm:$0xff]  ;;  %v503_v25 = vld [vmem:[%s6730_s4 + $0x30] sm:$0xff] }
   0x6   :  { %3396 = vmatprep.subr.bf16.mxu0 %v3395_v10  ;;  %v501_v21 = vld [vmem:[%s6730_s4 + $0x20] sm:$0xff]  ;;  %v28_v23 = vld [vmem:[%s6727_s1 + $0x8] sm:$0xff]  ;;  %v504_v26 = vld [vmem:[%s6730_s4 + $0x38] sm:$0xff] }
   0x7   :  { %3401 = vmatpush1.bf16.msra.mxu1 %v3400_v17  ;;  %v3406_v24 = vpack.c.bf16 %v502_v22, %v501_v21  ;;  %v29_v27 = vld [vmem:[%s6727_s1 + $0x10] sm:$0xff] }
   0x8   :  { %3402 = vmatprep.subr.bf16.mxu1 %v3894_v8 }
   0x9   :  { %3398 = vmatpush1.bf16.msra.mxu0 %v3397_v13 }
   0xb   :  { %3404 = vmatpush1.bf16.msra.mxu1 %v3403_v20 }
   0xc   :  { %3222 = vmatmul.mubr.msk.f32.vlgmr.msra.gmra.mrb[0].mxu0 %vm79_vm0, %v27_v19  ;;  %3405 = vmatprep.subr.bf16.mxu1 %v3894_v8 }
   0xd   :  { %246 = vmatprep.mubr.f32.mxu0 %v3893_v7 }
  0x10   :  { %3223 = vmatmul.mubr.msk.f32.gmra.mrb[2].mxu0 %vm79_vm0, %v28_v23 }
  0x11   :  { %252 = vmatprep.mubr.f32.mxu0 %v3893_v7 }
  0x12   :  { %12 = vsyncpa [#allocation3], 0  ;;  %3407 = vmatpush1.bf16.msra.mxu1 %v3406_v24  ;;  %v3409_v28 = vpack.c.bf16 %v504_v26, %v503_v25  ;;  %v505_v29 = vld [vmem:[%s6730_s4 + $0x40] sm:$0xff]  ;;  %v506_v30 = vld [vmem:[%s6730_s4 + $0x48] sm:$0xff]  ;;  %vm769_vm1 = vcmask 523264  }
  0x13   :  { %3408 = vmatprep.subr.bf16.mxu1 %v3894_v8  ;;  %v30_v31 = vld [vmem:[%s6727_s1 + $0x18] sm:$0xff]  ;;  %v3412_v32 = vpack.c.bf16 %v506_v30, %v505_v29  ;;  %v507_v33 = vld [vmem:[%s6730_s4 + $0x50] sm:$0xff]  ;;  %v31_v35 = vld [vmem:[%s6727_s1 + $0x20] sm:$0xff] }
  0x14   :  { %3224 = vmatmul.mubr.msk.f32.gmra.mrb[4].mxu0 %vm79_vm0, %v29_v27  ;;  %v508_v34 = vld [vmem:[%s6730_s4 + $0x58] sm:$0xff]  ;;  %v509_v37 = vld [vmem:[%s6730_s4 + $0x60] sm:$0xff]  ;;  %v510_v38 = vld [vmem:[%s6730_s4 + $0x68] sm:$0xff] }
  0x15   :  { %258 = vmatprep.mubr.f32.mxu0 %v3893_v7  ;;  %v3415_v36 = vpack.c.bf16 %v508_v34, %v507_v33  ;;  %v32_v39 = vld [vmem:[%s6727_s1 + $0x28] sm:$0xff]  ;;  %v3418_v40 = vpack.c.bf16 %v510_v38, %v509_v37  ;;  %v511_v41 = vld [vmem:[%s6730_s4 + $0x70] sm:$0xff]  ;;  %v512_v42 = vld [vmem:[%s6730_s4 + $0x78] sm:$0xff] }
  0x16   :  { %3410 = vmatpush1.bf16.msra.mxu1 %v3409_v28  ;;  %v33_v43 = vld [vmem:[%s6727_s1 + $0x30] sm:$0xff]  ;;  %v3421_v44 = vpack.c.bf16 %v512_v42, %v511_v41  ;;  %v513_v45 = vld [vmem:[%s6730_s4 + $0x80] sm:$0xff]  ;;  %v514_v46 = vld [vmem:[%s6730_s4 + $0x88] sm:$0xff] }
  0x17   :  { %3411 = vmatprep.subr.bf16.mxu1 %v3894_v8  ;;  %v34_v47 = vld [vmem:[%s6727_s1 + $0x38] sm:$0xff]  ;;  %v3424_v48 = vpack.c.bf16 %v514_v46, %v513_v45  ;;  %v515_v49 = vld [vmem:[%s6730_s4 + $0x90] sm:$0xff]  ;;  %v35_v51 = vld [vmem:[%s6727_s1 + $0x40] sm:$0xff] }
  0x18   :  { %3225 = vmatmul.mubr.msk.f32.gmra.mrb[6].mxu0 %vm79_vm0, %v30_v31  ;;  %v516_v50 = vld [vmem:[%s6730_s4 + $0x98] sm:$0xff]  ;;  %v517_v53 = vld [vmem:[%s6730_s4 + $0xa0] sm:$0xff]  ;;  %v518_v54 = vld [vmem:[%s6730_s4 + $0xa8] sm:$0xff] }
  0x19   :  { %264 = vmatprep.mubr.f32.mxu0 %v3893_v7  ;;  %v3427_v52 = vpack.c.bf16 %v516_v50, %v515_v49  ;;  %v36_v55 = vld [vmem:[%s6727_s1 + $0x48] sm:$0xff]  ;;  %v3430_v56 = vpack.c.bf16 %v518_v54, %v517_v53  ;;  %v519_v57 = vld [vmem:[%s6730_s4 + $0xb0] sm:$0xff]  ;;  %v520_v58 = vld [vmem:[%s6730_s4 + $0xb8] sm:$0xff] }
  0x1a   :  { %3413 = vmatpush1.bf16.msra.mxu1 %v3412_v32  ;;  %v37_v59 = vld [vmem:[%s6727_s1 + $0x50] sm:$0xff]  ;;  %v3433_v60 = vpack.c.bf16 %v520_v58, %v519_v57  ;;  %v521_v61 = vld [vmem:[%s6730_s4 + $0xc0] sm:$0xff]  ;;  %v522_v62 = vld [vmem:[%s6730_s4 + $0xc8] sm:$0xff] }
  0x1b   :  { %3414 = vmatprep.subr.bf16.mxu1 %v3894_v8  ;;  %v38_v63 = vld [vmem:[%s6727_s1 + $0x58] sm:$0xff]  ;;  %v3436_v0 = vpack.c.bf16 %v522_v62, %v521_v61  ;;  %v523_v1 = vld [vmem:[%s6730_s4 + $0xd0] sm:$0xff]  ;;  %v525_v4 = vld [vmem:[%s6730_s4 + $0xe0] sm:$0xff] }
  0x1c   :  { %3226 = vmatmul.mubr.msk.f32.gmra.mrb[8].mxu0 %vm79_vm0, %v31_v35  ;;  %v524_v2 = vld [vmem:[%s6730_s4 + $0xd8] sm:$0xff]  ;;  %v526_v5 = vld [vmem:[%s6730_s4 + $0xe8] sm:$0xff]  ;;  %v527_v9 = vld [vmem:[%s6730_s4 + $0xf0] sm:$0xff] }
  0x1d   :  { %270 = vmatprep.mubr.f32.mxu0 %v3893_v7  ;;  %v3439_v3 = vpack.c.bf16 %v524_v2, %v523_v1  ;;  %v3442_v6 = vpack.c.bf16 %v526_v5, %v525_v4  ;;  %v528_v10 = vld [vmem:[%s6730_s4 + $0xf8] sm:$0xff]  ;;  %v39_v12 = vld [vmem:[%s6727_s1 + $0x60] sm:$0xff]  ;;  %v41_v13 = vld [vmem:[%s6727_s1 + $0x70] sm:$0xff] }
  0x1e   :  { %3416 = vmatpush1.bf16.msra.mxu1 %v3415_v36  ;;  %v3445_v11 = vpack.c.bf16 %v528_v10, %v527_v9  ;;  %v42_v14 = vld [vmem:[%s6727_s1 + $0x78] sm:$0xff]  ;;  %v43_v15 = vld [vmem:[%s6727_s1 + $0x80] sm:$0xff]  ;;  %v762_v17 = vld [vmem:[%s6732_s6 + $0x8] sm:$0xff] }
  0x1f   :  { %3417 = vmatprep.subr.bf16.mxu1 %v3894_v8  ;;  %v761_v16 = vld [vmem:[%s6732_s6] sm:$0xff]  ;;  %v44_v19 = vld [vmem:[%s6727_s1 + $0x88] sm:$0xff]  ;;  %v763_v20 = vld [vmem:[%s6732_s6 + $0x10] sm:$0xff] }
  0x20   :  { %3227 = vmatmul.mubr.msk.f32.gmra.mrb[10].mxu0 %vm79_vm0, %v32_v39  ;;  %v4173_v18 = vpack.c.bf16 %v762_v17, %v761_v16  ;;  %v764_v21 = vld [vmem:[%s6732_s6 + $0x18] sm:$0xff]  ;;  %v45_v22 = vld [vmem:[%s6727_s1 + $0x90] sm:$0xff]  ;;  %v765_v25 = vld [vmem:[%s6732_s6 + $0x20] sm:$0xff] }
  0x21   :  { %276 = vmatprep.mubr.f32.mxu0 %v3893_v7  ;;  %v4193_v23 = vpack.c.bf16 %v764_v21, %v763_v20  ;;  %v46_v24 = vld [vmem:[%s6727_s1 + $0x98] sm:$0xff]  ;;  %v766_v26 = vld [vmem:[%s6732_s6 + $0x28] sm:$0xff]  ;;  %v47_v27 = vld [vmem:[%s6727_s1 + $0xa0] sm:$0xff] }
  0x22   :  { %3419 = vmatpush1.bf16.msra.mxu1 %v3418_v40  ;;  %3448 = vmatprep.subr.bf16.mxu0 %v4173_v18  ;;  %v4213_v28 = vpack.c.bf16 %v766_v26, %v765_v25  ;;  %v48_v29 = vld [vmem:[%s6727_s1 + $0xa8] sm:$0xff]  ;;  %v767_v30 = vld [vmem:[%s6732_s6 + $0x30] sm:$0xff]  ;;  %v768_v31 = vld [vmem:[%s6732_s6 + $0x38] sm:$0xff] }
  0x23   :  { %3420 = vmatprep.subr.bf16.mxu1 %v3894_v8  ;;  %3450 = vmatpush3.bf16.msra.mxu0 %v4173_v18  ;;  %v49_v32 = vld [vmem:[%s6727_s1 + $0xb0] sm:$0xff]  ;;  %v4233_v33 = vpack.c.bf16 %v768_v31, %v767_v30  ;;  %v50_v34 = vld [vmem:[%s6727_s1 + $0xb8] sm:$0xff]  ;;  %v51_v35 = vld [vmem:[%s6727_s1 + $0xc0] sm:$0xff] }
  0x24   :  { %3228 = vmatmul.mubr.msk.f32.gmra.mrb[12].mxu0 %vm79_vm0, %v33_v43  ;;  %3452 = vmatprep.subr.bf16.mxu0 %v4193_v23  ;;  %v52_v36 = vld [vmem:[%s6727_s1 + $0xc8] sm:$0xff]  ;;  %v53_v37 = vld [vmem:[%s6727_s1 + $0xd0] sm:$0xff]  ;;  %v54_v38 = vld [vmem:[%s6727_s1 + $0xd8] sm:$0xff]  ;;  %v6734_v43 = vlaneseq }
  0x25   :  { %282 = vmatprep.mubr.f32.mxu0 %v3893_v7  ;;  %v55_v39 = vld [vmem:[%s6727_s1 + $0xe0] sm:$0xff]  ;;  %v56_v40 = vld [vmem:[%s6727_s1 + $0xe8] sm:$0xff]  ;;  %v57_v41 = vld [vmem:[%s6727_s1 + $0xf0] sm:$0xff] }
  0x26   :  { %3422 = vmatpush1.bf16.msra.mxu1 %v3421_v44  ;;  %v58_v42 = vld [vmem:[%s6727_s1 + $0xf8] sm:$0xff]  ;;  %v70_v44 = vshrl.u32 %v6734_v43, 7  ;;  %v67_v46 = vld [vmem:[%s6729_s3] sm:$0x3] }
  0x27   :  { %3423 = vmatprep.subr.bf16.mxu1 %v3894_v8  ;;  %3454 = vmatpush3.bf16.msra.mxu0 %v4193_v23 }
  0x28   :  { %3229 = vmatmul.mubr.msk.f32.gmra.mrb[14].mxu0 %vm79_vm0, %v34_v47  ;;  %3456 = vmatprep.subr.bf16.mxu0 %v4213_v28  ;;  %v71_v45 = vsub.s32 0, %v70_v44  ;;  %v75_v47 = vsub.s32 1, %v70_v44 }
  0x29   :  { %288 = vmatprep.mubr.f32.mxu0 %v3893_v7 }
  0x2a   :  { %3425 = vmatpush1.bf16.msra.mxu1 %v3424_v48  ;;  %v4287_v48 = vrot.slane %v67_v46, %v71_v45  ;;  %v4289_v49 = vrot.slane %v67_v46, %v75_v47 }
  0x2b   :  { %3426 = vmatprep.subr.bf16.mxu1 %v3894_v8  ;;  %3458 = vmatpush3.bf16.msra.mxu0 %v4213_v28 }
  0x2c   :  { %3230 = vmatmul.mubr.msk.f32.gmra.mrb[16].mxu0 %vm79_vm0, %v35_v51  ;;  %3460 = vmatprep.subr.bf16.mxu0 %v4233_v33 }
  0x2d   :  { %294 = vmatprep.mubr.f32.mxu0 %v3893_v7 }
  0x2e   :  { %3428 = vmatpush1.bf16.msra.mxu1 %v3427_v52 }
  0x2f   :  { %3429 = vmatprep.subr.bf16.mxu1 %v3894_v8  ;;  %3462 = vmatpush3.bf16.msra.mxu0 %v4233_v33 }
  0x30   :  { %3231 = vmatmul.mubr.msk.f32.gmra.mrb[18].mxu0 %vm79_vm0, %v36_v55 }
  0x31   :  { %300 = vmatprep.mubr.f32.mxu0 %v3893_v7 }
  0x32   :  { %3431 = vmatpush1.bf16.msra.mxu1 %v3430_v56 }
  0x33   :  { %3432 = vmatprep.subr.bf16.mxu1 %v3894_v8 }
  0x34   :  { %3232 = vmatmul.mubr.msk.f32.gmra.mrb[20].mxu0 %vm79_vm0, %v37_v59 }
  0x35   :  { %306 = vmatprep.mubr.f32.mxu0 %v3893_v7 }
  0x36   :  { %3434 = vmatpush1.bf16.msra.mxu1 %v3433_v60 }
  0x37   :  { %3435 = vmatprep.subr.bf16.mxu1 %v3894_v8 }
  0x38   :  { %3233 = vmatmul.mubr.msk.f32.gmra.mrb[22].mxu0 %vm79_vm0, %v38_v63 }
  0x39   :  { %312 = vmatprep.mubr.f32.mxu0 %v3893_v7 }
  0x3a   :  { %3437 = vmatpush1.bf16.msra.mxu1 %v3436_v0 }
  0x3b   :  { %3438 = vmatprep.subr.bf16.mxu1 %v3894_v8 }
  0x3c   :  { %3234 = vmatmul.mubr.msk.f32.gmra.mrb[24].mxu0 %vm79_vm0, %v39_v12 }
  0x3d   :  { %318 = vmatprep.mubr.f32.mxu0 %v3893_v7 }
  0x3e   :  { %3440 = vmatpush1.bf16.msra.mxu1 %v3439_v3 }
  0x3f   :  { %3441 = vmatprep.subr.bf16.mxu1 %v3894_v8 }
  0x42   :  { %3443 = vmatpush1.bf16.msra.mxu1 %v3442_v6 }
  0x43   :  { %3444 = vmatprep.subr.bf16.mxu1 %v3894_v8  ;;  %v40_v8 = vld [vmem:[%s6727_s1 + $0x68] sm:$0xff] }
  0x44   :  { %3235 = vmatmul.mubr.msk.f32.gmra.mrb[26].mxu0 %vm79_vm0, %v40_v8 }
  0x45   :  { %324 = vmatprep.mubr.f32.mxu0 %v3893_v7 }
  0x46   :  { %3446 = vmatpush1.bf16.msra.mxu1 %v3445_v11 }
  0x47   :  { %3463 = vmatprep.subr.bf16.mxu1 %v4173_v18 }
  0x48   :  { %3236 = vmatmul.mubr.msk.f32.gmra.mrb[28].mxu0 %vm79_vm0, %v41_v13 }
  0x49   :  { %330 = vmatprep.mubr.f32.mxu0 %v3893_v7 }
  0x4c   :  { %3237 = vmatmul.mubr.msk.f32.gmra.mrb[30].mxu0 %vm79_vm0, %v42_v14 }
  0x4d   :  { %336 = vmatprep.mubr.f32.mxu0 %v3893_v7 }
  0x50   :  { %3238 = vmatmul.mubr.msk.f32.gmra.mrb[32].mxu0 %vm79_vm0, %v43_v15 }
  0x51   :  { %342 = vmatprep.mubr.f32.mxu0 %v3893_v7 }
  0x54   :  { %3239 = vmatmul.mubr.msk.f32.gmra.mrb[34].mxu0 %vm79_vm0, %v44_v19 }
  0x55   :  { %348 = vmatprep.mubr.f32.mxu0 %v3893_v7 }
  0x58   :  { %3240 = vmatmul.mubr.msk.f32.gmra.mrb[36].mxu0 %vm79_vm0, %v45_v22 }
  0x59   :  { %354 = vmatprep.mubr.f32.mxu0 %v3893_v7 }
  0x5c   :  { %3241 = vmatmul.mubr.msk.f32.gmra.mrb[38].mxu0 %vm79_vm0, %v46_v24 }
  0x5d   :  { %360 = vmatprep.mubr.f32.mxu0 %v3893_v7 }
  0x60   :  { %3242 = vmatmul.mubr.msk.f32.gmra.mrb[40].mxu0 %vm79_vm0, %v47_v27 }
  0x61   :  { %366 = vmatprep.mubr.f32.mxu0 %v3893_v7 }
  0x64   :  { %3243 = vmatmul.mubr.msk.f32.gmra.mrb[42].mxu0 %vm79_vm0, %v48_v29 }
  0x65   :  { %372 = vmatprep.mubr.f32.mxu0 %v3893_v7 }
  0x68   :  { %3244 = vmatmul.mubr.msk.f32.gmra.mrb[44].mxu0 %vm79_vm0, %v49_v32 }
  0x69   :  { %378 = vmatprep.mubr.f32.mxu0 %v3893_v7 }
  0x6c   :  { %3245 = vmatmul.mubr.msk.f32.gmra.mrb[46].mxu0 %vm79_vm0, %v50_v34 }
  0x6d   :  { %384 = vmatprep.mubr.f32.mxu0 %v3893_v7 }
  0x70   :  { %3246 = vmatmul.mubr.msk.f32.gmra.mrb[48].mxu0 %vm79_vm0, %v51_v35 }
  0x71   :  { %390 = vmatprep.mubr.f32.mxu0 %v3893_v7 }
  0x74   :  { %3247 = vmatmul.mubr.msk.f32.gmra.mrb[50].mxu0 %vm79_vm0, %v52_v36 }
  0x75   :  { %396 = vmatprep.mubr.f32.mxu0 %v3893_v7 }
  0x78   :  { %3248 = vmatmul.mubr.msk.f32.gmra.mrb[52].mxu0 %vm79_vm0, %v53_v37 }
  0x79   :  { %402 = vmatprep.mubr.f32.mxu0 %v3893_v7 }
  0x7c   :  { %3249 = vmatmul.mubr.msk.f32.gmra.mrb[54].mxu0 %vm79_vm0, %v54_v38 }
  0x7d   :  { %408 = vmatprep.mubr.f32.mxu0 %v3893_v7 }
  0x80   :  { %3250 = vmatmul.mubr.msk.f32.gmra.mrb[56].mxu0 %vm79_vm0, %v55_v39 }
  0x81   :  { %414 = vmatprep.mubr.f32.mxu0 %v3893_v7 }
  0x84   :  { %3251 = vmatmul.mubr.msk.f32.gmra.mrb[58].mxu0 %vm79_vm0, %v56_v40 }
  0x85   :  { %420 = vmatprep.mubr.f32.mxu0 %v3893_v7 }
  0x88   :  { %3252 = vmatmul.mubr.msk.f32.gmra.mrb[60].mxu0 %vm79_vm0, %v57_v41 }
  0x89   :  { %426 = vmatprep.mubr.f32.mxu0 %v3893_v7 }
  0x8c   :  { %3253 = vmatmul.mubr.msk.f32.gmra.mrb[62].mxu0 %vm79_vm0, %v58_v42 }
  0xdf   :  { %v242_v7 = vpop.f32.mrb[0].mxu0 }
  0xe0   :  { %v243_v50 = vadd.f32 %v242_v7, %v4287_v48  ;;  %v244_v51 = vpop.f32.mrb[1].mxu0 }
  0xe1   :  { %v245_v52 = vadd.f32 %v244_v51, %v4289_v49 }
  0xe2   :  { %v433_v55 = vmax.f32 %v243_v50, 0.0 }
  0xe3   :  { %v248_v53 = vpop.f32.mrb[2].mxu0  ;;  %v434_v54 = vmax.f32 %v245_v52, 0.0 }
  0xe4   :  { %v249_v56 = vadd.f32 %v248_v53, %v4287_v48  ;;  %v250_v57 = vpop.f32.mrb[3].mxu0 }
  0xe5   :  { %v251_v58 = vadd.f32 %v250_v57, %v4289_v49  ;;  %600 = vmatprep.mubr.f32.mxu1 %v434_v54 }
  0xe6   :  { %601 = vmatmul.mubr.f32.vlgmr.msra.gmra.mrb[0].mxu1 %v433_v55  ;;  %v435_v61 = vmax.f32 %v249_v56, 0.0 }
  0xe7   :  { %v436_v59 = vmax.f32 %v251_v58, 0.0  ;;  %v254_v60 = vpop.f32.mrb[4].mxu0  ;;  %3467 = vmatpush3.bf16.msra.mxu1 %v4173_v18 }
  0xe8   :  { %v255_v62 = vadd.f32 %v254_v60, %v4287_v48  ;;  %v256_v63 = vpop.f32.mrb[5].mxu0  ;;  %3464 = vmatprep.subr.bf16.mxu1 %v4193_v23 }
  0xe9   :  { %605 = vmatprep.mubr.f32.mxu1 %v436_v59  ;;  %v257_v0 = vadd.f32 %v256_v63, %v4289_v49 }
  0xea   :  { %606 = vmatmul.mubr.f32.gmra.mrb[2].mxu1 %v435_v61  ;;  %v437_v1 = vmax.f32 %v255_v62, 0.0 }
  0xeb   :  { %v438_v2 = vmax.f32 %v257_v0, 0.0  ;;  %v260_v3 = vpop.f32.mrb[6].mxu0  ;;  %3468 = vmatpush3.bf16.msra.mxu1 %v4193_v23 }
  0xec   :  { %v261_v4 = vadd.f32 %v260_v3, %v4287_v48  ;;  %v262_v5 = vpop.f32.mrb[7].mxu0  ;;  %3465 = vmatprep.subr.bf16.mxu1 %v4213_v28 }
  0xed   :  { %v263_v6 = vadd.f32 %v262_v5, %v4289_v49  ;;  %610 = vmatprep.mubr.f32.mxu1 %v438_v2 }
  0xee   :  { %v439_v9 = vmax.f32 %v261_v4, 0.0  ;;  %611 = vmatmul.mubr.f32.gmra.mrb[4].mxu1 %v437_v1 }
  0xef   :  { %v440_v10 = vmax.f32 %v263_v6, 0.0  ;;  %v266_v11 = vpop.f32.mrb[8].mxu0  ;;  %3469 = vmatpush3.bf16.msra.mxu1 %v4213_v28 }
  0xf0   :  { %v267_v12 = vadd.f32 %v266_v11, %v4287_v48  ;;  %v268_v8 = vpop.f32.mrb[9].mxu0  ;;  %3466 = vmatprep.subr.bf16.mxu1 %v4233_v33 }
  0xf1   :  { %615 = vmatprep.mubr.f32.mxu1 %v440_v10  ;;  %v269_v13 = vadd.f32 %v268_v8, %v4289_v49 }
  0xf2   :  { %616 = vmatmul.mubr.f32.gmra.mrb[6].mxu1 %v439_v9  ;;  %v441_v14 = vmax.f32 %v267_v12, 0.0 }
  0xf3   :  { %v442_v15 = vmax.f32 %v269_v13, 0.0  ;;  %v272_v16 = vpop.f32.mrb[10].mxu0  ;;  %3470 = vmatpush3.bf16.msra.mxu1 %v4233_v33 }
  0xf4   :  { %v273_v17 = vadd.f32 %v272_v16, %v4287_v48  ;;  %v274_v18 = vpop.f32.mrb[11].mxu0 }
  0xf5   :  { %v275_v19 = vadd.f32 %v274_v18, %v4289_v49  ;;  %620 = vmatprep.mubr.f32.mxu1 %v442_v15 }
  0xf6   :  { %v443_v20 = vmax.f32 %v273_v17, 0.0  ;;  %621 = vmatmul.mubr.f32.gmra.mrb[8].mxu1 %v441_v14 }
  0xf7   :  { %v444_v21 = vmax.f32 %v275_v19, 0.0  ;;  %v278_v22 = vpop.f32.mrb[12].mxu0 }
  0xf8   :  { %v279_v23 = vadd.f32 %v278_v22, %v4287_v48  ;;  %v280_v24 = vpop.f32.mrb[13].mxu0 }
  0xf9   :  { %625 = vmatprep.mubr.f32.mxu1 %v444_v21  ;;  %v281_v25 = vadd.f32 %v280_v24, %v4289_v49 }
  0xfa   :  { %626 = vmatmul.mubr.f32.gmra.mrb[10].mxu1 %v443_v20  ;;  %v445_v26 = vmax.f32 %v279_v23, 0.0 }
  0xfb   :  { %v446_v27 = vmax.f32 %v281_v25, 0.0  ;;  %v284_v28 = vpop.f32.mrb[14].mxu0 }
  0xfc   :  { %v285_v29 = vadd.f32 %v284_v28, %v4287_v48  ;;  %v286_v30 = vpop.f32.mrb[15].mxu0 }
  0xfd   :  { %v287_v31 = vadd.f32 %v286_v30, %v4289_v49  ;;  %630 = vmatprep.mubr.f32.mxu1 %v446_v27 }
  0xfe   :  { %v447_v32 = vmax.f32 %v285_v29, 0.0  ;;  %631 = vmatmul.mubr.f32.gmra.mrb[12].mxu1 %v445_v26 }
  0xff   :  { %v448_v33 = vmax.f32 %v287_v31, 0.0  ;;  %v290_v34 = vpop.f32.mrb[16].mxu0 }
 0x100   :  { %v291_v35 = vadd.f32 %v290_v34, %v4287_v48  ;;  %v292_v36 = vpop.f32.mrb[17].mxu0 }
 0x101   :  { %635 = vmatprep.mubr.f32.mxu1 %v448_v33  ;;  %v293_v37 = vadd.f32 %v292_v36, %v4289_v49 }
 0x102   :  { %636 = vmatmul.mubr.f32.gmra.mrb[14].mxu1 %v447_v32  ;;  %v449_v38 = vmax.f32 %v291_v35, 0.0 }
 0x103   :  { %v450_v39 = vmax.f32 %v293_v37, 0.0  ;;  %v296_v40 = vpop.f32.mrb[18].mxu0 }
 0x104   :  { %v297_v41 = vadd.f32 %v296_v40, %v4287_v48  ;;  %v298_v42 = vpop.f32.mrb[19].mxu0 }
 0x105   :  { %v299_v44 = vadd.f32 %v298_v42, %v4289_v49  ;;  %640 = vmatprep.mubr.f32.mxu1 %v450_v39 }
 0x106   :  { %v451_v45 = vmax.f32 %v297_v41, 0.0  ;;  %641 = vmatmul.mubr.f32.gmra.mrb[16].mxu1 %v449_v38 }
 0x107   :  { %v452_v46 = vmax.f32 %v299_v44, 0.0  ;;  %v302_v47 = vpop.f32.mrb[20].mxu0 }
 0x108   :  { %v303_v7 = vadd.f32 %v302_v47, %v4287_v48  ;;  %v304_v50 = vpop.f32.mrb[21].mxu0 }
 0x109   :  { %645 = vmatprep.mubr.f32.mxu1 %v452_v46  ;;  %v305_v51 = vadd.f32 %v304_v50, %v4289_v49 }
 0x10a   :  { %646 = vmatmul.mubr.f32.gmra.mrb[18].mxu1 %v451_v45  ;;  %v453_v52 = vmax.f32 %v303_v7, 0.0 }
 0x10b   :  { %v454_v53 = vmax.f32 %v305_v51, 0.0  ;;  %v308_v54 = vpop.f32.mrb[22].mxu0 }
 0x10c   :  { %v309_v55 = vadd.f32 %v308_v54, %v4287_v48  ;;  %v310_v56 = vpop.f32.mrb[23].mxu0 }
 0x10d   :  { %v311_v57 = vadd.f32 %v310_v56, %v4289_v49  ;;  %650 = vmatprep.mubr.f32.mxu1 %v454_v53 }
 0x10e   :  { %v455_v58 = vmax.f32 %v309_v55, 0.0  ;;  %651 = vmatmul.mubr.f32.gmra.mrb[20].mxu1 %v453_v52 }
 0x10f   :  { %v456_v59 = vmax.f32 %v311_v57, 0.0  ;;  %v314_v60 = vpop.f32.mrb[24].mxu0 }
 0x110   :  { %v315_v61 = vadd.f32 %v314_v60, %v4287_v48  ;;  %v316_v62 = vpop.f32.mrb[25].mxu0 }
 0x111   :  { %655 = vmatprep.mubr.f32.mxu1 %v456_v59  ;;  %v317_v63 = vadd.f32 %v316_v62, %v4289_v49 }
 0x112   :  { %656 = vmatmul.mubr.f32.gmra.mrb[22].mxu1 %v455_v58  ;;  %v457_v0 = vmax.f32 %v315_v61, 0.0 }
 0x113   :  { %v458_v2 = vmax.f32 %v317_v63, 0.0  ;;  %v6735_v63 = vmov 0  }
 0x114   :  { %3485 = vset.pattern.permute.xlu1 %v6735_v63 }
 0x115   :  { %660 = vmatprep.mubr.f32.mxu1 %v458_v2 }
 0x116   :  { %661 = vmatmul.mubr.f32.gmra.mrb[24].mxu1 %v457_v0  ;;  %v6749_v0 = vmov 7  }
 0x117   :  { %v320_v1 = vpop.f32.mrb[26].mxu0  ;;  %3484 = vset.pattern.permute.xlu0 %v6749_v0 }
 0x118   :  { %v321_v3 = vadd.f32 %v320_v1, %v4287_v48  ;;  %v322_v4 = vpop.f32.mrb[27].mxu0 }
 0x119   :  { %v323_v5 = vadd.f32 %v322_v4, %v4289_v49 }
 0x11a   :  { %v459_v6 = vmax.f32 %v321_v3, 0.0 }
 0x11b   :  { %v460_v9 = vmax.f32 %v323_v5, 0.0  ;;  %v326_v10 = vpop.f32.mrb[28].mxu0 }
 0x11c   :  { %v327_v11 = vadd.f32 %v326_v10, %v4287_v48  ;;  %v328_v12 = vpop.f32.mrb[29].mxu0 }
 0x11d   :  { %665 = vmatprep.mubr.f32.mxu1 %v460_v9  ;;  %v329_v8 = vadd.f32 %v328_v12, %v4289_v49 }
 0x11e   :  { %666 = vmatmul.mubr.f32.gmra.mrb[26].mxu1 %v459_v6  ;;  %v461_v14 = vmax.f32 %v327_v11, 0.0 }
 0x11f   :  { %v332_v13 = vpop.f32.mrb[30].mxu0  ;;  %v462_v17 = vmax.f32 %v329_v8, 0.0 }
 0x120   :  { %v333_v15 = vadd.f32 %v332_v13, %v4287_v48  ;;  %v334_v16 = vpop.f32.mrb[31].mxu0 }
 0x121   :  { %v335_v18 = vadd.f32 %v334_v16, %v4289_v49  ;;  %670 = vmatprep.mubr.f32.mxu1 %v462_v17 }
 0x122   :  { %v463_v20 = vmax.f32 %v333_v15, 0.0  ;;  %671 = vmatmul.mubr.f32.gmra.mrb[28].mxu1 %v461_v14 }
 0x123   :  { %v464_v19 = vmax.f32 %v335_v18, 0.0  ;;  %v338_v21 = vpop.f32.mrb[32].mxu0 }
 0x124   :  { %v339_v22 = vadd.f32 %v338_v21, %v4287_v48  ;;  %v340_v23 = vpop.f32.mrb[33].mxu0 }
 0x125   :  { %675 = vmatprep.mubr.f32.mxu1 %v464_v19  ;;  %v341_v24 = vadd.f32 %v340_v23, %v4289_v49 }
 0x126   :  { %676 = vmatmul.mubr.f32.gmra.mrb[30].mxu1 %v463_v20  ;;  %v465_v26 = vmax.f32 %v339_v22, 0.0 }
 0x127   :  { %v344_v25 = vpop.f32.mrb[34].mxu0  ;;  %v466_v29 = vmax.f32 %v341_v24, 0.0 }
 0x128   :  { %v345_v27 = vadd.f32 %v344_v25, %v4287_v48  ;;  %v346_v28 = vpop.f32.mrb[35].mxu0 }
 0x129   :  { %v347_v30 = vadd.f32 %v346_v28, %v4289_v49  ;;  %680 = vmatprep.mubr.f32.mxu1 %v466_v29 }
 0x12a   :  { %v467_v32 = vmax.f32 %v345_v27, 0.0  ;;  %681 = vmatmul.mubr.f32.gmra.mrb[32].mxu1 %v465_v26 }
 0x12b   :  { %v468_v31 = vmax.f32 %v347_v30, 0.0  ;;  %v350_v33 = vpop.f32.mrb[36].mxu0 }
 0x12c   :  { %v351_v34 = vadd.f32 %v350_v33, %v4287_v48  ;;  %v352_v35 = vpop.f32.mrb[37].mxu0 }
 0x12d   :  { %685 = vmatprep.mubr.f32.mxu1 %v468_v31  ;;  %v353_v36 = vadd.f32 %v352_v35, %v4289_v49 }
 0x12e   :  { %686 = vmatmul.mubr.f32.gmra.mrb[34].mxu1 %v467_v32  ;;  %v469_v38 = vmax.f32 %v351_v34, 0.0 }
 0x12f   :  { %v356_v37 = vpop.f32.mrb[38].mxu0  ;;  %v470_v41 = vmax.f32 %v353_v36, 0.0 }
 0x130   :  { %v357_v39 = vadd.f32 %v356_v37, %v4287_v48  ;;  %v358_v40 = vpop.f32.mrb[39].mxu0 }
 0x131   :  { %v359_v42 = vadd.f32 %v358_v40, %v4289_v49  ;;  %690 = vmatprep.mubr.f32.mxu1 %v470_v41 }
 0x132   :  { %v471_v45 = vmax.f32 %v357_v39, 0.0  ;;  %691 = vmatmul.mubr.f32.gmra.mrb[36].mxu1 %v469_v38 }
 0x133   :  { %v472_v44 = vmax.f32 %v359_v42, 0.0  ;;  %v362_v46 = vpop.f32.mrb[40].mxu0 }
 0x134   :  { %v363_v47 = vadd.f32 %v362_v46, %v4287_v48  ;;  %v364_v7 = vpop.f32.mrb[41].mxu0 }
 0x135   :  { %695 = vmatprep.mubr.f32.mxu1 %v472_v44  ;;  %v365_v50 = vadd.f32 %v364_v7, %v4289_v49 }
 0x136   :  { %696 = vmatmul.mubr.f32.gmra.mrb[38].mxu1 %v471_v45  ;;  %v473_v52 = vmax.f32 %v363_v47, 0.0 }
 0x137   :  { %v368_v51 = vpop.f32.mrb[42].mxu0  ;;  %v474_v55 = vmax.f32 %v365_v50, 0.0 }
 0x138   :  { %v369_v53 = vadd.f32 %v368_v51, %v4287_v48  ;;  %v370_v54 = vpop.f32.mrb[43].mxu0 }
 0x139   :  { %v371_v56 = vadd.f32 %v370_v54, %v4289_v49  ;;  %700 = vmatprep.mubr.f32.mxu1 %v474_v55 }
 0x13a   :  { %v475_v59 = vmax.f32 %v369_v53, 0.0  ;;  %701 = vmatmul.mubr.f32.gmra.mrb[40].mxu1 %v473_v52 }
 0x13b   :  { %v476_v57 = vmax.f32 %v371_v56, 0.0  ;;  %v374_v58 = vpop.f32.mrb[44].mxu0 }
 0x13c   :  { %v375_v60 = vadd.f32 %v374_v58, %v4287_v48  ;;  %v376_v61 = vpop.f32.mrb[45].mxu0 }
 0x13d   :  { %v377_v62 = vadd.f32 %v376_v61, %v4289_v49  ;;  %705 = vmatprep.mubr.f32.mxu1 %v476_v57 }
 0x13e   :  { %v477_v3 = vmax.f32 %v375_v60, 0.0  ;;  %706 = vmatmul.mubr.f32.gmra.mrb[42].mxu1 %v475_v59  ;;  %v4367_v60 = vld [vmem:[%s6731_s5] ss:$0 sm:$0xff] }
 0x13f   :  { %v478_v1 = vmax.f32 %v377_v62, 0.0  ;;  %v380_v2 = vpop.f32.mrb[46].mxu0 }
 0x140   :  { %v381_v4 = vadd.f32 %v380_v2, %v4287_v48  ;;  %v382_v5 = vpop.f32.mrb[47].mxu0 }
 0x141   :  { %v383_v6 = vadd.f32 %v382_v5, %v4289_v49  ;;  %710 = vmatprep.mubr.f32.mxu1 %v478_v1 }
 0x142   :  { %v479_v11 = vmax.f32 %v381_v4, 0.0  ;;  %711 = vmatmul.mubr.f32.gmra.mrb[44].mxu1 %v477_v3 }
 0x143   :  { %v480_v9 = vmax.f32 %v383_v6, 0.0  ;;  %v386_v10 = vpop.f32.mrb[48].mxu0 }
 0x144   :  { %v387_v12 = vadd.f32 %v386_v10, %v4287_v48  ;;  %v388_v8 = vpop.f32.mrb[49].mxu0 }
 0x145   :  { %v389_v13 = vadd.f32 %v388_v8, %v4289_v49  ;;  %715 = vmatprep.mubr.f32.mxu1 %v480_v9 }
 0x146   :  { %v481_v16 = vmax.f32 %v387_v12, 0.0  ;;  %716 = vmatmul.mubr.f32.gmra.mrb[46].mxu1 %v479_v11 }
 0x147   :  { %v482_v14 = vmax.f32 %v389_v13, 0.0  ;;  %v392_v15 = vpop.f32.mrb[50].mxu0 }
 0x148   :  { %v393_v17 = vadd.f32 %v392_v15, %v4287_v48  ;;  %v394_v18 = vpop.f32.mrb[51].mxu0 }
 0x149   :  { %v395_v19 = vadd.f32 %v394_v18, %v4289_v49  ;;  %720 = vmatprep.mubr.f32.mxu1 %v482_v14 }
 0x14a   :  { %v483_v22 = vmax.f32 %v393_v17, 0.0  ;;  %721 = vmatmul.mubr.f32.gmra.mrb[48].mxu1 %v481_v16 }
 0x14b   :  { %v484_v20 = vmax.f32 %v395_v19, 0.0  ;;  %v398_v21 = vpop.f32.mrb[52].mxu0 }
 0x14c   :  { %v399_v23 = vadd.f32 %v398_v21, %v4287_v48  ;;  %v400_v24 = vpop.f32.mrb[53].mxu0 }
 0x14d   :  { %v401_v25 = vadd.f32 %v400_v24, %v4289_v49  ;;  %725 = vmatprep.mubr.f32.mxu1 %v484_v20 }
 0x14e   :  { %v485_v28 = vmax.f32 %v399_v23, 0.0  ;;  %726 = vmatmul.mubr.f32.gmra.mrb[50].mxu1 %v483_v22 }
 0x14f   :  { %v486_v26 = vmax.f32 %v401_v25, 0.0  ;;  %v404_v27 = vpop.f32.mrb[54].mxu0 }
 0x150   :  { %v405_v29 = vadd.f32 %v404_v27, %v4287_v48  ;;  %v406_v30 = vpop.f32.mrb[55].mxu0 }
 0x151   :  { %v407_v31 = vadd.f32 %v406_v30, %v4289_v49  ;;  %730 = vmatprep.mubr.f32.mxu1 %v486_v26 }
 0x152   :  { %v487_v34 = vmax.f32 %v405_v29, 0.0  ;;  %731 = vmatmul.mubr.f32.gmra.mrb[52].mxu1 %v485_v28 }
 0x153   :  { %v488_v32 = vmax.f32 %v407_v31, 0.0  ;;  %v410_v33 = vpop.f32.mrb[56].mxu0 }
 0x154   :  { %v411_v35 = vadd.f32 %v410_v33, %v4287_v48  ;;  %v412_v36 = vpop.f32.mrb[57].mxu0 }
 0x155   :  { %v413_v37 = vadd.f32 %v412_v36, %v4289_v49  ;;  %735 = vmatprep.mubr.f32.mxu1 %v488_v32 }
 0x156   :  { %v489_v40 = vmax.f32 %v411_v35, 0.0  ;;  %736 = vmatmul.mubr.f32.gmra.mrb[54].mxu1 %v487_v34 }
 0x157   :  { %v490_v38 = vmax.f32 %v413_v37, 0.0  ;;  %v416_v39 = vpop.f32.mrb[58].mxu0 }
 0x158   :  { %v417_v41 = vadd.f32 %v416_v39, %v4287_v48  ;;  %v418_v42 = vpop.f32.mrb[59].mxu0 }
 0x159   :  { %v419_v44 = vadd.f32 %v418_v42, %v4289_v49  ;;  %740 = vmatprep.mubr.f32.mxu1 %v490_v38 }
 0x15a   :  { %v491_v47 = vmax.f32 %v417_v41, 0.0  ;;  %741 = vmatmul.mubr.f32.gmra.mrb[56].mxu1 %v489_v40 }
 0x15b   :  { %v492_v45 = vmax.f32 %v419_v44, 0.0  ;;  %v422_v46 = vpop.f32.mrb[60].mxu0 }
 0x15c   :  { %v423_v7 = vadd.f32 %v422_v46, %v4287_v48  ;;  %v424_v50 = vpop.f32.mrb[61].mxu0 }
 0x15d   :  { %v425_v51 = vadd.f32 %v424_v50, %v4289_v49  ;;  %745 = vmatprep.mubr.f32.mxu1 %v492_v45 }
 0x15e   :  { %v493_v54 = vmax.f32 %v423_v7, 0.0  ;;  %746 = vmatmul.mubr.f32.gmra.mrb[58].mxu1 %v491_v47 }
 0x15f   :  { %v494_v52 = vmax.f32 %v425_v51, 0.0  ;;  %v428_v53 = vpop.f32.mrb[62].mxu0 }
 0x160   :  { %v429_v55 = vadd.f32 %v428_v53, %v4287_v48  ;;  %v430_v56 = vpop.f32.mrb[63].mxu0 }
 0x161   :  { %v431_v57 = vadd.f32 %v430_v56, %v4289_v49  ;;  %750 = vmatprep.mubr.f32.mxu1 %v494_v52 }
 0x162   :  { %v495_v59 = vmax.f32 %v429_v55, 0.0  ;;  %751 = vmatmul.mubr.f32.gmra.mrb[60].mxu1 %v493_v54 }
 0x163   :  { %v496_v58 = vmax.f32 %v431_v57, 0.0 }
 0x165   :  { %755 = vmatprep.mubr.f32.mxu1 %v496_v58 }
 0x166   :  { %756 = vmatmul.mubr.f32.gmra.mrb[62].mxu1 %v495_v59 }
 0x1b9   :  { %v602_v61 = vpop.f32.mrb[0].mxu1 }
 0x1ba   :  { %v603_v62 = vadd.f32 %v4367_v60, %v602_v61  ;;  %v604_v1 = vpop.f32.mrb[1].mxu1 }
 0x1bb   :  { %v6739_v1 = vmov 2  }
 0x1bc   :  { %3343 = vmatprep.mubr.msk.f32.mxu0 %vm769_vm1, %v603_v62 }
 0x1bd   :  { %v607_v48 = vpop.f32.mrb[2].mxu1 }
 0x1be   :  { %v608_v49 = vadd.f32 %v4367_v60, %v607_v48  ;;  %v609_v2 = vpop.f32.mrb[3].mxu1  ;;  %v6747_v48 = vmov 1  }
 0x1c0   :  { %3344 = vmatmul.mubr.msk.f32.vlgmr.msra.gmra.mrb[64].mxu0 %vm769_vm1, %v608_v49 }
 0x1c1   :  { %v612_v3 = vpop.f32.mrb[4].mxu1 }
 0x1c2   :  { %v613_v4 = vadd.f32 %v4367_v60, %v612_v3  ;;  %v614_v5 = vpop.f32.mrb[5].mxu1  ;;  %v6743_v3 = vmov 4  }
 0x1c3   :  { %v6745_v5 = vmov 6  }
 0x1c4   :  { %3346 = vmatprep.mubr.msk.f32.mxu0 %vm769_vm1, %v613_v4  ;;  %v6741_v4 = vmov 3  }
 0x1c5   :  { %v617_v6 = vpop.f32.mrb[6].mxu1 }
 0x1c6   :  { %v618_v9 = vadd.f32 %v4367_v60, %v617_v6  ;;  %v619_v10 = vpop.f32.mrb[7].mxu1  ;;  %v6737_v6 = vmov 5  }
 0x1c8   :  { %3347 = vmatmul.mubr.msk.f32.gmra.mrb[66].mxu0 %vm769_vm1, %v618_v9 }
 0x1c9   :  { %v622_v11 = vpop.f32.mrb[8].mxu1 }
 0x1ca   :  { %v623_v12 = vadd.f32 %v4367_v60, %v622_v11  ;;  %v624_v8 = vpop.f32.mrb[9].mxu1 }
 0x1cc   :  { %3349 = vmatprep.mubr.msk.f32.mxu0 %vm769_vm1, %v623_v12 }
 0x1cd   :  { %v627_v13 = vpop.f32.mrb[10].mxu1 }
 0x1ce   :  { %v628_v14 = vadd.f32 %v4367_v60, %v627_v13  ;;  %v629_v15 = vpop.f32.mrb[11].mxu1 }
 0x1d0   :  { %3350 = vmatmul.mubr.msk.f32.gmra.mrb[68].mxu0 %vm769_vm1, %v628_v14 }
 0x1d1   :  { %v632_v16 = vpop.f32.mrb[12].mxu1 }
 0x1d2   :  { %v633_v17 = vadd.f32 %v4367_v60, %v632_v16  ;;  %v634_v18 = vpop.f32.mrb[13].mxu1 }
 0x1d4   :  { %3352 = vmatprep.mubr.msk.f32.mxu0 %vm769_vm1, %v633_v17 }
 0x1d5   :  { %v637_v19 = vpop.f32.mrb[14].mxu1 }
 0x1d6   :  { %v638_v20 = vadd.f32 %v4367_v60, %v637_v19  ;;  %v639_v21 = vpop.f32.mrb[15].mxu1 }
 0x1d8   :  { %3353 = vmatmul.mubr.msk.f32.gmra.mrb[70].mxu0 %vm769_vm1, %v638_v20 }
 0x1d9   :  { %v642_v22 = vpop.f32.mrb[16].mxu1 }
 0x1da   :  { %v643_v23 = vadd.f32 %v4367_v60, %v642_v22  ;;  %v644_v24 = vpop.f32.mrb[17].mxu1 }
 0x1dc   :  { %3355 = vmatprep.mubr.msk.f32.mxu0 %vm769_vm1, %v643_v23 }
 0x1dd   :  { %v647_v25 = vpop.f32.mrb[18].mxu1 }
 0x1de   :  { %v648_v26 = vadd.f32 %v4367_v60, %v647_v25  ;;  %v649_v27 = vpop.f32.mrb[19].mxu1 }
 0x1e0   :  { %3356 = vmatmul.mubr.msk.f32.gmra.mrb[72].mxu0 %vm769_vm1, %v648_v26 }
 0x1e1   :  { %v652_v28 = vpop.f32.mrb[20].mxu1 }
 0x1e2   :  { %v653_v29 = vadd.f32 %v4367_v60, %v652_v28  ;;  %v654_v30 = vpop.f32.mrb[21].mxu1 }
 0x1e4   :  { %3358 = vmatprep.mubr.msk.f32.mxu0 %vm769_vm1, %v653_v29 }
 0x1e5   :  { %v657_v31 = vpop.f32.mrb[22].mxu1 }
 0x1e6   :  { %v658_v32 = vadd.f32 %v4367_v60, %v657_v31  ;;  %v659_v33 = vpop.f32.mrb[23].mxu1 }
 0x1e8   :  { %3359 = vmatmul.mubr.msk.f32.gmra.mrb[74].mxu0 %vm769_vm1, %v658_v32 }
 0x1e9   :  { %v662_v34 = vpop.f32.mrb[24].mxu1 }
 0x1ea   :  { %v663_v35 = vadd.f32 %v4367_v60, %v662_v34  ;;  %v664_v36 = vpop.f32.mrb[25].mxu1 }
 0x1ec   :  { %3361 = vmatprep.mubr.msk.f32.mxu0 %vm769_vm1, %v663_v35 }
 0x1f1   :  { %v667_v37 = vpop.f32.mrb[26].mxu1 }
 0x1f2   :  { %v668_v38 = vadd.f32 %v4367_v60, %v667_v37  ;;  %v669_v39 = vpop.f32.mrb[27].mxu1 }
 0x1f4   :  { %3362 = vmatmul.mubr.msk.f32.gmra.mrb[76].mxu0 %vm769_vm1, %v668_v38 }
 0x1f5   :  { %v672_v40 = vpop.f32.mrb[28].mxu1 }
 0x1f6   :  { %v673_v41 = vadd.f32 %v4367_v60, %v672_v40  ;;  %v674_v42 = vpop.f32.mrb[29].mxu1 }
 0x1f8   :  { %3364 = vmatprep.mubr.msk.f32.mxu0 %vm769_vm1, %v673_v41 }
 0x1f9   :  { %v677_v44 = vpop.f32.mrb[30].mxu1 }
 0x1fa   :  { %v678_v45 = vadd.f32 %v4367_v60, %v677_v44  ;;  %v679_v46 = vpop.f32.mrb[31].mxu1 }
 0x1fc   :  { %3365 = vmatmul.mubr.msk.f32.gmra.mrb[78].mxu0 %vm769_vm1, %v678_v45 }
 0x1fd   :  { %v682_v47 = vpop.f32.mrb[32].mxu1 }
 0x1fe   :  { %v683_v7 = vadd.f32 %v4367_v60, %v682_v47  ;;  %v684_v50 = vpop.f32.mrb[33].mxu1 }
 0x200   :  { %3367 = vmatprep.mubr.msk.f32.mxu0 %vm769_vm1, %v683_v7 }
 0x201   :  { %v687_v51 = vpop.f32.mrb[34].mxu1 }
 0x202   :  { %v688_v52 = vadd.f32 %v4367_v60, %v687_v51  ;;  %v689_v53 = vpop.f32.mrb[35].mxu1 }
 0x204   :  { %3368 = vmatmul.mubr.msk.f32.gmra.mrb[80].mxu0 %vm769_vm1, %v688_v52 }
 0x205   :  { %v692_v56 = vpop.f32.mrb[36].mxu1 }
 0x206   :  { %v693_v57 = vadd.f32 %v4367_v60, %v692_v56  ;;  %v694_v58 = vpop.f32.mrb[37].mxu1 }
 0x208   :  { %3370 = vmatprep.mubr.msk.f32.mxu0 %vm769_vm1, %v693_v57 }
 0x209   :  { %v697_v59 = vpop.f32.mrb[38].mxu1 }
 0x20a   :  { %v698_v61 = vadd.f32 %v4367_v60, %v697_v59  ;;  %v699_v62 = vpop.f32.mrb[39].mxu1 }
 0x20c   :  { %3371 = vmatmul.mubr.msk.f32.gmra.mrb[82].mxu0 %vm769_vm1, %v698_v61 }
 0x20d   :  { %v702_v14 = vpop.f32.mrb[40].mxu1 }
 0x20e   :  { %v703_v15 = vadd.f32 %v4367_v60, %v702_v14  ;;  %v704_v16 = vpop.f32.mrb[41].mxu1 }
 0x210   :  { %3373 = vmatprep.mubr.msk.f32.mxu0 %vm769_vm1, %v703_v15 }
 0x211   :  { %v707_v17 = vpop.f32.mrb[42].mxu1 }
 0x212   :  { %v708_v18 = vadd.f32 %v4367_v60, %v707_v17  ;;  %v709_v19 = vpop.f32.mrb[43].mxu1 }
 0x214   :  { %3374 = vmatmul.mubr.msk.f32.gmra.mrb[84].mxu0 %vm769_vm1, %v708_v18 }
 0x215   :  { %v712_v20 = vpop.f32.mrb[44].mxu1 }
 0x216   :  { %v713_v21 = vadd.f32 %v4367_v60, %v712_v20  ;;  %v714_v22 = vpop.f32.mrb[45].mxu1 }
 0x218   :  { %3376 = vmatprep.mubr.msk.f32.mxu0 %vm769_vm1, %v713_v21 }
 0x219   :  { %v717_v23 = vpop.f32.mrb[46].mxu1 }
 0x21a   :  { %v718_v24 = vadd.f32 %v4367_v60, %v717_v23  ;;  %v719_v25 = vpop.f32.mrb[47].mxu1 }
 0x21c   :  { %3377 = vmatmul.mubr.msk.f32.gmra.mrb[86].mxu0 %vm769_vm1, %v718_v24 }
 0x21d   :  { %v722_v26 = vpop.f32.mrb[48].mxu1 }
 0x21e   :  { %v723_v27 = vadd.f32 %v4367_v60, %v722_v26  ;;  %v724_v28 = vpop.f32.mrb[49].mxu1 }
 0x220   :  { %3379 = vmatprep.mubr.msk.f32.mxu0 %vm769_vm1, %v723_v27 }
 0x221   :  { %v727_v30 = vpop.f32.mrb[50].mxu1 }
 0x222   :  { %v728_v31 = vadd.f32 %v4367_v60, %v727_v30  ;;  %v729_v32 = vpop.f32.mrb[51].mxu1 }
 0x224   :  { %3380 = vmatmul.mubr.msk.f32.gmra.mrb[88].mxu0 %vm769_vm1, %v728_v31 }
 0x225   :  { %v732_v33 = vpop.f32.mrb[52].mxu1 }
 0x226   :  { %v733_v34 = vadd.f32 %v4367_v60, %v732_v33  ;;  %v734_v35 = vpop.f32.mrb[53].mxu1 }
 0x228   :  { %3382 = vmatprep.mubr.msk.f32.mxu0 %vm769_vm1, %v733_v34 }
 0x229   :  { %v737_v36 = vpop.f32.mrb[54].mxu1 }
 0x22a   :  { %v738_v37 = vadd.f32 %v4367_v60, %v737_v36  ;;  %v739_v38 = vpop.f32.mrb[55].mxu1 }
 0x22c   :  { %3383 = vmatmul.mubr.msk.f32.gmra.mrb[90].mxu0 %vm769_vm1, %v738_v37 }
 0x22d   :  { %v742_v39 = vpop.f32.mrb[56].mxu1 }
 0x22e   :  { %v743_v40 = vadd.f32 %v4367_v60, %v742_v39  ;;  %v744_v41 = vpop.f32.mrb[57].mxu1 }
 0x230   :  { %3385 = vmatprep.mubr.msk.f32.mxu0 %vm769_vm1, %v743_v40 }
 0x231   :  { %v747_v42 = vpop.f32.mrb[58].mxu1 }
 0x232   :  { %v748_v44 = vadd.f32 %v4367_v60, %v747_v42  ;;  %v749_v45 = vpop.f32.mrb[59].mxu1 }
 0x234   :  { %3386 = vmatmul.mubr.msk.f32.gmra.mrb[92].mxu0 %vm769_vm1, %v748_v44 }
 0x235   :  { %v752_v47 = vpop.f32.mrb[60].mxu1 }
 0x236   :  { %v753_v7 = vadd.f32 %v4367_v60, %v752_v47  ;;  %v754_v50 = vpop.f32.mrb[61].mxu1 }
 0x238   :  { %3388 = vmatprep.mubr.msk.f32.mxu1 %vm769_vm1, %v753_v7 }
 0x239   :  { %v757_v51 = vpop.f32.mrb[62].mxu1 }
 0x23a   :  { %v758_v52 = vadd.f32 %v4367_v60, %v757_v51  ;;  %v759_v53 = vpop.f32.mrb[63].mxu1 }
 0x23c   :  { %3389 = vmatmul.mubr.msk.f32.vlgmr.msra.gmra.mrb[64].mxu1 %vm769_vm1, %v758_v52 }
 0x293   :  { %v3345_v54 = vpop.f32.mrb[64].mxu0 }
 0x294   :  { %1320 = vperm.xlu1 %3485, %v3345_v54   ;;  %1130 = vperm.xlu0 %3484, %v3345_v54   ;;  %v932_v55 = vpop.f32.mrb[65].mxu0 }
 0x298   :  { %3487 = vset.pattern.permute.xlu1 %v6739_v1  ;;  %3486 = vset.pattern.permute.xlu0 %v6747_v48 }
 0x299   :  { %1768 = vperm.xlu1 %3487, %v3345_v54   ;;  %1544 = vperm.xlu0 %3486, %v3345_v54  }
 0x29b   :  { %v4411_v49 = vpop.f32.mrb[66].mxu0 }
 0x29c   :  { %v4413_v2 = vpop.f32.mrb[67].mxu0 }
 0x29d   :  { %3489 = vset.pattern.permute.xlu1 %v6743_v3  ;;  %3488 = vset.pattern.permute.xlu0 %v6741_v4 }
 0x29e   :  { %2216 = vperm.xlu1 %3489, %v3345_v54   ;;  %1992 = vperm.xlu0 %3488, %v3345_v54  }
 0x2a2   :  { %3491 = vset.pattern.permute.xlu1 %v6745_v5  ;;  %3490 = vset.pattern.permute.xlu0 %v6737_v6 }
 0x2a3   :  { %2664 = vperm.xlu1 %3491, %v3345_v54   ;;  %2440 = vperm.xlu0 %3490, %v3345_v54   ;;  %v4419_v9 = vpop.f32.mrb[68].mxu0 }
 0x2a4   :  { %v4421_v10 = vpop.f32.mrb[69].mxu0 }
 0x2a7   :  { %3494 = vset.pattern.permute.xlu1 %v6747_v48  ;;  %3492 = vset.pattern.permute.xlu0 %v6749_v0 }
 0x2a8   :  { %1540 = vperm.xlu1 %3494, %v932_v55   ;;  %1125 = vperm.xlu0 %3492, %v932_v55  }
 0x2ab   :  { %v4425_v11 = vpop.f32.mrb[70].mxu0 }
 0x2ac   :  { %3496 = vset.pattern.permute.xlu1 %v6741_v4  ;;  %3493 = vset.pattern.permute.xlu0 %v6735_v63  ;;  %v4429_v12 = vpop.f32.mrb[71].mxu0 }
 0x2ad   :  { %1988 = vperm.xlu1 %3496, %v932_v55   ;;  %1316 = vperm.xlu0 %3493, %v932_v55  }
 0x2b1   :  { %3498 = vset.pattern.permute.xlu1 %v6737_v6  ;;  %3495 = vset.pattern.permute.xlu0 %v6739_v1 }
 0x2b2   :  { %2436 = vperm.xlu1 %3498, %v932_v55   ;;  %1764 = vperm.xlu0 %3495, %v932_v55  }
 0x2b3   :  { %v4433_v8 = vpop.f32.mrb[72].mxu0 }
 0x2b4   :  { %v4438_v13 = vpop.f32.mrb[73].mxu0 }
 0x2b6   :  { %3500 = vset.pattern.permute.xlu1 %v6749_v0  ;;  %3497 = vset.pattern.permute.xlu0 %v6743_v3 }
 0x2b7   :  { %2212 = vperm.xlu0 %3497, %v932_v55   ;;  %1140 = vperm.xlu1 %3500, %v4411_v49  }
 0x2bb   :  { %3499 = vset.pattern.permute.xlu0 %v6745_v5  ;;  %3502 = vset.pattern.permute.xlu1 %v6747_v48  ;;  %v4464_v29 = vpop.f32.mrb[74].mxu0 }
 0x2bc   :  { %2660 = vperm.xlu0 %3499, %v932_v55   ;;  %1552 = vperm.xlu1 %3502, %v4411_v49   ;;  %v4492_v46 = vpop.f32.mrb[75].mxu0 }
 0x2c0   :  { %3501 = vset.pattern.permute.xlu0 %v6735_v63  ;;  %3504 = vset.pattern.permute.xlu1 %v6741_v4 }
 0x2c1   :  { %1328 = vperm.xlu0 %3501, %v4411_v49   ;;  %2000 = vperm.xlu1 %3504, %v4411_v49  }
 0x2c5   :  { %3503 = vset.pattern.permute.xlu0 %v6739_v1  ;;  %3506 = vset.pattern.permute.xlu1 %v6737_v6 }
 0x2c6   :  { %1776 = vperm.xlu0 %3503, %v4411_v49   ;;  %2448 = vperm.xlu1 %3506, %v4411_v49  }
 0x2c7   :  { %v4515_v60 = vpop.f32.mrb[76].mxu0 }
 0x2c8   :  { %v4533_v54 = vpop.f32.mrb[77].mxu0 }
 0x2ca   :  { %3505 = vset.pattern.permute.xlu0 %v6743_v3  ;;  %3508 = vset.pattern.permute.xlu1 %v6749_v0 }
 0x2cb   :  { %2224 = vperm.xlu0 %3505, %v4411_v49   ;;  %1135 = vperm.xlu1 %3508, %v4413_v2  }
 0x2cf   :  { %3507 = vset.pattern.permute.xlu0 %v6745_v5  ;;  %3509 = vset.pattern.permute.xlu1 %v6735_v63  ;;  %v4559_v59 = vpop.f32.mrb[78].mxu0 }
 0x2d0   :  { %2672 = vperm.xlu0 %3507, %v4411_v49   ;;  %1324 = vperm.xlu1 %3509, %v4413_v2   ;;  %v4593_v16 = vpop.f32.mrb[79].mxu0 }
 0x2d4   :  { %3517 = vset.pattern.permute.xlu0 %v6735_v63  ;;  %3510 = vset.pattern.permute.xlu1 %v6747_v48 }
 0x2d5   :  { %1548 = vperm.xlu1 %3510, %v4413_v2   ;;  %1336 = vperm.xlu0 %3517, %v4419_v9  }
 0x2d7   :  { %v4627_v24 = vpop.f32.mrb[80].mxu0 }
 0x2d8   :  { %v4661_v33 = vpop.f32.mrb[81].mxu0 }
 0x2d9   :  { %3511 = vset.pattern.permute.xlu1 %v6739_v1  ;;  %3519 = vset.pattern.permute.xlu0 %v6739_v1 }
 0x2da   :  { %1772 = vperm.xlu1 %3511, %v4413_v2   ;;  %1784 = vperm.xlu0 %3519, %v4419_v9  }
 0x2de   :  { %3512 = vset.pattern.permute.xlu1 %v6741_v4  ;;  %3521 = vset.pattern.permute.xlu0 %v6743_v3 }
 0x2df   :  { %1996 = vperm.xlu1 %3512, %v4413_v2   ;;  %2232 = vperm.xlu0 %3521, %v4419_v9   ;;  %v4699_v44 = vpop.f32.mrb[82].mxu0 }
 0x2e0   :  { %v4729_v52 = vpop.f32.mrb[83].mxu0 }
 0x2e3   :  { %3513 = vset.pattern.permute.xlu1 %v6743_v3  ;;  %3523 = vset.pattern.permute.xlu0 %v6745_v5 }
 0x2e4   :  { %2220 = vperm.xlu1 %3513, %v4413_v2   ;;  %2680 = vperm.xlu0 %3523, %v4419_v9  }
 0x2e8   :  { %3514 = vset.pattern.permute.xlu1 %v6737_v6  ;;  %3524 = vset.pattern.permute.xlu0 %v6749_v0 }
 0x2e9   :  { %2444 = vperm.xlu1 %3514, %v4413_v2   ;;  %1145 = vperm.xlu0 %3524, %v4421_v10  }
 0x2ed   :  { %3515 = vset.pattern.permute.xlu1 %v6745_v5  ;;  %3526 = vset.pattern.permute.xlu0 %v6747_v48 }
 0x2ee   :  { %2668 = vperm.xlu1 %3515, %v4413_v2   ;;  %1556 = vperm.xlu0 %3526, %v4421_v10  }
 0x2f2   :  { %3516 = vset.pattern.permute.xlu1 %v6749_v0  ;;  %3528 = vset.pattern.permute.xlu0 %v6741_v4 }
 0x2f3   :  { %1150 = vperm.xlu1 %3516, %v4419_v9   ;;  %2004 = vperm.xlu0 %3528, %v4421_v10  }
 0x2f7   :  { %3518 = vset.pattern.permute.xlu1 %v6747_v48  ;;  %3530 = vset.pattern.permute.xlu0 %v6737_v6 }
 0x2f8   :  { %1560 = vperm.xlu1 %3518, %v4419_v9   ;;  %2452 = vperm.xlu0 %3530, %v4421_v10  }
 0x2fc   :  { %3520 = vset.pattern.permute.xlu1 %v6741_v4  ;;  %3533 = vset.pattern.permute.xlu0 %v6735_v63 }
 0x2fd   :  { %2008 = vperm.xlu1 %3520, %v4419_v9   ;;  %1344 = vperm.xlu0 %3533, %v4425_v11  }
 0x301   :  { %3522 = vset.pattern.permute.xlu1 %v6737_v6  ;;  %3535 = vset.pattern.permute.xlu0 %v6739_v1 }
 0x302   :  { %2456 = vperm.xlu1 %3522, %v4419_v9   ;;  %1792 = vperm.xlu0 %3535, %v4425_v11  }
 0x306   :  { %3525 = vset.pattern.permute.xlu1 %v6735_v63  ;;  %3537 = vset.pattern.permute.xlu0 %v6743_v3 }
 0x307   :  { %1332 = vperm.xlu1 %3525, %v4421_v10   ;;  %2240 = vperm.xlu0 %3537, %v4425_v11  }
 0x30b   :  { %3527 = vset.pattern.permute.xlu1 %v6739_v1  ;;  %3539 = vset.pattern.permute.xlu0 %v6745_v5 }
 0x30c   :  { %1780 = vperm.xlu1 %3527, %v4421_v10   ;;  %2688 = vperm.xlu0 %3539, %v4425_v11  }
 0x310   :  { %3529 = vset.pattern.permute.xlu1 %v6743_v3  ;;  %3540 = vset.pattern.permute.xlu0 %v6749_v0 }
 0x311   :  { %2228 = vperm.xlu1 %3529, %v4421_v10   ;;  %1155 = vperm.xlu0 %3540, %v4429_v12  }
 0x313   :  { %v4543_v55 = vpop.permute.xlu1 %1320  ;;  %v4545_v56 = vpop.permute.xlu0 %1130 }
 0x315   :  { %3531 = vset.pattern.permute.xlu1 %v6745_v5  ;;  %3542 = vset.pattern.permute.xlu0 %v6747_v48 }
 0x316   :  { %2676 = vperm.xlu1 %3531, %v4421_v10   ;;  %1564 = vperm.xlu0 %3542, %v4429_v12  }
 0x318   :  { %v4551_v57 = vpop.permute.xlu1 %1768  ;;  %v4553_v58 = vpop.permute.xlu0 %1544 }
 0x31a   :  { %3532 = vset.pattern.permute.xlu1 %v6749_v0  ;;  %3544 = vset.pattern.permute.xlu0 %v6741_v4 }
 0x31b   :  { %1160 = vperm.xlu1 %3532, %v4425_v11   ;;  %2012 = vperm.xlu0 %3544, %v4429_v12  }
 0x31d   :  { %v4561_v61 = vpop.permute.xlu1 %2216  ;;  %v4563_v62 = vpop.permute.xlu0 %1992 }
 0x31f   :  { %3534 = vset.pattern.permute.xlu1 %v6747_v48  ;;  %3546 = vset.pattern.permute.xlu0 %v6737_v6 }
 0x320   :  { %1568 = vperm.xlu1 %3534, %v4425_v11   ;;  %2460 = vperm.xlu0 %3546, %v4429_v12  }
 0x322   :  { %v4569_v49 = vpop.permute.xlu1 %2664  ;;  %v4571_v2 = vpop.permute.xlu0 %2440 }
 0x324   :  { %3536 = vset.pattern.permute.xlu1 %v6741_v4  ;;  %3549 = vset.pattern.permute.xlu0 %v6735_v63 }
 0x325   :  { %2016 = vperm.xlu1 %3536, %v4425_v11   ;;  %1352 = vperm.xlu0 %3549, %v4433_v8  }
 0x327   :  { %v4577_v9 = vpop.permute.xlu1 %1540  ;;  %v4579_v10 = vpop.permute.xlu0 %1125 }
 0x329   :  { %3538 = vset.pattern.permute.xlu1 %v6737_v6  ;;  %3551 = vset.pattern.permute.xlu0 %v6739_v1 }
 0x32a   :  { %2464 = vperm.xlu1 %3538, %v4425_v11   ;;  %1800 = vperm.xlu0 %3551, %v4433_v8  }
 0x32c   :  { %v4585_v14 = vpop.permute.xlu1 %1988  ;;  %v4587_v15 = vpop.permute.xlu0 %1316 }
 0x32e   :  { %3541 = vset.pattern.permute.xlu1 %v6735_v63  ;;  %3553 = vset.pattern.permute.xlu0 %v6743_v3 }
 0x32f   :  { %1340 = vperm.xlu1 %3541, %v4429_v12   ;;  %2248 = vperm.xlu0 %3553, %v4433_v8  }
 0x331   :  { %v4595_v17 = vpop.permute.xlu1 %2436  ;;  %v4597_v18 = vpop.permute.xlu0 %1764 }
 0x333   :  { %3543 = vset.pattern.permute.xlu1 %v6739_v1  ;;  %3555 = vset.pattern.permute.xlu0 %v6745_v5 }
 0x334   :  { %1788 = vperm.xlu1 %3543, %v4429_v12   ;;  %2696 = vperm.xlu0 %3555, %v4433_v8  }
 0x336   :  { %v4603_v11 = vpop.permute.xlu0 %2212  ;;  %v4605_v19 = vpop.permute.xlu1 %1140 }
 0x338   :  { %3545 = vset.pattern.permute.xlu1 %v6743_v3  ;;  %3556 = vset.pattern.permute.xlu0 %v6749_v0 }
 0x339   :  { %2236 = vperm.xlu1 %3545, %v4429_v12   ;;  %1165 = vperm.xlu0 %3556, %v4438_v13  }
 0x33b   :  { %v4611_v20 = vpop.permute.xlu0 %2660  ;;  %v4613_v21 = vpop.permute.xlu1 %1552 }
 0x33d   :  { %3547 = vset.pattern.permute.xlu1 %v6745_v5  ;;  %3558 = vset.pattern.permute.xlu0 %v6747_v48 }
 0x33e   :  { %2684 = vperm.xlu1 %3547, %v4429_v12   ;;  %1572 = vperm.xlu0 %3558, %v4438_v13  }
 0x340   :  { %v4619_v22 = vpop.permute.xlu0 %1328  ;;  %v4621_v23 = vpop.permute.xlu1 %2000 }
 0x342   :  { %3548 = vset.pattern.permute.xlu1 %v6749_v0  ;;  %3560 = vset.pattern.permute.xlu0 %v6741_v4 }
 0x343   :  { %1170 = vperm.xlu1 %3548, %v4433_v8   ;;  %2020 = vperm.xlu0 %3560, %v4438_v13  }
 0x345   :  { %v4629_v25 = vpop.permute.xlu0 %1776  ;;  %v4631_v26 = vpop.permute.xlu1 %2448 }
 0x347   :  { %3550 = vset.pattern.permute.xlu1 %v6747_v48  ;;  %3562 = vset.pattern.permute.xlu0 %v6737_v6 }
 0x348   :  { %1576 = vperm.xlu1 %3550, %v4433_v8   ;;  %2468 = vperm.xlu0 %3562, %v4438_v13  }
 0x34a   :  { %v4637_v12 = vpop.permute.xlu0 %2224  ;;  %v4639_v27 = vpop.permute.xlu1 %1135 }
 0x34c   :  { %3552 = vset.pattern.permute.xlu1 %v6741_v4  ;;  %3565 = vset.pattern.permute.xlu0 %v6735_v63 }
 0x34d   :  { %2024 = vperm.xlu1 %3552, %v4433_v8   ;;  %1360 = vperm.xlu0 %3565, %v4464_v29  }
 0x34f   :  { %v4645_v28 = vpop.permute.xlu1 %1324  ;;  %v4647_v30 = vpop.permute.xlu0 %2672 }
 0x351   :  { %3554 = vset.pattern.permute.xlu1 %v6737_v6  ;;  %3567 = vset.pattern.permute.xlu0 %v6739_v1 }
 0x352   :  { %2472 = vperm.xlu1 %3554, %v4433_v8   ;;  %1808 = vperm.xlu0 %3567, %v4464_v29  }
 0x354   :  { %v4653_v31 = vpop.permute.xlu1 %1548  ;;  %v4655_v32 = vpop.permute.xlu0 %1336 }
 0x356   :  { %3557 = vset.pattern.permute.xlu1 %v6735_v63  ;;  %3569 = vset.pattern.permute.xlu0 %v6743_v3 }
 0x357   :  { %1348 = vperm.xlu1 %3557, %v4438_v13   ;;  %2256 = vperm.xlu0 %3569, %v4464_v29  }
 0x359   :  { %v4663_v34 = vpop.permute.xlu1 %1772  ;;  %v4665_v35 = vpop.permute.xlu0 %1784 }
 0x35a   :  { %6757 = vst [vmem:[#allocation5_spill] sm:$0xff] %v4665_v35  ;;  %v4851_v35 = vpop.f32.mrb[64].mxu1 }
 0x35b   :  { %3559 = vset.pattern.permute.xlu1 %v6739_v1  ;;  %3571 = vset.pattern.permute.xlu0 %v6745_v5 }
 0x35c   :  { %1796 = vperm.xlu1 %3559, %v4438_v13   ;;  %2704 = vperm.xlu0 %3571, %v4464_v29  }
 0x35e   :  { %v4671_v8 = vpop.permute.xlu1 %1996  ;;  %v4673_v36 = vpop.permute.xlu0 %2232 }
 0x35f   :  { %6758 = vst [vmem:[#allocation6_spill] sm:$0xff] %v4673_v36 }
 0x360   :  { %3561 = vset.pattern.permute.xlu1 %v6743_v3  ;;  %3572 = vset.pattern.permute.xlu0 %v6749_v0 }
 0x361   :  { %2244 = vperm.xlu1 %3561, %v4438_v13   ;;  %1175 = vperm.xlu0 %3572, %v4492_v46  }
 0x363   :  { %v4679_v37 = vpop.permute.xlu1 %2220  ;;  %v4681_v38 = vpop.permute.xlu0 %2680 }
 0x364   :  { %6759 = vst [vmem:[#allocation7_spill] sm:$0xff] %v4679_v37  ;;  %6760 = vst [vmem:[#allocation8_spill] sm:$0xff] %v4681_v38  ;;  %v6785_v38 = vmov 2  }
 0x365   :  { %3563 = vset.pattern.permute.xlu1 %v6745_v5  ;;  %3574 = vset.pattern.permute.xlu0 %v6747_v48 }
 0x366   :  { %2692 = vperm.xlu1 %3563, %v4438_v13   ;;  %1580 = vperm.xlu0 %3574, %v4492_v46  }
 0x368   :  { %v4687_v39 = vpop.permute.xlu1 %2444  ;;  %v4689_v40 = vpop.permute.xlu0 %1145 }
 0x369   :  { %6761 = vst [vmem:[#allocation9_spill] sm:$0xff] %v4687_v39  ;;  %v6794_v39 = vmov 7  }
 0x36a   :  { %3564 = vset.pattern.permute.xlu1 %v6749_v0  ;;  %3576 = vset.pattern.permute.xlu0 %v6741_v4 }
 0x36b   :  { %1180 = vperm.xlu1 %3564, %v4464_v29   ;;  %2028 = vperm.xlu0 %3576, %v4492_v46  }
 0x36d   :  { %v4695_v41 = vpop.permute.xlu1 %2668  ;;  %v4697_v42 = vpop.permute.xlu0 %1556 }
 0x36e   :  { %6762 = vst [vmem:[#allocation10_spill] sm:$0xff] %v4695_v41  ;;  %6763 = vst [vmem:[#allocation11_spill] sm:$0xff] %v4697_v42 }
 0x36f   :  { %3566 = vset.pattern.permute.xlu1 %v6747_v48  ;;  %3578 = vset.pattern.permute.xlu0 %v6737_v6 }
 0x370   :  { %1584 = vperm.xlu1 %3566, %v4464_v29   ;;  %2476 = vperm.xlu0 %3578, %v4492_v46  }
 0x372   :  { %v4705_v13 = vpop.permute.xlu1 %1150  ;;  %v4707_v45 = vpop.permute.xlu0 %2004 }
 0x373   :  { %6764 = vst [vmem:[#allocation12_spill] sm:$0xff] %v4707_v45 }
 0x374   :  { %3568 = vset.pattern.permute.xlu1 %v6741_v4  ;;  %3581 = vset.pattern.permute.xlu0 %v6735_v63 }
 0x375   :  { %2032 = vperm.xlu1 %3568, %v4464_v29   ;;  %1368 = vperm.xlu0 %3581, %v4515_v60  }
 0x377   :  { %v4713_v47 = vpop.permute.xlu1 %1560  ;;  %v4715_v7 = vpop.permute.xlu0 %2452 }
 0x378   :  { %6765 = vst [vmem:[#allocation13_spill] sm:$0xff] %v4715_v7  ;;  %v6779_v7 = vmov 5  }
 0x379   :  { %3570 = vset.pattern.permute.xlu1 %v6737_v6  ;;  %3583 = vset.pattern.permute.xlu0 %v6739_v1 }
 0x37a   :  { %2480 = vperm.xlu1 %3570, %v4464_v29   ;;  %1816 = vperm.xlu0 %3583, %v4515_v60  }
 0x37c   :  { %v4721_v50 = vpop.permute.xlu1 %2008  ;;  %v4723_v51 = vpop.permute.xlu0 %1344 }
 0x37d   :  { %6766 = vst [vmem:[#allocation14_spill] sm:$0xff] %v4721_v50  ;;  %6767 = vst [vmem:[#allocation15_spill] sm:$0xff] %v4723_v51 }
 0x37e   :  { %3573 = vset.pattern.permute.xlu1 %v6735_v63  ;;  %3585 = vset.pattern.permute.xlu0 %v6743_v3 }
 0x37f   :  { %1356 = vperm.xlu1 %3573, %v4492_v46   ;;  %2264 = vperm.xlu0 %3585, %v4515_v60  }
 0x381   :  { %v4731_v53 = vpop.permute.xlu1 %2456  ;;  %v4733_v43 = vpop.permute.xlu0 %1792 }
 0x382   :  { %6768 = vst [vmem:[#allocation16_spill] sm:$0xff] %v4731_v53  ;;  %6769 = vst [vmem:[#allocation17_spill] sm:$0xff] %v4733_v43 }
 0x383   :  { %3575 = vset.pattern.permute.xlu1 %v6739_v1  ;;  %3587 = vset.pattern.permute.xlu0 %v6745_v5 }
 0x384   :  { %1804 = vperm.xlu1 %3575, %v4492_v46   ;;  %2712 = vperm.xlu0 %3587, %v4515_v60  }
 0x386   :  { %v4739_v29 = vpop.permute.xlu1 %1332  ;;  %v4741_v63 = vpop.permute.xlu0 %2240 }
 0x387   :  { %6770 = vst [vmem:[#allocation18_spill] sm:$0xff] %v4741_v63  ;;  %v6775_v63 = vmov 3  }
 0x388   :  { %3577 = vset.pattern.permute.xlu1 %v6743_v3  ;;  %3588 = vset.pattern.permute.xlu0 %v6749_v0 }
 0x389   :  { %2252 = vperm.xlu1 %3577, %v4492_v46   ;;  %1185 = vperm.xlu0 %3588, %v4533_v54  }
 0x38b   :  { %v4747_v6 = vpop.permute.xlu1 %1780  ;;  %v4749_v1 = vpop.permute.xlu0 %2688 }
 0x38c   :  { %6771 = vst [vmem:[#allocation19_spill] sm:$0xff] %v4747_v6  ;;  %6772 = vst [vmem:[#allocation20_spill] sm:$0xff] %v4749_v1 }
 0x38d   :  { %3579 = vset.pattern.permute.xlu1 %v6745_v5  ;;  %3590 = vset.pattern.permute.xlu0 %v6747_v48  ;;  %v4767_v48 = vpop.f32.mrb[84].mxu0 }
 0x38e   :  { %2700 = vperm.xlu1 %3579, %v4492_v46   ;;  %1588 = vperm.xlu0 %3590, %v4533_v54   ;;  %v6778_v46 = vmov 1  }
 0x390   :  { %v4755_v4 = vpop.permute.xlu1 %2228  ;;  %v4757_v3 = vpop.permute.xlu0 %1155 }
 0x391   :  { %6773 = vst [vmem:[#allocation21_spill] sm:$0xff] %v4755_v4  ;;  %6774 = vst [vmem:[#allocation22_spill] sm:$0xff] %v4757_v3  ;;  %v4771_v4 = vpop.f32.mrb[85].mxu0 }
 0x392   :  { %3580 = vset.pattern.permute.xlu1 %v6749_v0  ;;  %3592 = vset.pattern.permute.xlu0 %v6775_v63 }
 0x393   :  { %1190 = vperm.xlu1 %3580, %v4515_v60   ;;  %2036 = vperm.xlu0 %3592, %v4533_v54  }
 0x395   :  { %v4763_v1 = vpop.permute.xlu1 %2676  ;;  %v4765_v5 = vpop.permute.xlu0 %1564 }
 0x396   :  { %6776 = vst [vmem:[#allocation23_spill] sm:$0xff] %v4763_v1  ;;  %6777 = vst [vmem:[#allocation24_spill] sm:$0xff] %v4765_v5  ;;  %v6782_v1 = vmov 0   ;;  %v4781_v5 = vpop.f32.mrb[86].mxu0 }
 0x397   :  { %3582 = vset.pattern.permute.xlu1 %v6778_v46  ;;  %3594 = vset.pattern.permute.xlu0 %v6779_v7  ;;  %v4785_v43 = vpop.f32.mrb[87].mxu0 }
 0x398   :  { %1592 = vperm.xlu1 %3582, %v4515_v60   ;;  %2484 = vperm.xlu0 %3594, %v4533_v54   ;;  %v4799_v41 = vpop.f32.mrb[88].mxu0 }
 0x39a   :  { %v4775_v0 = vpop.permute.xlu1 %1160  ;;  %v4777_v53 = vpop.permute.xlu0 %2012 }
 0x39b   :  { %6780 = vst [vmem:[#allocation25_spill] sm:$0xff] %v4775_v0  ;;  %6781 = vst [vmem:[#allocation26_spill] sm:$0xff] %v4777_v53  ;;  %v6788_v0 = vmov 4  }
 0x39c   :  { %3584 = vset.pattern.permute.xlu1 %v6775_v63  ;;  %3597 = vset.pattern.permute.xlu0 %v6782_v1 }
 0x39d   :  { %2040 = vperm.xlu1 %3584, %v4515_v60   ;;  %1376 = vperm.xlu0 %3597, %v4559_v59  }
 0x39f   :  { %v4787_v3 = vpop.permute.xlu1 %1568  ;;  %v4789_v45 = vpop.permute.xlu0 %2460 }
 0x3a0   :  { %6783 = vst [vmem:[#allocation27_spill] sm:$0xff] %v4787_v3  ;;  %6784 = vst [vmem:[#allocation28_spill] sm:$0xff] %v4789_v45  ;;  %v4803_v3 = vpop.f32.mrb[89].mxu0 }
 0x3a1   :  { %3586 = vset.pattern.permute.xlu1 %v6779_v7  ;;  %3599 = vset.pattern.permute.xlu0 %v6785_v38  ;;  %v4819_v51 = vpop.f32.mrb[90].mxu0 }
 0x3a2   :  { %2488 = vperm.xlu1 %3586, %v4515_v60   ;;  %1824 = vperm.xlu0 %3599, %v4559_v59  }
 0x3a4   :  { %v4795_v53 = vpop.permute.xlu1 %2016  ;;  %v4797_v36 = vpop.permute.xlu0 %1352 }
 0x3a5   :  { %6786 = vst [vmem:[#allocation29_spill] sm:$0xff] %v4795_v53  ;;  %6787 = vst [vmem:[#allocation30_spill] sm:$0xff] %v4797_v36  ;;  %v6791_v53 = vmov 6  }
 0x3a6   :  { %3589 = vset.pattern.permute.xlu1 %v6782_v1  ;;  %3601 = vset.pattern.permute.xlu0 %v6788_v0 }
 0x3a7   :  { %1364 = vperm.xlu1 %3589, %v4533_v54   ;;  %2272 = vperm.xlu0 %3601, %v4559_v59  }
 0x3a9   :  { %v4807_v45 = vpop.permute.xlu1 %2464  ;;  %v4809_v60 = vpop.permute.xlu0 %1800 }
 0x3aa   :  { %6789 = vst [vmem:[#allocation31_spill] sm:$0xff] %v4807_v45  ;;  %6790 = vst [vmem:[#allocation32_spill] sm:$0xff] %v4809_v60  ;;  %v4823_v45 = vpop.f32.mrb[91].mxu0 }
 0x3ab   :  { %3591 = vset.pattern.permute.xlu1 %v6785_v38  ;;  %3603 = vset.pattern.permute.xlu0 %v6791_v53  ;;  %v4831_v42 = vpop.f32.mrb[92].mxu0 }
 0x3ac   :  { %1812 = vperm.xlu1 %3591, %v4533_v54   ;;  %2720 = vperm.xlu0 %3603, %v4559_v59  }
 0x3ae   :  { %v4815_v36 = vpop.permute.xlu1 %1340  ;;  %v4817_v6 = vpop.permute.xlu0 %2248 }
 0x3af   :  { %6792 = vst [vmem:[#allocation33_spill] sm:$0xff] %v4815_v36  ;;  %6793 = vst [vmem:[#allocation34_spill] sm:$0xff] %v4817_v6  ;;  %v4835_v6 = vpop.f32.mrb[93].mxu0 }
 0x3b0   :  { %3593 = vset.pattern.permute.xlu1 %v6788_v0  ;;  %3604 = vset.pattern.permute.xlu0 %v6794_v39 }
 0x3b1   :  { %2260 = vperm.xlu1 %3593, %v4533_v54   ;;  %1195 = vperm.xlu0 %3604, %v4593_v16  }
 0x3b3   :  { %v4827_v60 = vpop.permute.xlu1 %1788  ;;  %v4829_v50 = vpop.permute.xlu0 %2696 }
 0x3b4   :  { %6795 = vst [vmem:[#allocation35_spill] sm:$0xff] %v4827_v60  ;;  %6796 = vst [vmem:[#allocation36_spill] sm:$0xff] %v4829_v50 }
 0x3b5   :  { %3595 = vset.pattern.permute.xlu1 %v6791_v53  ;;  %3606 = vset.pattern.permute.xlu0 %v6778_v46 }
 0x3b6   :  { %2708 = vperm.xlu1 %3595, %v4533_v54   ;;  %1596 = vperm.xlu0 %3606, %v4593_v16   ;;  %v4855_v54 = vpop.f32.mrb[65].mxu1 }
 0x3b8   :  { %v4839_v36 = vpop.permute.xlu1 %2236  ;;  %v4841_v37 = vpop.permute.xlu0 %1165 }
 0x3b9   :  { %6797 = vst [vmem:[#allocation37_spill] sm:$0xff] %v4839_v36  ;;  %6798 = vst [vmem:[#allocation38_spill] sm:$0xff] %v4841_v37 }
 0x3ba   :  { %3596 = vset.pattern.permute.xlu1 %v6794_v39  ;;  %3608 = vset.pattern.permute.xlu0 %v6775_v63 }
 0x3bb   :  { %1200 = vperm.xlu1 %3596, %v4559_v59   ;;  %2044 = vperm.xlu0 %3608, %v4593_v16  }
 0x3bd   :  { %v4847_v50 = vpop.permute.xlu1 %2684  ;;  %v4849_v60 = vpop.permute.xlu0 %1572 }
 0x3be   :  { %6799 = vst [vmem:[#allocation39_spill] sm:$0xff] %v4847_v50  ;;  %6800 = vst [vmem:[#allocation40_spill] sm:$0xff] %v4849_v60 }
 0x3bf   :  { %3598 = vset.pattern.permute.xlu1 %v6778_v46  ;;  %3610 = vset.pattern.permute.xlu0 %v6779_v7 }
 0x3c0   :  { %1600 = vperm.xlu1 %3598, %v4559_v59   ;;  %2492 = vperm.xlu0 %3610, %v4593_v16  }
 0x3c2   :  { %v4859_v36 = vpop.permute.xlu1 %1170  ;;  %v4861_v37 = vpop.permute.xlu0 %2020 }
 0x3c3   :  { %6801 = vst [vmem:[#allocation41_spill] sm:$0xff] %v4859_v36  ;;  %6802 = vst [vmem:[#allocation42_spill] sm:$0xff] %v4861_v37 }
 0x3c4   :  { %3600 = vset.pattern.permute.xlu1 %v6775_v63  ;;  %3613 = vset.pattern.permute.xlu0 %v6782_v1 }
 0x3c5   :  { %2048 = vperm.xlu1 %3600, %v4559_v59   ;;  %1384 = vperm.xlu0 %3613, %v4627_v24  }
 0x3c7   :  { %v4867_v50 = vpop.permute.xlu1 %1576  ;;  %v4869_v60 = vpop.permute.xlu0 %2468 }
 0x3c8   :  { %6803 = vst [vmem:[#allocation43_spill] sm:$0xff] %v4867_v50  ;;  %6804 = vst [vmem:[#allocation44_spill] sm:$0xff] %v4869_v60 }
 0x3c9   :  { %3602 = vset.pattern.permute.xlu1 %v6779_v7  ;;  %3615 = vset.pattern.permute.xlu0 %v6785_v38 }
 0x3ca   :  { %2496 = vperm.xlu1 %3602, %v4559_v59   ;;  %1832 = vperm.xlu0 %3615, %v4627_v24  }
 0x3cc   :  { %v4875_v37 = vpop.permute.xlu1 %2024  ;;  %v4877_v36 = vpop.permute.xlu0 %1360 }
 0x3cd   :  { %6805 = vst [vmem:[#allocation45_spill] sm:$0xff] %v4875_v37  ;;  %6806 = vst [vmem:[#allocation46_spill] sm:$0xff] %v4877_v36 }
 0x3ce   :  { %3605 = vset.pattern.permute.xlu1 %v6782_v1  ;;  %3617 = vset.pattern.permute.xlu0 %v6788_v0 }
 0x3cf   :  { %1372 = vperm.xlu1 %3605, %v4593_v16   ;;  %2280 = vperm.xlu0 %3617, %v4627_v24  }
 0x3d1   :  { %v4883_v60 = vpop.permute.xlu1 %2472  ;;  %v4885_v50 = vpop.permute.xlu0 %1808 }
 0x3d2   :  { %6807 = vst [vmem:[#allocation47_spill] sm:$0xff] %v4883_v60  ;;  %6808 = vst [vmem:[#allocation48_spill] sm:$0xff] %v4885_v50 }
 0x3d3   :  { %3607 = vset.pattern.permute.xlu1 %v6785_v38  ;;  %3619 = vset.pattern.permute.xlu0 %v6791_v53 }
 0x3d4   :  { %1820 = vperm.xlu1 %3607, %v4593_v16   ;;  %2728 = vperm.xlu0 %3619, %v4627_v24  }
 0x3d6   :  { %v4891_v59 = vpop.permute.xlu1 %1348  ;;  %v4893_v37 = vpop.permute.xlu0 %2256 }
 0x3d7   :  { %6809 = vst [vmem:[#allocation49_spill] sm:$0xff] %v4893_v37 }
 0x3d8   :  { %3609 = vset.pattern.permute.xlu1 %v6788_v0  ;;  %3620 = vset.pattern.permute.xlu0 %v6794_v39 }
 0x3d9   :  { %2268 = vperm.xlu1 %3609, %v4593_v16   ;;  %1205 = vperm.xlu0 %3620, %v4661_v33  }
 0x3db   :  { %v4899_v60 = vpop.permute.xlu1 %1796  ;;  %v4901_v50 = vpop.permute.xlu0 %2704 }
 0x3dc   :  { %6810 = vst [vmem:[#allocation50_spill] sm:$0xff] %v4899_v60  ;;  %6811 = vst [vmem:[#allocation51_spill] sm:$0xff] %v4901_v50 }
 0x3dd   :  { %3611 = vset.pattern.permute.xlu1 %v6791_v53  ;;  %3622 = vset.pattern.permute.xlu0 %v6778_v46 }
 0x3de   :  { %2716 = vperm.xlu1 %3611, %v4593_v16   ;;  %1604 = vperm.xlu0 %3622, %v4661_v33  }
 0x3e0   :  { %v4907_v37 = vpop.permute.xlu1 %2244  ;;  %v4909_v36 = vpop.permute.xlu0 %1175 }
 0x3e1   :  { %6812 = vst [vmem:[#allocation52_spill] sm:$0xff] %v4907_v37  ;;  %6813 = vst [vmem:[#allocation53_spill] sm:$0xff] %v4909_v36 }
 0x3e2   :  { %3612 = vset.pattern.permute.xlu1 %v6794_v39  ;;  %3624 = vset.pattern.permute.xlu0 %v6775_v63 }
 0x3e3   :  { %1210 = vperm.xlu1 %3612, %v4627_v24   ;;  %2052 = vperm.xlu0 %3624, %v4661_v33  }
 0x3e5   :  { %v4915_v50 = vpop.permute.xlu1 %2692  ;;  %v4917_v60 = vpop.permute.xlu0 %1580 }
 0x3e6   :  { %6814 = vst [vmem:[#allocation54_spill] sm:$0xff] %v4915_v50  ;;  %6815 = vst [vmem:[#allocation55_spill] sm:$0xff] %v4917_v60 }
 0x3e7   :  { %3614 = vset.pattern.permute.xlu1 %v6778_v46  ;;  %3626 = vset.pattern.permute.xlu0 %v6779_v7 }
 0x3e8   :  { %1608 = vperm.xlu1 %3614, %v4627_v24   ;;  %2500 = vperm.xlu0 %3626, %v4661_v33  }
 0x3ea   :  { %v4923_v16 = vpop.permute.xlu1 %1180  ;;  %v4925_v37 = vpop.permute.xlu0 %2028 }
 0x3eb   :  { %6816 = vst [vmem:[#allocation56_spill] sm:$0xff] %v4923_v16  ;;  %6817 = vst [vmem:[#allocation57_spill] sm:$0xff] %v4925_v37 }
 0x3ec   :  { %3616 = vset.pattern.permute.xlu1 %v6775_v63  ;;  %3629 = vset.pattern.permute.xlu0 %v6782_v1 }
 0x3ed   :  { %2056 = vperm.xlu1 %3616, %v4627_v24   ;;  %1392 = vperm.xlu0 %3629, %v4699_v44  }
 0x3ef   :  { %v4931_v50 = vpop.permute.xlu1 %1584  ;;  %v4933_v60 = vpop.permute.xlu0 %2476 }
 0x3f0   :  { %6818 = vst [vmem:[#allocation58_spill] sm:$0xff] %v4933_v60 }
 0x3f1   :  { %3618 = vset.pattern.permute.xlu1 %v6779_v7  ;;  %3631 = vset.pattern.permute.xlu0 %v6785_v38 }
 0x3f2   :  { %2504 = vperm.xlu1 %3618, %v4627_v24   ;;  %1840 = vperm.xlu0 %3631, %v4699_v44  }
 0x3f4   :  { %v4939_v37 = vpop.permute.xlu1 %2032  ;;  %v4941_v36 = vpop.permute.xlu0 %1368 }
 0x3f5   :  { %6819 = vst [vmem:[#allocation59_spill] sm:$0xff] %v4939_v37  ;;  %6820 = vst [vmem:[#allocation60_spill] sm:$0xff] %v4941_v36 }
 0x3f6   :  { %3621 = vset.pattern.permute.xlu1 %v6782_v1  ;;  %3633 = vset.pattern.permute.xlu0 %v6788_v0 }
 0x3f7   :  { %1380 = vperm.xlu1 %3621, %v4661_v33   ;;  %2288 = vperm.xlu0 %3633, %v4699_v44  }
 0x3f9   :  { %v4947_v60 = vpop.permute.xlu1 %2480  ;;  %v4949_v16 = vpop.permute.xlu0 %1816 }
 0x3fa   :  { %6821 = vst [vmem:[#allocation61_spill] sm:$0xff] %v4947_v60  ;;  %6822 = vst [vmem:[#allocation62_spill] sm:$0xff] %v4949_v16 }
 0x3fb   :  { %3623 = vset.pattern.permute.xlu1 %v6785_v38  ;;  %3635 = vset.pattern.permute.xlu0 %v6791_v53 }
 0x3fc   :  { %1828 = vperm.xlu1 %3623, %v4661_v33   ;;  %2736 = vperm.xlu0 %3635, %v4699_v44  }
 0x3fe   :  { %v4955_v24 = vpop.permute.xlu1 %1356  ;;  %v4957_v36 = vpop.permute.xlu0 %2264 }
 0x3ff   :  { %6823 = vst [vmem:[#allocation63_spill] sm:$0xff] %v4957_v36 }
 0x400   :  { %3625 = vset.pattern.permute.xlu1 %v6788_v0  ;;  %3636 = vset.pattern.permute.xlu0 %v6794_v39 }
 0x401   :  { %2276 = vperm.xlu1 %3625, %v4661_v33   ;;  %1215 = vperm.xlu0 %3636, %v4729_v52  }
 0x403   :  { %v4963_v16 = vpop.permute.xlu1 %1804  ;;  %v4965_v60 = vpop.permute.xlu0 %2712 }
 0x404   :  { %6824 = vst [vmem:[#allocation64_spill] sm:$0xff] %v4963_v16  ;;  %6825 = vst [vmem:[#allocation65_spill] sm:$0xff] %v4965_v60 }
 0x405   :  { %3627 = vset.pattern.permute.xlu1 %v6791_v53  ;;  %3638 = vset.pattern.permute.xlu0 %v6778_v46 }
 0x406   :  { %2724 = vperm.xlu1 %3627, %v4661_v33   ;;  %1612 = vperm.xlu0 %3638, %v4729_v52  }
 0x408   :  { %v4971_v36 = vpop.permute.xlu1 %2252  ;;  %v4973_v37 = vpop.permute.xlu0 %1185 }
 0x409   :  { %6826 = vst [vmem:[#allocation66_spill] sm:$0xff] %v4971_v36 }
 0x40a   :  { %3628 = vset.pattern.permute.xlu1 %v6794_v39  ;;  %3640 = vset.pattern.permute.xlu0 %v6775_v63 }
 0x40b   :  { %1220 = vperm.xlu1 %3628, %v4699_v44   ;;  %2060 = vperm.xlu0 %3640, %v4729_v52  }
 0x40d   :  { %v4979_v60 = vpop.permute.xlu1 %2700  ;;  %v4981_v16 = vpop.permute.xlu0 %1588 }
 0x40e   :  { %6827 = vst [vmem:[#allocation67_spill] sm:$0xff] %v4979_v60  ;;  %6828 = vst [vmem:[#allocation68_spill] sm:$0xff] %v4981_v16 }
 0x40f   :  { %3630 = vset.pattern.permute.xlu1 %v6778_v46  ;;  %3642 = vset.pattern.permute.xlu0 %v6779_v7 }
 0x410   :  { %1616 = vperm.xlu1 %3630, %v4699_v44   ;;  %2508 = vperm.xlu0 %3642, %v4729_v52  }
 0x412   :  { %v4987_v33 = vpop.permute.xlu1 %1190  ;;  %v4989_v36 = vpop.permute.xlu0 %2036 }
 0x413   :  { %6829 = vst [vmem:[#allocation69_spill] sm:$0xff] %v4987_v33  ;;  %6830 = vst [vmem:[#allocation70_spill] sm:$0xff] %v4989_v36 }
 0x414   :  { %3632 = vset.pattern.permute.xlu1 %v6775_v63  ;;  %3645 = vset.pattern.permute.xlu0 %v6782_v1 }
 0x415   :  { %2064 = vperm.xlu1 %3632, %v4699_v44   ;;  %1400 = vperm.xlu0 %3645, %v4767_v48  }
 0x417   :  { %v4995_v60 = vpop.permute.xlu1 %1592  ;;  %v4997_v16 = vpop.permute.xlu0 %2484 }
 0x418   :  { %6831 = vst [vmem:[#allocation71_spill] sm:$0xff] %v4995_v60  ;;  %6832 = vst [vmem:[#allocation72_spill] sm:$0xff] %v4997_v16 }
 0x419   :  { %3634 = vset.pattern.permute.xlu1 %v6779_v7  ;;  %3647 = vset.pattern.permute.xlu0 %v6785_v38 }
 0x41a   :  { %2512 = vperm.xlu1 %3634, %v4699_v44   ;;  %1848 = vperm.xlu0 %3647, %v4767_v48  }
 0x41c   :  { %v5003_v36 = vpop.permute.xlu1 %2040  ;;  %v5005_v33 = vpop.permute.xlu0 %1376 }
 0x41d   :  { %6833 = vst [vmem:[#allocation73_spill] sm:$0xff] %v5003_v36  ;;  %6834 = vst [vmem:[#allocation74_spill] sm:$0xff] %v5005_v33 }
 0x41e   :  { %3637 = vset.pattern.permute.xlu1 %v6782_v1  ;;  %3649 = vset.pattern.permute.xlu0 %v6788_v0 }
 0x41f   :  { %1388 = vperm.xlu1 %3637, %v4729_v52   ;;  %2296 = vperm.xlu0 %3649, %v4767_v48  }
 0x421   :  { %v5011_v16 = vpop.permute.xlu1 %2488  ;;  %v5013_v60 = vpop.permute.xlu0 %1824 }
 0x422   :  { %6835 = vst [vmem:[#allocation75_spill] sm:$0xff] %v5011_v16  ;;  %6836 = vst [vmem:[#allocation76_spill] sm:$0xff] %v5013_v60 }
 0x423   :  { %3639 = vset.pattern.permute.xlu1 %v6785_v38  ;;  %3651 = vset.pattern.permute.xlu0 %v6791_v53 }
 0x424   :  { %1836 = vperm.xlu1 %3639, %v4729_v52   ;;  %2744 = vperm.xlu0 %3651, %v4767_v48  }
 0x426   :  { %v5019_v44 = vpop.permute.xlu1 %1364  ;;  %v5021_v33 = vpop.permute.xlu0 %2272 }
 0x427   :  { %6837 = vst [vmem:[#allocation77_spill] sm:$0xff] %v5021_v33 }
 0x428   :  { %3641 = vset.pattern.permute.xlu1 %v6788_v0  ;;  %3652 = vset.pattern.permute.xlu0 %v6794_v39 }
 0x429   :  { %2284 = vperm.xlu1 %3641, %v4729_v52   ;;  %1225 = vperm.xlu0 %3652, %v4771_v4  }
 0x42b   :  { %v5027_v60 = vpop.permute.xlu1 %1812  ;;  %v5029_v16 = vpop.permute.xlu0 %2720 }
 0x42c   :  { %6838 = vst [vmem:[#allocation78_spill] sm:$0xff] %v5027_v60  ;;  %6839 = vst [vmem:[#allocation79_spill] sm:$0xff] %v5029_v16 }
 0x42d   :  { %3643 = vset.pattern.permute.xlu1 %v6791_v53  ;;  %3654 = vset.pattern.permute.xlu0 %v6778_v46 }
 0x42e   :  { %2732 = vperm.xlu1 %3643, %v4729_v52   ;;  %1620 = vperm.xlu0 %3654, %v4771_v4  }
 0x430   :  { %v5035_v33 = vpop.permute.xlu1 %2260  ;;  %v5037_v36 = vpop.permute.xlu0 %1195 }
 0x431   :  { %6840 = vst [vmem:[#allocation80_spill] sm:$0xff] %v5035_v33 }
 0x432   :  { %3644 = vset.pattern.permute.xlu1 %v6794_v39  ;;  %3656 = vset.pattern.permute.xlu0 %v6775_v63 }
 0x433   :  { %1230 = vperm.xlu1 %3644, %v4767_v48   ;;  %2068 = vperm.xlu0 %3656, %v4771_v4  }
 0x435   :  { %v5043_v16 = vpop.permute.xlu1 %2708  ;;  %v5045_v60 = vpop.permute.xlu0 %1596 }
 0x436   :  { %6841 = vst [vmem:[#allocation81_spill] sm:$0xff] %v5043_v16  ;;  %6842 = vst [vmem:[#allocation82_spill] sm:$0xff] %v5045_v60 }
 0x437   :  { %3646 = vset.pattern.permute.xlu1 %v6778_v46  ;;  %3658 = vset.pattern.permute.xlu0 %v6779_v7 }
 0x438   :  { %1624 = vperm.xlu1 %3646, %v4767_v48   ;;  %2516 = vperm.xlu0 %3658, %v4771_v4  }
 0x43a   :  { %v5051_v52 = vpop.permute.xlu1 %1200  ;;  %v5053_v33 = vpop.permute.xlu0 %2044 }
 0x43b   :  { %6843 = vst [vmem:[#allocation83_spill] sm:$0xff] %v5051_v52  ;;  %6844 = vst [vmem:[#allocation84_spill] sm:$0xff] %v5053_v33 }
 0x43c   :  { %3648 = vset.pattern.permute.xlu1 %v6775_v63  ;;  %3661 = vset.pattern.permute.xlu0 %v6782_v1 }
 0x43d   :  { %2072 = vperm.xlu1 %3648, %v4767_v48   ;;  %1408 = vperm.xlu0 %3661, %v4781_v5  }
 0x43f   :  { %v5059_v16 = vpop.permute.xlu1 %1600  ;;  %v5061_v60 = vpop.permute.xlu0 %2492 }
 0x440   :  { %6845 = vst [vmem:[#allocation85_spill] sm:$0xff] %v5059_v16  ;;  %6846 = vst [vmem:[#allocation86_spill] sm:$0xff] %v5061_v60 }
 0x441   :  { %3650 = vset.pattern.permute.xlu1 %v6779_v7  ;;  %3663 = vset.pattern.permute.xlu0 %v6785_v38 }
 0x442   :  { %2520 = vperm.xlu1 %3650, %v4767_v48   ;;  %1856 = vperm.xlu0 %3663, %v4781_v5  }
 0x444   :  { %v5067_v52 = vpop.permute.xlu1 %2048  ;;  %v5069_v33 = vpop.permute.xlu0 %1384 }
 0x445   :  { %6847 = vst [vmem:[#allocation87_spill] sm:$0xff] %v5067_v52  ;;  %6848 = vst [vmem:[#allocation88_spill] sm:$0xff] %v5069_v33 }
 0x446   :  { %3653 = vset.pattern.permute.xlu1 %v6782_v1  ;;  %3665 = vset.pattern.permute.xlu0 %v6788_v0 }
 0x447   :  { %1396 = vperm.xlu1 %3653, %v4771_v4   ;;  %2304 = vperm.xlu0 %3665, %v4781_v5  }
 0x449   :  { %v5075_v16 = vpop.permute.xlu1 %2496  ;;  %v5077_v60 = vpop.permute.xlu0 %1832 }
 0x44a   :  { %6849 = vst [vmem:[#allocation89_spill] sm:$0xff] %v5075_v16  ;;  %6850 = vst [vmem:[#allocation90_spill] sm:$0xff] %v5077_v60 }
 0x44b   :  { %3655 = vset.pattern.permute.xlu1 %v6785_v38  ;;  %3667 = vset.pattern.permute.xlu0 %v6791_v53 }
 0x44c   :  { %1844 = vperm.xlu1 %3655, %v4771_v4   ;;  %2752 = vperm.xlu0 %3667, %v4781_v5  }
 0x44e   :  { %v5083_v48 = vpop.permute.xlu1 %1372  ;;  %v5085_v33 = vpop.permute.xlu0 %2280 }
 0x44f   :  { %6851 = vst [vmem:[#allocation91_spill] sm:$0xff] %v5085_v33 }
 0x450   :  { %3657 = vset.pattern.permute.xlu1 %v6788_v0  ;;  %3668 = vset.pattern.permute.xlu0 %v6794_v39 }
 0x451   :  { %2292 = vperm.xlu1 %3657, %v4771_v4   ;;  %1235 = vperm.xlu0 %3668, %v4785_v43  }
 0x453   :  { %v5091_v16 = vpop.permute.xlu1 %1820  ;;  %v5093_v60 = vpop.permute.xlu0 %2728 }
 0x454   :  { %6852 = vst [vmem:[#allocation92_spill] sm:$0xff] %v5091_v16  ;;  %6853 = vst [vmem:[#allocation93_spill] sm:$0xff] %v5093_v60 }
 0x455   :  { %3659 = vset.pattern.permute.xlu1 %v6791_v53  ;;  %3670 = vset.pattern.permute.xlu0 %v6778_v46 }
 0x456   :  { %2740 = vperm.xlu1 %3659, %v4771_v4   ;;  %1628 = vperm.xlu0 %3670, %v4785_v43  }
 0x458   :  { %v5099_v33 = vpop.permute.xlu1 %2268  ;;  %v5101_v52 = vpop.permute.xlu0 %1205 }
 0x459   :  { %6854 = vst [vmem:[#allocation94_spill] sm:$0xff] %v5099_v33 }
 0x45a   :  { %3660 = vset.pattern.permute.xlu1 %v6794_v39  ;;  %3672 = vset.pattern.permute.xlu0 %v6775_v63 }
 0x45b   :  { %1240 = vperm.xlu1 %3660, %v4781_v5   ;;  %2076 = vperm.xlu0 %3672, %v4785_v43  }
 0x45d   :  { %v5107_v60 = vpop.permute.xlu1 %2716  ;;  %v5109_v16 = vpop.permute.xlu0 %1604 }
 0x45e   :  { %6855 = vst [vmem:[#allocation95_spill] sm:$0xff] %v5107_v60  ;;  %6856 = vst [vmem:[#allocation96_spill] sm:$0xff] %v5109_v16 }
 0x45f   :  { %3662 = vset.pattern.permute.xlu1 %v6778_v46  ;;  %3674 = vset.pattern.permute.xlu0 %v6779_v7 }
 0x460   :  { %1632 = vperm.xlu1 %3662, %v4781_v5   ;;  %2524 = vperm.xlu0 %3674, %v4785_v43  }
 0x462   :  { %v5115_v4 = vpop.permute.xlu1 %1210  ;;  %v5117_v33 = vpop.permute.xlu0 %2052 }
 0x463   :  { %6857 = vst [vmem:[#allocation97_spill] sm:$0xff] %v5115_v4  ;;  %6858 = vst [vmem:[#allocation98_spill] sm:$0xff] %v5117_v33 }
 0x464   :  { %3664 = vset.pattern.permute.xlu1 %v6775_v63  ;;  %3677 = vset.pattern.permute.xlu0 %v6782_v1 }
 0x465   :  { %2080 = vperm.xlu1 %3664, %v4781_v5   ;;  %1416 = vperm.xlu0 %3677, %v4799_v41  }
 0x467   :  { %v5123_v60 = vpop.permute.xlu1 %1608  ;;  %v5125_v16 = vpop.permute.xlu0 %2500 }
 0x468   :  { %6859 = vst [vmem:[#allocation99_spill] sm:$0xff] %v5123_v60  ;;  %6860 = vst [vmem:[#allocation100_spill] sm:$0xff] %v5125_v16 }
 0x469   :  { %3666 = vset.pattern.permute.xlu1 %v6779_v7  ;;  %3679 = vset.pattern.permute.xlu0 %v6785_v38 }
 0x46a   :  { %2528 = vperm.xlu1 %3666, %v4781_v5   ;;  %1864 = vperm.xlu0 %3679, %v4799_v41  }
 0x46c   :  { %v5131_v4 = vpop.permute.xlu1 %2056  ;;  %v5133_v33 = vpop.permute.xlu0 %1392 }
 0x46d   :  { %6861 = vst [vmem:[#allocation101_spill] sm:$0xff] %v5131_v4  ;;  %6862 = vst [vmem:[#allocation102_spill] sm:$0xff] %v5133_v33 }
 0x46e   :  { %3669 = vset.pattern.permute.xlu1 %v6782_v1  ;;  %3681 = vset.pattern.permute.xlu0 %v6788_v0 }
 0x46f   :  { %1404 = vperm.xlu1 %3669, %v4785_v43   ;;  %2312 = vperm.xlu0 %3681, %v4799_v41  }
 0x471   :  { %v5139_v60 = vpop.permute.xlu1 %2504  ;;  %v5141_v16 = vpop.permute.xlu0 %1840 }
 0x472   :  { %6863 = vst [vmem:[#allocation103_spill] sm:$0xff] %v5139_v60  ;;  %6864 = vst [vmem:[#allocation104_spill] sm:$0xff] %v5141_v16 }
 0x473   :  { %3671 = vset.pattern.permute.xlu1 %v6785_v38  ;;  %3683 = vset.pattern.permute.xlu0 %v6791_v53 }
 0x474   :  { %1852 = vperm.xlu1 %3671, %v4785_v43   ;;  %2760 = vperm.xlu0 %3683, %v4799_v41  }
 0x476   :  { %v5147_v5 = vpop.permute.xlu1 %1380  ;;  %v5149_v33 = vpop.permute.xlu0 %2288 }
 0x477   :  { %6865 = vst [vmem:[#allocation105_spill] sm:$0xff] %v5149_v33 }
 0x478   :  { %3673 = vset.pattern.permute.xlu1 %v6788_v0  ;;  %3684 = vset.pattern.permute.xlu0 %v6794_v39 }
 0x479   :  { %2300 = vperm.xlu1 %3673, %v4785_v43   ;;  %1245 = vperm.xlu0 %3684, %v4803_v3  }
 0x47b   :  { %v5155_v60 = vpop.permute.xlu1 %1828  ;;  %v5157_v16 = vpop.permute.xlu0 %2736 }
 0x47c   :  { %6866 = vst [vmem:[#allocation106_spill] sm:$0xff] %v5155_v60  ;;  %6867 = vst [vmem:[#allocation107_spill] sm:$0xff] %v5157_v16 }
 0x47d   :  { %3675 = vset.pattern.permute.xlu1 %v6791_v53  ;;  %3686 = vset.pattern.permute.xlu0 %v6778_v46 }
 0x47e   :  { %2748 = vperm.xlu1 %3675, %v4785_v43   ;;  %1636 = vperm.xlu0 %3686, %v4803_v3  }
 0x480   :  { %v5163_v33 = vpop.permute.xlu1 %2276  ;;  %v5165_v4 = vpop.permute.xlu0 %1215 }
 0x481   :  { %6868 = vst [vmem:[#allocation108_spill] sm:$0xff] %v5163_v33  ;;  %6869 = vst [vmem:[#allocation109_spill] sm:$0xff] %v5165_v4 }
 0x482   :  { %3676 = vset.pattern.permute.xlu1 %v6794_v39  ;;  %3688 = vset.pattern.permute.xlu0 %v6775_v63 }
 0x483   :  { %1250 = vperm.xlu1 %3676, %v4799_v41   ;;  %2084 = vperm.xlu0 %3688, %v4803_v3  }
 0x485   :  { %v5171_v16 = vpop.permute.xlu1 %2724  ;;  %v5173_v60 = vpop.permute.xlu0 %1612 }
 0x486   :  { %6870 = vst [vmem:[#allocation110_spill] sm:$0xff] %v5171_v16  ;;  %6871 = vst [vmem:[#allocation111_spill] sm:$0xff] %v5173_v60 }
 0x487   :  { %3678 = vset.pattern.permute.xlu1 %v6778_v46  ;;  %3690 = vset.pattern.permute.xlu0 %v6779_v7 }
 0x488   :  { %1640 = vperm.xlu1 %3678, %v4799_v41   ;;  %2532 = vperm.xlu0 %3690, %v4803_v3  }
 0x48a   :  { %v5179_v43 = vpop.permute.xlu1 %1220  ;;  %v5181_v33 = vpop.permute.xlu0 %2060 }
 0x48b   :  { %6872 = vst [vmem:[#allocation112_spill] sm:$0xff] %v5179_v43  ;;  %6873 = vst [vmem:[#allocation113_spill] sm:$0xff] %v5181_v33 }
 0x48c   :  { %3680 = vset.pattern.permute.xlu1 %v6775_v63  ;;  %3693 = vset.pattern.permute.xlu0 %v6782_v1 }
 0x48d   :  { %2088 = vperm.xlu1 %3680, %v4799_v41   ;;  %1424 = vperm.xlu0 %3693, %v4819_v51  }
 0x48f   :  { %v5187_v16 = vpop.permute.xlu1 %1616  ;;  %v5189_v60 = vpop.permute.xlu0 %2508 }
 0x490   :  { %6874 = vst [vmem:[#allocation114_spill] sm:$0xff] %v5187_v16  ;;  %6875 = vst [vmem:[#allocation115_spill] sm:$0xff] %v5189_v60 }
 0x491   :  { %3682 = vset.pattern.permute.xlu1 %v6779_v7  ;;  %3695 = vset.pattern.permute.xlu0 %v6785_v38 }
 0x492   :  { %2536 = vperm.xlu1 %3682, %v4799_v41   ;;  %1872 = vperm.xlu0 %3695, %v4819_v51  }
 0x494   :  { %v5195_v43 = vpop.permute.xlu1 %2064  ;;  %v5197_v33 = vpop.permute.xlu0 %1400 }
 0x495   :  { %6876 = vst [vmem:[#allocation116_spill] sm:$0xff] %v5195_v43  ;;  %6877 = vst [vmem:[#allocation117_spill] sm:$0xff] %v5197_v33 }
 0x496   :  { %3685 = vset.pattern.permute.xlu1 %v6782_v1  ;;  %3697 = vset.pattern.permute.xlu0 %v6788_v0 }
 0x497   :  { %1412 = vperm.xlu1 %3685, %v4803_v3   ;;  %2320 = vperm.xlu0 %3697, %v4819_v51  }
 0x499   :  { %v5203_v16 = vpop.permute.xlu1 %2512  ;;  %v5205_v60 = vpop.permute.xlu0 %1848 }
 0x49a   :  { %6878 = vst [vmem:[#allocation118_spill] sm:$0xff] %v5203_v16  ;;  %6879 = vst [vmem:[#allocation119_spill] sm:$0xff] %v5205_v60 }
 0x49b   :  { %3687 = vset.pattern.permute.xlu1 %v6785_v38  ;;  %3699 = vset.pattern.permute.xlu0 %v6791_v53 }
 0x49c   :  { %1860 = vperm.xlu1 %3687, %v4803_v3   ;;  %2768 = vperm.xlu0 %3699, %v4819_v51  }
 0x49e   :  { %v5211_v41 = vpop.permute.xlu1 %1388  ;;  %v5213_v43 = vpop.permute.xlu0 %2296 }
 0x49f   :  { %6880 = vst [vmem:[#allocation120_spill] sm:$0xff] %v5211_v41  ;;  %6881 = vst [vmem:[#allocation121_spill] sm:$0xff] %v5213_v43 }
 0x4a0   :  { %3689 = vset.pattern.permute.xlu1 %v6788_v0  ;;  %3700 = vset.pattern.permute.xlu0 %v6794_v39 }
 0x4a1   :  { %2308 = vperm.xlu1 %3689, %v4803_v3   ;;  %1255 = vperm.xlu0 %3700, %v4823_v45  }
 0x4a3   :  { %v5219_v16 = vpop.permute.xlu1 %1836  ;;  %v5221_v60 = vpop.permute.xlu0 %2744 }
 0x4a4   :  { %6882 = vst [vmem:[#allocation122_spill] sm:$0xff] %v5219_v16  ;;  %6883 = vst [vmem:[#allocation123_spill] sm:$0xff] %v5221_v60 }
 0x4a5   :  { %3691 = vset.pattern.permute.xlu1 %v6791_v53  ;;  %3702 = vset.pattern.permute.xlu0 %v6778_v46 }
 0x4a6   :  { %2756 = vperm.xlu1 %3691, %v4803_v3   ;;  %1644 = vperm.xlu0 %3702, %v4823_v45  }
 0x4a8   :  { %v5227_v43 = vpop.permute.xlu1 %2284  ;;  %v5229_v33 = vpop.permute.xlu0 %1225 }
 0x4a9   :  { %6884 = vst [vmem:[#allocation124_spill] sm:$0xff] %v5227_v43  ;;  %6885 = vst [vmem:[#allocation125_spill] sm:$0xff] %v5229_v33 }
 0x4aa   :  { %3692 = vset.pattern.permute.xlu1 %v6794_v39  ;;  %3704 = vset.pattern.permute.xlu0 %v6775_v63 }
 0x4ab   :  { %1260 = vperm.xlu1 %3692, %v4819_v51   ;;  %2092 = vperm.xlu0 %3704, %v4823_v45  }
 0x4ad   :  { %v5235_v60 = vpop.permute.xlu1 %2732  ;;  %v5237_v16 = vpop.permute.xlu0 %1620 }
 0x4ae   :  { %6886 = vst [vmem:[#allocation126_spill] sm:$0xff] %v5235_v60  ;;  %6887 = vst [vmem:[#allocation127_spill] sm:$0xff] %v5237_v16 }
 0x4af   :  { %3694 = vset.pattern.permute.xlu1 %v6778_v46  ;;  %3706 = vset.pattern.permute.xlu0 %v6779_v7 }
 0x4b0   :  { %1648 = vperm.xlu1 %3694, %v4819_v51   ;;  %2540 = vperm.xlu0 %3706, %v4823_v45  }
 0x4b2   :  { %v5243_v3 = vpop.permute.xlu1 %1230  ;;  %v5245_v43 = vpop.permute.xlu0 %2068 }
 0x4b3   :  { %6888 = vst [vmem:[#allocation128_spill] sm:$0xff] %v5243_v3  ;;  %6889 = vst [vmem:[#allocation129_spill] sm:$0xff] %v5245_v43 }
 0x4b4   :  { %3696 = vset.pattern.permute.xlu1 %v6775_v63  ;;  %3709 = vset.pattern.permute.xlu0 %v6782_v1 }
 0x4b5   :  { %2096 = vperm.xlu1 %3696, %v4819_v51   ;;  %1432 = vperm.xlu0 %3709, %v4831_v42  }
 0x4b7   :  { %v5251_v60 = vpop.permute.xlu1 %1624  ;;  %v5253_v16 = vpop.permute.xlu0 %2516 }
 0x4b8   :  { %6890 = vst [vmem:[#allocation130_spill] sm:$0xff] %v5251_v60  ;;  %6891 = vst [vmem:[#allocation131_spill] sm:$0xff] %v5253_v16 }
 0x4b9   :  { %3698 = vset.pattern.permute.xlu1 %v6779_v7  ;;  %3711 = vset.pattern.permute.xlu0 %v6785_v38 }
 0x4ba   :  { %2544 = vperm.xlu1 %3698, %v4819_v51   ;;  %1880 = vperm.xlu0 %3711, %v4831_v42  }
 0x4bc   :  { %v5259_v3 = vpop.permute.xlu1 %2072  ;;  %v5261_v43 = vpop.permute.xlu0 %1408 }
 0x4bd   :  { %6892 = vst [vmem:[#allocation132_spill] sm:$0xff] %v5259_v3  ;;  %6893 = vst [vmem:[#allocation133_spill] sm:$0xff] %v5261_v43 }
 0x4be   :  { %3701 = vset.pattern.permute.xlu1 %v6782_v1  ;;  %3713 = vset.pattern.permute.xlu0 %v6788_v0 }
 0x4bf   :  { %1420 = vperm.xlu1 %3701, %v4823_v45   ;;  %2328 = vperm.xlu0 %3713, %v4831_v42  }
 0x4c1   :  { %v5267_v60 = vpop.permute.xlu1 %2520  ;;  %v5269_v16 = vpop.permute.xlu0 %1856 }
 0x4c2   :  { %6894 = vst [vmem:[#allocation134_spill] sm:$0xff] %v5267_v60  ;;  %6895 = vst [vmem:[#allocation135_spill] sm:$0xff] %v5269_v16 }
 0x4c3   :  { %3703 = vset.pattern.permute.xlu1 %v6785_v38  ;;  %3715 = vset.pattern.permute.xlu0 %v6791_v53 }
 0x4c4   :  { %1868 = vperm.xlu1 %3703, %v4823_v45   ;;  %2776 = vperm.xlu0 %3715, %v4831_v42  }
 0x4c6   :  { %v5275_v51 = vpop.permute.xlu1 %1396  ;;  %v5277_v3 = vpop.permute.xlu0 %2304 }
 0x4c7   :  { %6896 = vst [vmem:[#allocation136_spill] sm:$0xff] %v5275_v51  ;;  %6897 = vst [vmem:[#allocation137_spill] sm:$0xff] %v5277_v3  ;;  %v5329_v51 = vld [vmem:[%s6726_s0 + $0x18] sm:$0xff] }
 0x4c8   :  { %3705 = vset.pattern.permute.xlu1 %v6788_v0  ;;  %3716 = vset.pattern.permute.xlu0 %v6794_v39  ;;  %vm1286_vm5 = vcmp.eq.s32.totalorder %v5329_v51, 0  ;;  %vm1510_vm10 = vcmp.eq.s32.totalorder %v5329_v51, 1  ;;  %vm1734_vm11 = vcmp.eq.s32.totalorder %v5329_v51, 2  ;;  %vm1958_vm0 = vcmp.eq.s32.totalorder %v5329_v51, 3 }
 0x4c9   :  { %2316 = vperm.xlu1 %3705, %v4823_v45   ;;  %1265 = vperm.xlu0 %3716, %v4835_v6  }
 0x4cb   :  { %v5283_v60 = vpop.permute.xlu1 %1844  ;;  %v5285_v16 = vpop.permute.xlu0 %2752 }
 0x4cc   :  { %6898 = vst [vmem:[#allocation138_spill] sm:$0xff] %v5283_v60  ;;  %6899 = vst [vmem:[#allocation139_spill] sm:$0xff] %v5285_v16  ;;  %v5300_v16 = vld [vmem:[%s6726_s0 + $0x8] sm:$0xff] }
 0x4cd   :  { %3707 = vset.pattern.permute.xlu1 %v6791_v53  ;;  %3718 = vset.pattern.permute.xlu0 %v6778_v46  ;;  %vm1284_vm2 = vcmp.eq.s32.totalorder %v5300_v16, 0  ;;  %vm1508_vm3 = vcmp.eq.s32.totalorder %v5300_v16, 1  ;;  %vm1732_vm6 = vcmp.eq.s32.totalorder %v5300_v16, 2  ;;  %vm1956_vm7 = vcmp.eq.s32.totalorder %v5300_v16, 3 }
 0x4ce   :  { %2764 = vperm.xlu1 %3707, %v4823_v45   ;;  %1652 = vperm.xlu0 %3718, %v4835_v6   ;;  %v1668_v33 = vsel %vm1508_vm3, %v4553_v58, 0.0  ;;  %vm2180_vm12 = vcmp.eq.s32.totalorder %v5300_v16, 4  ;;  %vm2404_vm13 = vcmp.eq.s32.totalorder %v5300_v16, 5  ;;  %vm2628_vm1 = vcmp.eq.s32.totalorder %v5300_v16, 6 }
 0x4d0   :  { %v5291_v3 = vpop.permute.xlu1 %2292  ;;  %v5293_v43 = vpop.permute.xlu0 %1235 }
 0x4d1   :  { %6900 = vst [vmem:[#allocation140_spill] sm:$0xff] %v5291_v3  ;;  %6901 = vst [vmem:[#allocation141_spill] sm:$0xff] %v5293_v43  ;;  %v1444_v3 = vsel %vm1284_vm2, %v4543_v55, 0.0 }
 0x4d2   :  { %3708 = vset.pattern.permute.xlu1 %v6794_v39  ;;  %3720 = vset.pattern.permute.xlu0 %v6775_v63  ;;  %v1476_v55 = vadd.f32 %v1444_v3, %v4545_v56 }
 0x4d3   :  { %1270 = vperm.xlu1 %3708, %v4831_v42   ;;  %2100 = vperm.xlu0 %3720, %v4835_v6  }
 0x4d4   :  { %v1700_v58 = vadd.f32 %v1668_v33, %v1476_v55  ;;  %v2116_v33 = vsel %vm1956_vm7, %v4563_v62, 0.0  ;;  %v1894_v62 = vsel %vm1734_vm11, %v4629_v25, 0.0  ;;  %vm2630_vm7 = vcmp.eq.s32.totalorder %v5329_v51, 6 }
 0x4d5   :  { %v5304_v45 = vpop.permute.xlu1 %2740  ;;  %v5306_v60 = vpop.permute.xlu0 %1628 }
 0x4d6   :  { %6902 = vst [vmem:[#allocation142_spill] sm:$0xff] %v5304_v45  ;;  %6903 = vst [vmem:[#allocation143_spill] sm:$0xff] %v5306_v60  ;;  %v5318_v45 = vld [vmem:[%s6726_s0] sm:$0xff] }
 0x4d7   :  { %3710 = vset.pattern.permute.xlu1 %v6778_v46  ;;  %3722 = vset.pattern.permute.xlu0 %v6779_v7  ;;  %vm1283_vm4 = vcmp.eq.s32.totalorder %v5318_v45, 0  ;;  %vm1507_vm8 = vcmp.eq.s32.totalorder %v5318_v45, 1  ;;  %vm1731_vm9 = vcmp.eq.s32.totalorder %v5318_v45, 2  ;;  %vm1955_vm14 = vcmp.eq.s32.totalorder %v5318_v45, 3 }
 0x4d8   :  { %1656 = vperm.xlu1 %3710, %v4831_v42   ;;  %2548 = vperm.xlu0 %3722, %v4835_v6   ;;  %v1443_v4 = vsel %vm1283_vm4, %v4587_v15, 0.0  ;;  %v1892_v15 = vsel %vm1732_vm6, %v4551_v57, 0.0  ;;  %vm2179_vm15 = vcmp.eq.s32.totalorder %v5318_v45, 4  ;;  %vm2403_vm2 = vcmp.eq.s32.totalorder %v5318_v45, 5 }
 0x4d9   :  { %v1475_v3 = vadd.f32 %v1443_v4, %v4579_v10  ;;  %v1924_v41 = vadd.f32 %v1892_v15, %v1700_v58  ;;  %v1667_v10 = vsel %vm1507_vm8, %v4577_v9, 0.0  ;;  %v1891_v58 = vsel %vm1731_vm9, %v4597_v18, 0.0 }
 0x4da   :  { %v5321_v60 = vpop.permute.xlu1 %1240  ;;  %v5323_v43 = vpop.permute.xlu0 %2076  ;;  %v1670_v15 = vsel %vm1510_vm10, %v4613_v21, 0.0  ;;  %v6906_v18 = vlaneseq  ;;  %vm2627_vm3 = vcmp.eq.s32.totalorder %v5318_v45, 6  ;;  %vm2406_vm4 = vcmp.eq.s32.totalorder %v5329_v51, 5 }
 0x4db   :  { %6904 = vst [vmem:[#allocation144_spill] sm:$0xff] %v5321_v60  ;;  %6905 = vst [vmem:[#allocation145_spill] sm:$0xff] %v5323_v43  ;;  %v1446_v60 = vsel %vm1286_vm5, %v4619_v22, 0.0  ;;  %v1699_v57 = vadd.f32 %v1667_v10, %v1475_v3  ;;  %v2564_v10 = vsel %vm2404_vm13, %v4571_v2, 0.0  ;;  %vm2182_vm5 = vcmp.eq.s32.totalorder %v5329_v51, 4  ;;  %v6913_v51 = vld [vmem:[#allocation7_spill] sm:$0xff] }
 0x4dc   :  { %3712 = vset.pattern.permute.xlu1 %v6775_v63  ;;  %3725 = vset.pattern.permute.xlu0 %v6782_v1  ;;  %v1478_v22 = vadd.f32 %v1446_v60, %v4605_v19  ;;  %v2148_v19 = vadd.f32 %v2116_v33, %v1924_v41  ;;  %v5373_v21 = vand.u32 127, %v6906_v18  ;;  %v2340_v60 = vsel %vm2180_vm12, %v4561_v61, 0.0  ;;  %v5385_v33 = vld [vmem:[%s6726_s0 + $0x10] sm:$0xff] }
 0x4dd   :  { %2104 = vperm.xlu1 %3712, %v4831_v42   ;;  %1440 = vperm.xlu0 %3725, %v4851_v35   ;;  %v1923_v9 = vadd.f32 %v1891_v58, %v1699_v57  ;;  %v2115_v61 = vsel %vm1955_vm14, %v4585_v14, 0.0  ;;  %v5399_v58 = vld [vmem:[%s6726_s0 + $0x28] sm:$0xff]  ;;  %v2339_v2 = vsel %vm2179_vm15, %v4603_v11, 0.0  ;;  %v2118_v14 = vsel %vm1958_vm0, %v4621_v23, 0.0 }
 0x4de   :  { %vm6751_vm6 = vcmp.lt.s32.totalorder %v5373_v21, 9  ;;  %vm1285_vm8 = vcmp.eq.s32.totalorder %v5385_v33, 0  ;;  %vm1509_vm9 = vcmp.eq.s32.totalorder %v5385_v33, 1  ;;  %vm1733_vm10 = vcmp.eq.s32.totalorder %v5385_v33, 2 }
 0x4df   :  { %v5340_v43 = vpop.permute.xlu1 %1632  ;;  %v5342_v56 = vpop.permute.xlu0 %2524  ;;  %v2147_v57 = vadd.f32 %v2115_v61, %v1923_v9  ;;  %v2342_v23 = vsel %vm2182_vm5, %v4637_v12, 0.0  ;;  %vm1288_vm11 = vcmp.eq.s32.totalorder %v5399_v58, 0  ;;  %vm1957_vm12 = vcmp.eq.s32.totalorder %v5385_v33, 3 }
 0x4e0   :  { %vm1512_vm13 = vcmp.eq.s32.totalorder %v5399_v58, 1  ;;  %vm2181_vm15 = vcmp.eq.s32.totalorder %v5385_v33, 4  ;;  %v2788_v12 = vsel %vm2628_vm1, %v4569_v49, 0.0  ;;  %v1445_v18 = vsel %vm1285_vm8, %v4645_v28, 0.0 }
 0x4e1   :  { %3714 = vset.pattern.permute.xlu1 %v6779_v7  ;;  %3727 = vset.pattern.permute.xlu0 %v6785_v38  ;;  %v2371_v9 = vadd.f32 %v2339_v2, %v2147_v57  ;;  %vm2405_vm5 = vcmp.eq.s32.totalorder %v5385_v33, 5  ;;  %v1448_v49 = vsel %vm1288_vm11, %v4655_v32, 0.0  ;;  %vm2629_vm1 = vcmp.eq.s32.totalorder %v5385_v33, 6 }
 0x4e2   :  { %2552 = vperm.xlu1 %3714, %v4831_v42   ;;  %1888 = vperm.xlu0 %3727, %v4851_v35   ;;  %v1702_v42 = vadd.f32 %v1670_v15, %v1478_v22  ;;  %v2372_v22 = vadd.f32 %v2340_v60, %v2148_v19  ;;  %v5445_v60 = vld [vmem:[%s6726_s0 + $0x38] sm:$0xff]  ;;  %v1672_v28 = vsel %vm1512_vm13, %v4713_v47, 0.0  ;;  %v1480_v61 = vadd.f32 %v1448_v49, %v4705_v13 }
 0x4e3   :  { %vm2184_vm8 = vcmp.eq.s32.totalorder %v5399_v58, 4  ;;  %vm1290_vm11 = vcmp.eq.s32.totalorder %v5445_v60, 0  ;;  %v1893_v13 = vsel %vm1733_vm10, %v4663_v34, 0.0  ;;  %vm1514_vm10 = vcmp.eq.s32.totalorder %v5445_v60, 1 }
 0x4e4   :  { %v5358_v4 = vpop.permute.xlu1 %2080  ;;  %v5360_v55 = vpop.permute.xlu0 %1416  ;;  %v1926_v25 = vadd.f32 %v1894_v62, %v1702_v42  ;;  %v2596_v15 = vadd.f32 %v2564_v10, %v2372_v22  ;;  %v5417_v42 = vld [vmem:[%s6726_s0 + $0x20] sm:$0xff]  ;;  %v1669_v10 = vsel %vm1509_vm9, %v4653_v31, 0.0  ;;  %v2566_v31 = vsel %vm2406_vm4, %v4631_v26, 0.0 }
 0x4e5   :  { %vm1287_vm0 = vcmp.eq.s32.totalorder %v5417_v42, 0  ;;  %vm1511_vm14 = vcmp.eq.s32.totalorder %v5417_v42, 1  ;;  %vm1735_vm4 = vcmp.eq.s32.totalorder %v5417_v42, 2 }
 0x4e6   :  { %3717 = vset.pattern.permute.xlu1 %v6782_v1  ;;  %3729 = vset.pattern.permute.xlu0 %v6788_v0  ;;  %v2150_v19 = vadd.f32 %v2118_v14, %v1926_v25  ;;  %v2820_v16 = vadd.f32 %v2788_v12, %v2596_v15  ;;  %v2563_v25 = vsel %vm2403_vm2, %v4595_v17, 0.0  ;;  %v1447_v32 = vsel %vm1287_vm0, %v4739_v29, 0.0  ;;  %v5488_v29 = vld [vmem:[%s6726_s0 + $0x30] sm:$0xff]  ;;  %v6911_v12 = vld [vmem:[#allocation5_spill] sm:$0xff] }
 0x4e7   :  { %1428 = vperm.xlu1 %3717, %v4835_v6   ;;  %2336 = vperm.xlu0 %3729, %v4851_v35   ;;  %v2595_v47 = vadd.f32 %v2563_v25, %v2371_v9  ;;  %v1477_v14 = vadd.f32 %v1445_v18, %v4639_v27  ;;  %vm1960_vm2 = vcmp.eq.s32.totalorder %v5399_v58, 3  ;;  %v2787_v17 = vsel %vm2627_vm3, %v4611_v20, 0.0  ;;  %v5493_v20 = vld [vmem:[%s6726_s0 + $0x48] sm:$0xff] }
 0x4e8   :  { %v2374_v22 = vadd.f32 %v2342_v23, %v2150_v19  ;;  %v1704_v27 = vadd.f32 %v1672_v28, %v1480_v61  ;;  %v1479_v45 = vadd.f32 %v1447_v32, %v4689_v40  ;;  %v2790_v15 = vsel %vm2630_vm7, %v4647_v30, 0.0 }
 0x4e9   :  { %v5376_v41 = vpop.permute.xlu1 %2528  ;;  %v5378_v3 = vpop.permute.xlu0 %1864  ;;  %v1701_v34 = vadd.f32 %v1669_v10, %v1477_v14  ;;  %v2117_v19 = vsel %vm1957_vm12, %v4671_v8, 0.0  ;;  %v5511_v40 = vsel %vm6751_vm6, %v2820_v16, -inf  ;;  %v2819_v23 = vadd.f32 %v2787_v17, %v2595_v47  ;;  %v6915_v10 = vld [vmem:[#allocation14_spill] sm:$0xff]  ;;  %v5538_v47 = vld [vmem:[%s6726_s0 + $0x40] sm:$0xff] }
 0x4ea   :  { %6907 = vst [vmem:[#allocation146_spill] sm:$0xff] %v5376_v41  ;;  %v2598_v26 = vadd.f32 %v2566_v31, %v2374_v22  ;;  %6910 = vst [vmem:[#allocation149_spill] sm:$0xff] %v5511_v40  ;;  %vm6912_vm0 = vcmp.eq.s32.totalorder %v5399_v58, 2  ;;  %vm2408_vm3 = vcmp.eq.s32.totalorder %v5399_v58, 5  ;;  %vm2183_vm7 = vcmp.eq.s32.totalorder %v5417_v42, 4  ;;  %v6914_v22 = vld [vmem:[#allocation11_spill] sm:$0xff] }
 0x4eb   :  { %3719 = vset.pattern.permute.xlu1 %v6785_v38  ;;  %3731 = vset.pattern.permute.xlu0 %v6791_v53  ;;  %v1925_v9 = vadd.f32 %v1893_v13, %v1701_v34  ;;  %vm1513_vm13 = vcmp.eq.s32.totalorder %v5488_v29, 1  ;;  %vm1962_vm12 = vcmp.eq.s32.totalorder %v5445_v60, 3  ;;  %vm1292_vm9 = vcmp.eq.s32.totalorder %v5493_v20, 0  ;;  %v6916_v14 = vld [vmem:[#allocation9_spill] sm:$0xff]  ;;  %v6917_v31 = vld [vmem:[#allocation15_spill] sm:$0xff] }
 0x4ec   :  { %1876 = vperm.xlu1 %3719, %v4835_v6   ;;  %2784 = vperm.xlu0 %3731, %v4851_v35   ;;  %v2341_v18 = vsel %vm2181_vm15, %v6913_v51, 0.0  ;;  %v1671_v49 = vsel %vm1511_vm14, %v6914_v22, 0.0  ;;  %v2822_v16 = vadd.f32 %v2790_v15, %v2598_v26  ;;  %v2120_v61 = vsel %vm1960_vm2, %v6915_v10, 0.0  ;;  %v6919_v34 = vld [vmem:[#allocation27_spill] sm:$0xff]  ;;  %v6920_v15 = vld [vmem:[#allocation25_spill] sm:$0xff] }
 0x4ed   :  { %v2149_v25 = vadd.f32 %v2117_v19, %v1925_v9  ;;  %v1703_v32 = vadd.f32 %v1671_v49, %v1479_v45  ;;  %v2565_v17 = vsel %vm2405_vm5, %v6916_v14, 0.0  ;;  %vm2407_vm14 = vcmp.eq.s32.totalorder %v5417_v42, 5  ;;  %v5563_v9 = vld [vmem:[%s6726_s0 + $0x58] sm:$0xff]  ;;  %v6922_v22 = vld [vmem:[#allocation33_spill] sm:$0xff] }
 0x4ee   :  { %v5419_v11 = vpop.permute.xlu1 %1404  ;;  %v5421_v62 = vpop.permute.xlu0 %2312  ;;  %v1450_v13 = vsel %vm1290_vm11, %v6917_v31, 0.0  ;;  %vm1740_vm15 = vcmp.eq.s32.totalorder %v5493_v20, 2  ;;  %vm1737_vm5 = vcmp.eq.s32.totalorder %v5488_v29, 2  ;;  %vm1516_vm11 = vcmp.eq.s32.totalorder %v5493_v20, 1 }
 0x4ef   :  { %6908 = vst [vmem:[#allocation147_spill] sm:$0xff] %v5421_v62  ;;  %v2373_v45 = vadd.f32 %v2341_v18, %v2149_v25  ;;  %v1482_v19 = vadd.f32 %v1450_v13, %v6920_v15  ;;  %v5585_v33 = vsel %vm6751_vm6, %v2822_v16, -inf  ;;  %v6924_v16 = vld [vmem:[#allocation8_spill] sm:$0xff]  ;;  %vm2631_vm2 = vcmp.eq.s32.totalorder %v5417_v42, 6  ;;  %v6950_v62 = vld [vmem:[#allocation45_spill] sm:$0xff] }
 0x4f0   :  { %3721 = vset.pattern.permute.xlu1 %v6788_v0  ;;  %3732 = vset.pattern.permute.xlu0 %v6794_v39 }
 0x4f1   :  { %2324 = vperm.xlu1 %3721, %v4835_v6   ;;  %1275 = vperm.xlu0 %3732, %v4855_v54   ;;  %v2597_v14 = vadd.f32 %v2565_v17, %v2373_v45  ;;  %v6929_v45 = vld [vmem:[#allocation17_spill] sm:$0xff] }
 0x4f3   :  { %v5466_v57 = vpop.permute.xlu1 %1852  ;;  %v5468_v2 = vpop.permute.xlu0 %2760 }
 0x4f4   :  { %6909 = vst [vmem:[#allocation148_spill] sm:$0xff] %v5468_v2  ;;  %v6948_v2 = vld [vmem:[#allocation18_spill] sm:$0xff] }
 0x4f5   :  { %3723 = vset.pattern.permute.xlu1 %v6791_v53  ;;  %3734 = vset.pattern.permute.xlu0 %v6778_v46 }
 0x4f6   :  { %2772 = vperm.xlu1 %3723, %v4835_v6   ;;  %1660 = vperm.xlu0 %3734, %v4855_v54   ;;  %v1896_v6 = vsel %vm6912_vm0, %v6911_v12, 0.0  ;;  %vm1289_vm0 = vcmp.eq.s32.totalorder %v5488_v29, 0  ;;  %v5567_v12 = vsel %vm6751_vm6, %v2819_v23, -inf }
 0x4f7   :  { %v1928_v28 = vadd.f32 %v1896_v6, %v1704_v27  ;;  %v6918_v27 = vld [vmem:[#allocation19_spill] sm:$0xff]  ;;  %v6921_v6 = vld [vmem:[#allocation10_spill] sm:$0xff]  ;;  %v1449_v49 = vsel %vm1289_vm0, %v6922_v22, 0.0  ;;  %vm1291_vm0 = vcmp.eq.s32.totalorder %v5538_v47, 0 }
 0x4f8   :  { %v5521_v30 = vpop.permute.xlu1 %2300  ;;  %v5523_v8 = vpop.permute.xlu0 %1245  ;;  %v1895_v26 = vsel %vm1735_vm4, %v6918_v27, 0.0  ;;  %v2789_v51 = vsel %vm2629_vm1, %v6921_v6, 0.0  ;;  %vm6925_vm1 = vcmp.eq.s32.totalorder %v5399_v58, 6  ;;  %v6926_v27 = vld [vmem:[#allocation12_spill] sm:$0xff]  ;;  %vm1961_vm4 = vcmp.eq.s32.totalorder %v5488_v29, 3  ;;  %v6938_v58 = vld [vmem:[#allocation35_spill] sm:$0xff] }
 0x4f9   :  { %v2152_v18 = vadd.f32 %v2120_v61, %v1928_v28  ;;  %v1927_v23 = vadd.f32 %v1895_v26, %v1703_v32  ;;  %v6923_v28 = vld [vmem:[#allocation6_spill] sm:$0xff]  ;;  %v5596_v32 = vld [vmem:[%s6726_s0 + $0x50] sm:$0xff]  ;;  %v5603_v17 = vsel %vm6925_vm1, %v6924_v16, 0.0  ;;  %v2821_v13 = vadd.f32 %v2789_v51, %v2597_v14 }
 0x4fa   :  { %3724 = vset.pattern.permute.xlu1 %v6794_v39  ;;  %3736 = vset.pattern.permute.xlu0 %v6775_v63  ;;  %v1674_v39 = vsel %vm1514_vm10, %v6919_v34, 0.0  ;;  %v2344_v61 = vsel %vm2184_vm8, %v6923_v28, 0.0  ;;  %vm6927_vm8 = vcmp.eq.s32.totalorder %v5417_v42, 3  ;;  %v6928_v34 = vld [vmem:[#allocation22_spill] sm:$0xff]  ;;  %vm6930_vm1 = vcmp.eq.s32.totalorder %v5445_v60, 2  ;;  %v6932_v51 = vld [vmem:[#allocation43_spill] sm:$0xff] }
 0x4fb   :  { %1280 = vperm.xlu1 %3724, %v4851_v35   ;;  %2108 = vperm.xlu0 %3736, %v4855_v54   ;;  %v1706_v31 = vadd.f32 %v1674_v39, %v1482_v19  ;;  %v2119_v26 = vsel %vm6927_vm8, %v6926_v27, 0.0  ;;  %v1481_v39 = vadd.f32 %v1449_v49, %v6928_v34  ;;  %v1898_v15 = vsel %vm6930_vm1, %v6929_v45, 0.0  ;;  %v6931_v19 = vld [vmem:[#allocation30_spill] sm:$0xff]  ;;  %v6933_v28 = vld [vmem:[#allocation41_spill] sm:$0xff]  ;;  %v6934_v34 = vld [vmem:[#allocation16_spill] sm:$0xff] }
 0x4fc   :  { %v1452_v6 = vsel %vm1292_vm9, %v6931_v19, 0.0  ;;  %v1676_v22 = vsel %vm1516_vm11, %v6932_v51, 0.0  ;;  %v2151_v49 = vadd.f32 %v2119_v26, %v1927_v23  ;;  %vm2185_vm8 = vcmp.eq.s32.totalorder %v5488_v29, 4  ;;  %v6936_v45 = vld [vmem:[#allocation24_spill] sm:$0xff] }
 0x4fd   :  { %v5577_v25 = vpop.permute.xlu1 %2748  ;;  %v5579_v10 = vpop.permute.xlu0 %1636  ;;  %v1930_v14 = vadd.f32 %v1898_v15, %v1706_v31  ;;  %vm1742_vm1 = vcmp.eq.s32.totalorder %v5563_v9, 2  ;;  %vm1517_vm10 = vcmp.eq.s32.totalorder %v5596_v32, 1  ;;  %v2568_v23 = vsel %vm2408_vm3, %v6934_v34, 0.0  ;;  %v6935_v31 = vld [vmem:[#allocation21_spill] sm:$0xff]  ;;  %v6939_v34 = vld [vmem:[#allocation38_spill] sm:$0xff] }
 0x4fe   :  { %v2343_v26 = vsel %vm2183_vm7, %v6935_v31, 0.0  ;;  %v6937_v15 = vld [vmem:[#allocation29_spill] sm:$0xff]  ;;  %vm2188_vm9 = vcmp.eq.s32.totalorder %v5493_v20, 4  ;;  %vm1518_vm11 = vcmp.eq.s32.totalorder %v5563_v9, 1  ;;  %vm1293_vm3 = vcmp.eq.s32.totalorder %v5596_v32, 0 }
 0x4ff   :  { %3726 = vset.pattern.permute.xlu1 %v6778_v46  ;;  %3738 = vset.pattern.permute.xlu0 %v6779_v7  ;;  %v2376_v46 = vadd.f32 %v2344_v61, %v2152_v18  ;;  %v1484_v18 = vadd.f32 %v1452_v6, %v6933_v28  ;;  %v1451_v61 = vsel %vm1291_vm0, %v4891_v59, 0.0  ;;  %v1673_v59 = vsel %vm1513_vm13, %v6936_v45, 0.0 }
 0x500   :  { %1664 = vperm.xlu1 %3726, %v4851_v35   ;;  %2556 = vperm.xlu0 %3738, %v4855_v54   ;;  %v2122_v19 = vsel %vm1962_vm12, %v6937_v15, 0.0  ;;  %v1705_v6 = vadd.f32 %v1673_v59, %v1481_v39  ;;  %v1897_v28 = vsel %vm1737_vm5, %v6938_v58, 0.0  ;;  %vm1963_vm13 = vcmp.eq.s32.totalorder %v5538_v47, 3  ;;  %v6943_v58 = vld [vmem:[#allocation46_spill] sm:$0xff] }
 0x501   :  { %v1708_v51 = vadd.f32 %v1676_v22, %v1484_v18  ;;  %v1483_v31 = vadd.f32 %v1451_v61, %v6939_v34  ;;  %vm1966_vm7 = vcmp.eq.s32.totalorder %v5563_v9, 3  ;;  %v5660_v39 = vsel %vm6751_vm6, %v2821_v13, -inf  ;;  %v6941_v22 = vld [vmem:[#allocation13_spill] sm:$0xff]  ;;  %v6942_v61 = vld [vmem:[#allocation32_spill] sm:$0xff] }
 0x502   :  { %v5630_v16 = vpop.permute.xlu1 %1250  ;;  %v5632_v27 = vpop.permute.xlu0 %2084  ;;  %6940 = vst [vmem:[#allocation5_spill] sm:$0xff] %v5660_v39  ;;  %v2600_v18 = vadd.f32 %v2568_v23, %v2376_v46  ;;  %vm2634_vm12 = vcmp.eq.s32.totalorder %v5445_v60, 6  ;;  %v2375_v45 = vadd.f32 %v2343_v26, %v2151_v49  ;;  %v2154_v59 = vadd.f32 %v2122_v19, %v1930_v14  ;;  %v6945_v26 = vld [vmem:[#allocation40_spill] sm:$0xff] }
 0x503   :  { %vm2412_vm5 = vcmp.eq.s32.totalorder %v5493_v20, 5  ;;  %v1900_v15 = vsel %vm1740_vm15, %v6942_v61, 0.0  ;;  %vm6944_vm0 = vcmp.eq.s32.totalorder %v5563_v9, 0  ;;  %v1678_v46 = vsel %vm1518_vm11, %v4931_v50, 0.0 }
 0x504   :  { %3728 = vset.pattern.permute.xlu1 %v6775_v63  ;;  %3740 = vset.pattern.permute.xlu0 %v6791_v53  ;;  %v2567_v63 = vsel %vm2407_vm14, %v6941_v22, 0.0  ;;  %v1454_v13 = vsel %vm6944_vm0, %v6943_v58, 0.0  ;;  %v1453_v49 = vsel %vm1293_vm3, %v4955_v24, 0.0  ;;  %v1929_v23 = vadd.f32 %v1897_v28, %v1705_v6  ;;  %v6947_v22 = vld [vmem:[#allocation56_spill] sm:$0xff] }
 0x505   :  { %2112 = vperm.xlu1 %3728, %v4851_v35   ;;  %vm6946_vm15 = vcmp.eq.s32.totalorder %v5538_v47, 1  ;;  %v1932_v34 = vadd.f32 %v1900_v15, %v1708_v51  ;;  %v1486_v61 = vadd.f32 %v1454_v13, %v6947_v22  ;;  %vm6949_vm11 = vcmp.eq.s32.totalorder %v5445_v60, 4  ;;  %v6952_v51 = vld [vmem:[#allocation50_spill] sm:$0xff]  ;;  %v6954_v15 = vld [vmem:[#allocation53_spill] sm:$0xff] }
 0x506   :  { %v1675_v19 = vsel %vm6946_vm15, %v6945_v26, 0.0  ;;  %v2346_v50 = vsel %vm6949_vm11, %v6948_v2, 0.0  ;;  %vm6951_vm3 = vcmp.eq.s32.totalorder %v5493_v20, 3  ;;  %vm1741_vm0 = vcmp.eq.s32.totalorder %v5596_v32, 2  ;;  %v5714_v26 = vld [vmem:[%s6726_s0 + $0x60] sm:$0xff] }
 0x507   :  { %v5680_v14 = vpop.permute.xlu1 %1640  ;;  %v5687_v58 = vpop.permute.xlu0 %2532  ;;  %v2124_v24 = vsel %vm6951_vm3, %v6950_v62, 0.0  ;;  %v1707_v41 = vadd.f32 %v1675_v19, %v1483_v31  ;;  %v2599_v6 = vadd.f32 %v2567_v63, %v2375_v45  ;;  %vm2633_vm15 = vcmp.eq.s32.totalorder %v5488_v29, 6  ;;  %v6955_v62 = vld [vmem:[#allocation23_spill] sm:$0xff]  ;;  %v6956_v31 = vld [vmem:[#allocation26_spill] sm:$0xff] }
 0x508   :  { %vm2190_vm14 = vcmp.eq.s32.totalorder %v5563_v9, 4  ;;  %vm6953_vm6 = vcmp.eq.s32.totalorder %v5538_v47, 2  ;;  %vm1965_vm11 = vcmp.eq.s32.totalorder %v5596_v32, 3  ;;  %v1710_v2 = vadd.f32 %v1678_v46, %v1486_v61  ;;  %v6957_v19 = vld [vmem:[#allocation31_spill] sm:$0xff]  ;;  %v6961_v61 = vld [vmem:[#allocation48_spill] sm:$0xff] }
 0x509   :  { %3730 = vset.pattern.permute.xlu1 %v6779_v7  ;;  %v1899_v28 = vsel %vm6953_vm6, %v6952_v51, 0.0  ;;  %v1485_v13 = vadd.f32 %v1453_v49, %v6954_v15  ;;  %v2791_v7 = vsel %vm2631_vm2, %v6955_v62, 0.0  ;;  %v2121_v63 = vsel %vm1961_vm4, %v6956_v31, 0.0 }
 0x50a   :  { %2560 = vperm.xlu1 %3730, %v4851_v35   ;;  %v2378_v45 = vadd.f32 %v2346_v50, %v2154_v59  ;;  %v2824_v46 = vadd.f32 %v5603_v17, %v2600_v18  ;;  %vm6958_vm6 = vcmp.eq.s32.totalorder %v5445_v60, 5  ;;  %v2153_v42 = vadd.f32 %v2121_v63, %v1929_v23  ;;  %v5725_v59 = vld [vmem:[%s6726_s0 + $0x68] sm:$0xff]  ;;  %v6960_v17 = vld [vmem:[#allocation37_spill] sm:$0xff]  ;;  %v6962_v50 = vld [vmem:[#allocation55_spill] sm:$0xff] }
 0x50b   :  { %v2570_v35 = vsel %vm6958_vm6, %v6957_v19, 0.0  ;;  %v2156_v49 = vadd.f32 %v2124_v24, %v1932_v34  ;;  %vm1295_vm4 = vcmp.eq.s32.totalorder %v5714_v26, 0  ;;  %v2345_v18 = vsel %vm2185_vm8, %v6960_v17, 0.0  ;;  %v6963_v19 = vld [vmem:[#allocation34_spill] sm:$0xff] }
 0x50c   :  { %v5728_v22 = vpop.permute.xlu1 %2088  ;;  %vm2411_vm6 = vcmp.eq.s32.totalorder %v5538_v47, 5  ;;  %v1902_v23 = vsel %vm1742_vm1, %v6961_v61, 0.0  ;;  %v1931_v34 = vadd.f32 %v1899_v28, %v1707_v41  ;;  %v1677_v24 = vsel %vm1517_vm10, %v6962_v50, 0.0  ;;  %v5742_v31 = vpop.permute.xlu0 %1424  ;;  %v6964_v28 = vld [vmem:[#allocation59_spill] sm:$0xff]  ;;  %v6967_v61 = vld [vmem:[#allocation20_spill] sm:$0xff] }
 0x50d   :  { %6959 = vst [vmem:[#allocation7_spill] sm:$0xff] %v5728_v22  ;;  %v2823_v51 = vadd.f32 %v2791_v7, %v2599_v6  ;;  %vm2635_vm2 = vcmp.eq.s32.totalorder %v5538_v47, 6  ;;  %v1934_v15 = vadd.f32 %v1902_v23, %v1710_v2  ;;  %v1709_v62 = vadd.f32 %v1677_v24, %v1485_v13  ;;  %v6965_v6 = vld [vmem:[#allocation64_spill] sm:$0xff]  ;;  %v6966_v7 = vld [vmem:[#allocation42_spill] sm:$0xff]  ;;  %v6968_v50 = vld [vmem:[#allocation47_spill] sm:$0xff] }
 0x50e   :  { %vm2189_vm3 = vcmp.eq.s32.totalorder %v5596_v32, 4  ;;  %3733 = vset.pattern.permute.xlu1 %v6782_v1  ;;  %v2602_v63 = vadd.f32 %v2570_v35, %v2378_v45  ;;  %v2348_v41 = vsel %vm2188_vm9, %v6963_v19, 0.0  ;;  %v2126_v17 = vsel %vm1966_vm7, %v6964_v28, 0.0 }
 0x50f   :  { %vm1296_vm10 = vcmp.eq.s32.totalorder %v5725_v59, 0  ;;  %v1901_v2 = vsel %vm1741_vm0, %v6965_v6, 0.0  ;;  %1436 = vperm.xlu1 %3733, %v4855_v54   ;;  %v2377_v13 = vadd.f32 %v2345_v18, %v2153_v42  ;;  %v2123_v1 = vsel %vm1963_vm13, %v6966_v7, 0.0  ;;  %v6978_v7 = vld [vmem:[#allocation39_spill] sm:$0xff] }
 0x510   :  { %v2380_v45 = vadd.f32 %v2348_v41, %v2156_v49  ;;  %v1455_v35 = vsel %vm1295_vm4, %v5019_v44, 0.0  ;;  %v2794_v23 = vsel %vm2634_vm12, %v6967_v61, 0.0  ;;  %v2572_v24 = vsel %vm2412_vm5, %v6968_v50, 0.0  ;;  %v6971_v49 = vld [vmem:[#allocation52_spill] sm:$0xff] }
 0x511   :  { %v2155_v19 = vadd.f32 %v2123_v1, %v1931_v34  ;;  %v5768_v28 = vpop.permute.xlu1 %2536  ;;  %vm6970_vm8 = vcmp.lt.s32.totalorder %v5373_v21, 9  ;;  %vm2638_vm1 = vcmp.eq.s32.totalorder %v5563_v9, 6  ;;  %vm6972_vm9 = vcmp.eq.s32.totalorder %v5538_v47, 4  ;;  %v6973_v41 = vld [vmem:[#allocation28_spill] sm:$0xff] }
 0x512   :  { %6969 = vst [vmem:[#allocation11_spill] sm:$0xff] %v5768_v28  ;;  %v5772_v42 = vsel %vm6970_vm8, %v2824_v46, -inf  ;;  %v2347_v44 = vsel %vm6972_vm9, %v6971_v49, 0.0  ;;  %vm2413_vm13 = vcmp.eq.s32.totalorder %v5596_v32, 5  ;;  %v2158_v60 = vadd.f32 %v2126_v17, %v1934_v15  ;;  %vm6975_vm4 = vmmov %vm6970_vm8  ;;  %v5793_v17 = vpop.permute.xlu0 %1872  ;;  %v6981_v61 = vld [vmem:[#allocation68_spill] sm:$0xff]  ;;  %v6984_v49 = vld [vmem:[#allocation61_spill] sm:$0xff] }
 0x513   :  { %v1933_v18 = vadd.f32 %v1901_v2, %v1709_v62  ;;  %vm1519_vm7 = vcmp.eq.s32.totalorder %v5714_v26, 1  ;;  %vm6974_vm12 = vcmp.eq.s32.totalorder %v5488_v29, 5  ;;  %vm1967_vm5 = vcmp.eq.s32.totalorder %v5714_v26, 3  ;;  %3735 = vset.pattern.permute.xlu1 %v6785_v38  ;;  %6977 = vst [vmem:[#allocation9_spill] sm:$0xff] %v5793_v17  ;;  %v6979_v38 = vld [vmem:[#allocation49_spill] sm:$0xff]  ;;  %v7034_v28 = vld [vmem:[#allocation86_spill] sm:$0xff] }
 0x514   :  { %v2569_v34 = vsel %vm6974_vm12, %v6973_v41, 0.0  ;;  %vm1520_vm0 = vcmp.eq.s32.totalorder %v5725_v59, 1  ;;  %v1487_v46 = vadd.f32 %v1455_v35, %v4973_v37  ;;  %v5789_v6 = vsel %vm6975_vm4, %v2823_v51, -inf  ;;  %1884 = vperm.xlu1 %3735, %v4855_v54   ;;  %v6986_v41 = vld [vmem:[#allocation66_spill] sm:$0xff]  ;;  %v7040_v17 = vld [vmem:[#allocation124_spill] sm:$0xff] }
 0x515   :  { %6976 = vst [vmem:[#allocation14_spill] sm:$0xff] %v5789_v6  ;;  %v2601_v15 = vadd.f32 %v2569_v34, %v2377_v13  ;;  %v2604_v62 = vadd.f32 %v2572_v24, %v2380_v45  ;;  %vm2637_vm8 = vcmp.eq.s32.totalorder %v5596_v32, 6  ;;  %vm1743_vm9 = vcmp.eq.s32.totalorder %v5714_v26, 2  ;;  %v6980_v13 = vld [vmem:[#allocation57_spill] sm:$0xff]  ;;  %v6982_v24 = vld [vmem:[#allocation36_spill] sm:$0xff] }
 0x516   :  { %v2826_v2 = vadd.f32 %v2794_v23, %v2602_v63  ;;  %v2793_v37 = vsel %vm2633_vm15, %v6978_v7, 0.0  ;;  %v2350_v51 = vsel %vm2190_vm14, %v6979_v38, 0.0  ;;  %v2379_v1 = vadd.f32 %v2347_v44, %v2155_v19  ;;  %v5810_v63 = vld [vmem:[%s6726_s0 + $0x70] sm:$0xff]  ;;  %v5816_v50 = vpop.permute.xlu1 %1412  ;;  %v6987_v7 = vld [vmem:[#allocation44_spill] sm:$0xff] }
 0x517   :  { %v2125_v45 = vsel %vm1965_vm11, %v6980_v13, 0.0  ;;  %vm1744_vm12 = vcmp.eq.s32.totalorder %v5725_v59, 2  ;;  %v2382_v29 = vadd.f32 %v2350_v51, %v2158_v60  ;;  %v1679_v23 = vsel %vm1519_vm7, %v6981_v61, 0.0  ;;  %v6988_v51 = vld [vmem:[#allocation78_spill] sm:$0xff] }
 0x518   :  { %v2157_v35 = vadd.f32 %v2125_v45, %v1933_v18  ;;  %vm1297_vm14 = vcmp.eq.s32.totalorder %v5810_v63, 0  ;;  %vm6983_vm15 = vcmp.eq.s32.totalorder %v5493_v20, 6  ;;  %vm6985_vm11 = vcmp.eq.s32.totalorder %v5563_v9, 5  ;;  %v5836_v20 = vld [vmem:[%s6726_s0 + $0x78] sm:$0xff]  ;;  %3737 = vset.pattern.permute.xlu1 %v6788_v0 }
 0x519   :  { %v2796_v19 = vsel %vm6983_vm15, %v6982_v24, 0.0  ;;  %v2574_v44 = vsel %vm6985_vm11, %v6984_v49, 0.0  ;;  %v2349_v60 = vsel %vm2189_vm3, %v6986_v41, 0.0  ;;  %vm1968_vm4 = vcmp.eq.s32.totalorder %v5725_v59, 3  ;;  %2332 = vperm.xlu1 %3737, %v4855_v54   ;;  %v6991_v49 = vld [vmem:[#allocation60_spill] sm:$0xff]  ;;  %v6994_v41 = vld [vmem:[#allocation69_spill] sm:$0xff] }
 0x51a   :  { %v1711_v18 = vadd.f32 %v1679_v23, %v1487_v46  ;;  %v2825_v34 = vadd.f32 %v2793_v37, %v2601_v15  ;;  %v2571_v38 = vsel %vm2411_vm6, %v6987_v7, 0.0  ;;  %vm2192_vm7 = vcmp.eq.s32.totalorder %v5725_v59, 4  ;;  %v6989_v37 = vld [vmem:[#allocation54_spill] sm:$0xff] }
 0x51b   :  { %vm2640_vm15 = vcmp.eq.s32.totalorder %v5725_v59, 6  ;;  %v1903_v13 = vsel %vm1743_vm9, %v6988_v51, 0.0  ;;  %v2828_v46 = vadd.f32 %v2796_v19, %v2604_v62  ;;  %v2603_v15 = vadd.f32 %v2571_v38, %v2379_v1  ;;  %v6992_v1 = vld [vmem:[#allocation71_spill] sm:$0xff]  ;;  %v5864_v19 = vpop.permute.xlu0 %2320 }
 0x51c   :  { %v2795_v45 = vsel %vm2635_vm2, %v6989_v37, 0.0  ;;  %v1457_v61 = vsel %vm1297_vm14, %v5083_v48, 0.0  ;;  %vm6990_vm3 = vcmp.lt.s32.totalorder %v5373_v21, 9  ;;  %v2606_v24 = vadd.f32 %v2574_v44, %v2382_v29  ;;  %v5862_v48 = vld [vmem:[%s6726_s0 + $0x80] sm:$0xff]  ;;  %6993 = vst [vmem:[#allocation15_spill] sm:$0xff] %v5864_v19  ;;  %v7029_v19 = vld [vmem:[#allocation76_spill] sm:$0xff] }
 0x51d   :  { %v5851_v23 = vsel %vm6990_vm3, %v2826_v2, -inf  ;;  %v1456_v0 = vsel %vm1296_vm10, %v6991_v49, 0.0  ;;  %v2381_v62 = vadd.f32 %v2349_v60, %v2157_v35  ;;  %v1680_v47 = vsel %vm1520_vm0, %v6992_v1, 0.0  ;;  %v5871_v35 = vpop.permute.xlu1 %1860  ;;  %vm6995_vm11 = vmmov %vm6990_vm3  ;;  %3739 = vset.pattern.permute.xlu1 %v6791_v53  ;;  %v7000_v53 = vld [vmem:[#allocation67_spill] sm:$0xff] }
 0x51e   :  { %v1488_v2 = vadd.f32 %v1456_v0, %v6994_v41  ;;  %vm2415_vm2 = vcmp.eq.s32.totalorder %v5714_v26, 5  ;;  %vm1298_vm6 = vcmp.eq.s32.totalorder %v5836_v20, 0  ;;  %v1935_v29 = vadd.f32 %v1903_v13, %v1711_v18  ;;  %v6997_v18 = vld [vmem:[#allocation51_spill] sm:$0xff]  ;;  %v6998_v13 = vld [vmem:[#allocation58_spill] sm:$0xff]  ;;  %2780 = vperm.xlu1 %3739, %v4855_v54  }
 0x51f   :  { %vm1521_vm10 = vcmp.eq.s32.totalorder %v5810_v63, 1  ;;  %vm1299_vm9 = vcmp.eq.s32.totalorder %v5862_v48, 0  ;;  %v1489_v44 = vadd.f32 %v1457_v61, %v5037_v36  ;;  %vm1745_vm14 = vcmp.eq.s32.totalorder %v5810_v63, 2  ;;  %v6999_v61 = vld [vmem:[#allocation70_spill] sm:$0xff]  ;;  %2888 = vmax.xlane.f32.xlu0 %v5511_v40  ;;  %v5922_v41 = vpop.permute.xlu0 %2768 }
 0x520   :  { %v5878_v60 = vsel %vm6995_vm11, %v2825_v34, -inf  ;;  %v5882_v7 = vsel %vm6990_vm3, %v2828_v46, -inf  ;;  %v2798_v38 = vsel %vm2638_vm1, %v6997_v18, 0.0  ;;  %v2827_v51 = vadd.f32 %v2795_v45, %v2603_v15  ;;  %v5902_v15 = vld [vmem:[%s6726_s0 + $0x90] sm:$0xff]  ;;  %7005 = vst [vmem:[#allocation27_spill] sm:$0xff] %v5922_v41  ;;  %v7006_v18 = vld [vmem:[#allocation92_spill] sm:$0xff] }
 0x521   :  { %6996 = vst [vmem:[#allocation19_spill] sm:$0xff] %v5878_v60  ;;  %v2573_v37 = vsel %vm2413_vm13, %v6998_v13, 0.0  ;;  %v1712_v36 = vadd.f32 %v1680_v47, %v1488_v2  ;;  %vm2639_vm0 = vcmp.eq.s32.totalorder %v5714_v26, 6  ;;  %v2127_v46 = vsel %vm1967_vm5, %v6999_v61, 0.0  ;;  %v5924_v2 = vpop.permute.xlu1 %2308  ;;  %v7009_v61 = vld [vmem:[#allocation73_spill] sm:$0xff] }
 0x522   :  { %v2605_v34 = vadd.f32 %v2573_v37, %v2381_v62  ;;  %vm2193_vm11 = vcmp.eq.s32.totalorder %v5810_v63, 4  ;;  %v1459_v9 = vsel %vm1299_vm9, %v5147_v5, 0.0  ;;  %v2830_v45 = vadd.f32 %v2798_v38, %v2606_v24  ;;  %v7001_v62 = vld [vmem:[#allocation82_spill] sm:$0xff]  ;;  %v7003_v24 = vld [vmem:[#allocation80_spill] sm:$0xff] }
 0x523   :  { %v2797_v49 = vsel %vm2637_vm8, %v7000_v53, 0.0  ;;  %vm2416_vm1 = vcmp.eq.s32.totalorder %v5725_v59, 5  ;;  %v2159_v0 = vadd.f32 %v2127_v46, %v1935_v29  ;;  %v1681_v1 = vsel %vm1521_vm10, %v7001_v62, 0.0  ;;  %v7002_v5 = vld [vmem:[#allocation62_spill] sm:$0xff]  ;;  %vm7007_vm10 = vmmov %vm6990_vm3  ;;  %v7011_v62 = vld [vmem:[#allocation63_spill] sm:$0xff]  ;;  %2890 = vmax.xlane.f32.xlu0 %v5660_v39 }
 0x524   :  { %vm1301_vm13 = vcmp.eq.s32.totalorder %v5902_v15, 0  ;;  %v1904_v54 = vsel %vm1744_vm12, %v7002_v5, 0.0  ;;  %vm1746_vm5 = vcmp.eq.s32.totalorder %v5836_v20, 2  ;;  %vm7004_vm8 = vcmp.eq.s32.totalorder %v5714_v26, 4  ;;  %v7025_v39 = vld [vmem:[#allocation94_spill] sm:$0xff] }
 0x525   :  { %v2351_v32 = vsel %vm7004_vm8, %v7003_v24, 0.0  ;;  %v1713_v47 = vadd.f32 %v1681_v1, %v1489_v44  ;;  %vm1523_vm9 = vcmp.eq.s32.totalorder %v5862_v48, 1  ;;  %v1936_v29 = vadd.f32 %v1904_v54, %v1712_v36  ;;  %v7010_v36 = vld [vmem:[#allocation120_spill] sm:$0xff] }
 0x526   :  { %v1905_v38 = vsel %vm1745_vm14, %v7006_v18, 0.0  ;;  %vm1971_vm12 = vcmp.eq.s32.totalorder %v5862_v48, 3  ;;  %v1491_v13 = vadd.f32 %v1459_v9, %v5101_v52  ;;  %v5933_v37 = vsel %vm7007_vm10, %v2827_v51, -inf  ;;  %v7012_v52 = vld [vmem:[#allocation65_spill] sm:$0xff]  ;;  %v7014_v54 = vld [vmem:[#allocation96_spill] sm:$0xff] }
 0x527   :  { %7008 = vst [vmem:[#allocation25_spill] sm:$0xff] %v5933_v37  ;;  %v2829_v44 = vadd.f32 %v2797_v49, %v2605_v34  ;;  %v2128_v46 = vsel %vm1968_vm4, %v7009_v61, 0.0  ;;  %vm1747_vm3 = vcmp.eq.s32.totalorder %v5862_v48, 2  ;;  %v1461_v53 = vsel %vm1301_vm13, %v7010_v36, 0.0  ;;  %v5954_v9 = vld [vmem:[%s6726_s0 + $0xa0] sm:$0xff]  ;;  %vm7013_vm4 = vmmov %vm7007_vm10  ;;  %v5970_v61 = vpop.permute.xlu1 %2756  ;;  %v7016_v36 = vld [vmem:[#allocation72_spill] sm:$0xff]  ;;  %2894 = vmax.xlane.f32.xlu0 %v5789_v6 }
 0x528   :  { %v2352_v1 = vsel %vm2192_vm7, %v7011_v62, 0.0  ;;  %v5948_v51 = vsel %vm2640_vm15, %v7012_v52, 0.0  ;;  %v2383_v34 = vadd.f32 %v2351_v32, %v2159_v0  ;;  %vm2195_vm14 = vcmp.eq.s32.totalorder %v5862_v48, 4  ;;  %v7015_v18 = vld [vmem:[#allocation109_spill] sm:$0xff]  ;;  %v7018_v52 = vld [vmem:[#allocation106_spill] sm:$0xff] }
 0x529   :  { %v5959_v49 = vsel %vm7013_vm4, %v2830_v45, -inf  ;;  %vm2417_vm7 = vcmp.eq.s32.totalorder %v5810_v63, 5  ;;  %v1937_v5 = vadd.f32 %v1905_v38, %v1713_v47  ;;  %v1683_v0 = vsel %vm1523_vm9, %v7014_v54, 0.0  ;;  %v7017_v38 = vld [vmem:[#allocation74_spill] sm:$0xff]  ;;  %vm7019_vm9 = vmmov %vm7013_vm4  ;;  %v7020_v54 = vld [vmem:[#allocation84_spill] sm:$0xff] }
 0x52a   :  { %vm1525_vm15 = vcmp.eq.s32.totalorder %v5902_v15, 1  ;;  %vm1303_vm13 = vcmp.eq.s32.totalorder %v5954_v9, 0  ;;  %v2160_v24 = vadd.f32 %v2128_v46, %v1936_v29  ;;  %vm2641_vm8 = vcmp.eq.s32.totalorder %v5810_v63, 6 }
 0x52b   :  { %v1715_v32 = vadd.f32 %v1683_v0, %v1491_v13  ;;  %vm1973_vm10 = vcmp.eq.s32.totalorder %v5902_v15, 3  ;;  %v1493_v45 = vadd.f32 %v1461_v53, %v7015_v18  ;;  %v2575_v47 = vsel %vm2415_vm2, %v7016_v36, 0.0  ;;  %v5983_v13 = vpop.permute.xlu0 %1255  ;;  %v7022_v18 = vld [vmem:[#allocation136_spill] sm:$0xff]  ;;  %2898 = vmax.xlane.f32.xlu0 %v5878_v60 }
 0x52c   :  { %v5978_v62 = vsel %vm1298_vm6, %v7017_v38, 0.0  ;;  %v1907_v29 = vsel %vm1747_vm3, %v7018_v52, 0.0  ;;  %v5987_v46 = vsel %vm7019_vm9, %v2829_v44, -inf  ;;  %v2607_v53 = vadd.f32 %v2575_v47, %v2383_v34  ;;  %v5997_v38 = vld [vmem:[%s6726_s0 + $0xb0] sm:$0xff]  ;;  %v7023_v52 = vld [vmem:[#allocation81_spill] sm:$0xff] }
 0x52d   :  { %vm7021_vm4 = vcmp.eq.s32.totalorder %v5810_v63, 3  ;;  %vm1749_vm2 = vcmp.eq.s32.totalorder %v5902_v15, 2  ;;  %v1463_v36 = vsel %vm1303_vm13, %v7022_v18, 0.0  ;;  %v2799_v44 = vsel %vm2639_vm0, %v7023_v52, 0.0  ;;  %v7024_v47 = vld [vmem:[#allocation111_spill] sm:$0xff] }
 0x52e   :  { %v2129_v0 = vsel %vm7021_vm4, %v7020_v54, 0.0  ;;  %vm1522_vm6 = vcmp.eq.s32.totalorder %v5836_v20, 1  ;;  %v1685_v54 = vsel %vm1525_vm15, %v7024_v47, 0.0  ;;  %vm1305_vm3 = vcmp.eq.s32.totalorder %v5997_v38, 0  ;;  %v7026_v52 = vld [vmem:[#allocation75_spill] sm:$0xff]  ;;  %v7028_v47 = vld [vmem:[#allocation125_spill] sm:$0xff] }
 0x52f   :  { %v2161_v34 = vadd.f32 %v2129_v0, %v1937_v5  ;;  %v6008_v18 = vadd.f32 %v2352_v1, %v2160_v24  ;;  %v2353_v40 = vsel %vm2193_vm11, %v7025_v39, 0.0  ;;  %vm2419_vm13 = vcmp.eq.s32.totalorder %v5862_v48, 5  ;;  %v7027_v0 = vld [vmem:[#allocation122_spill] sm:$0xff]  ;;  %v6022_v24 = vpop.permute.xlu1 %1260  ;;  %2902 = vmax.xlane.f32.xlu0 %v5933_v37  ;;  %v7039_v37 = vld [vmem:[#allocation143_spill] sm:$0xff] }
 0x530   :  { %v1939_v6 = vadd.f32 %v1907_v29, %v1715_v32  ;;  %v1717_v26 = vadd.f32 %v1685_v54, %v1493_v45  ;;  %v6017_v5 = vsel %vm2416_vm1, %v7026_v52, 0.0  ;;  %v1909_v41 = vsel %vm1749_vm2, %v7027_v0, 0.0  ;;  %v6035_v45 = vld [vmem:[%s6726_s0 + $0xc0] sm:$0xff]  ;;  %v7032_v52 = vld [vmem:[#allocation108_spill] sm:$0xff] }
 0x531   :  { %vm1527_vm0 = vcmp.eq.s32.totalorder %v5954_v9, 1  ;;  %v1495_v1 = vadd.f32 %v1463_v36, %v7028_v47  ;;  %v6027_v39 = vsel %vm1746_vm5, %v7029_v19, 0.0  ;;  %v2831_v32 = vadd.f32 %v2799_v44, %v2607_v53  ;;  %v7030_v36 = vld [vmem:[#allocation98_spill] sm:$0xff]  ;;  %v6043_v53 = vpop.permute.xlu0 %1644 }
 0x532   :  { %vm2643_vm11 = vcmp.eq.s32.totalorder %v5862_v48, 6  ;;  %vm2197_vm15 = vcmp.eq.s32.totalorder %v5902_v15, 4  ;;  %v1465_v59 = vsel %vm1305_vm3, %v5419_v11, 0.0  ;;  %v2385_v29 = vadd.f32 %v2353_v40, %v2161_v34  ;;  %v6048_v11 = vld [vmem:[%s6726_s0 + $0x88] sm:$0xff]  ;;  %v7031_v40 = vld [vmem:[#allocation127_spill] sm:$0xff] }
 0x533   :  { %v2131_v19 = vsel %vm1971_vm12, %v7030_v36, 0.0  ;;  %vm1751_vm1 = vcmp.eq.s32.totalorder %v5954_v9, 2  ;;  %vm1307_vm5 = vcmp.eq.s32.totalorder %v6035_v45, 0  ;;  %vm2421_vm9 = vcmp.eq.s32.totalorder %v5902_v15, 5  ;;  %v7033_v36 = vld [vmem:[#allocation141_spill] sm:$0xff]  ;;  %2906 = vmax.xlane.f32.xlu0 %v5987_v46 }
 0x534   :  { %v2163_v44 = vadd.f32 %v2131_v19, %v1939_v6  ;;  %v1941_v54 = vadd.f32 %v1909_v41, %v1717_v26  ;;  %v1687_v34 = vsel %vm1527_vm0, %v7031_v40, 0.0  ;;  %vm1975_vm12 = vcmp.eq.s32.totalorder %v5954_v9, 3  ;;  %v7035_v41 = vld [vmem:[#allocation138_spill] sm:$0xff]  ;;  %v6065_v40 = vpop.permute.xlu1 %1648 }
 0x535   :  { %v2355_v0 = vsel %vm2195_vm14, %v7032_v52, 0.0  ;;  %v1719_v47 = vadd.f32 %v1687_v34, %v1495_v1  ;;  %vm1529_vm4 = vcmp.eq.s32.totalorder %v5997_v38, 1  ;;  %v1497_v60 = vadd.f32 %v1465_v59, %v7033_v36  ;;  %v7037_v59 = vld [vmem:[#allocation95_spill] sm:$0xff]  ;;  %v7038_v34 = vld [vmem:[#allocation113_spill] sm:$0xff]  ;;  %v6089_v22 = vpop.permute.xlu0 %2092 }
 0x536   :  { %v2577_v6 = vsel %vm2417_vm7, %v7034_v28, 0.0  ;;  %v1911_v26 = vsel %vm1751_vm1, %v7035_v41, 0.0  ;;  %v1467_v19 = vsel %vm1307_vm5, %v5816_v50, 0.0  ;;  %vm7036_vm2 = vcmp.lt.s32.totalorder %v5373_v21, 9 }
 0x537   :  { %v6070_v52 = vsel %vm7036_vm2, %v2831_v32, -inf  ;;  %vm1970_vm14 = vcmp.eq.s32.totalorder %v5836_v20, 3  ;;  %vm1300_vm3 = vcmp.eq.s32.totalorder %v6048_v11, 0  ;;  %v2609_v1 = vadd.f32 %v2577_v6, %v2385_v29  ;;  %vm7048_vm5 = vmmov %vm7036_vm2 }
 0x538   :  { %v2801_v28 = vsel %vm2641_vm8, %v7037_v59, 0.0  ;;  %v2133_v50 = vsel %vm1973_vm10, %v7038_v34, 0.0  ;;  %vm1753_vm7 = vcmp.eq.s32.totalorder %v5997_v38, 2  ;;  %v2387_v36 = vadd.f32 %v2355_v0, %v2163_v44  ;;  %v7041_v34 = vld [vmem:[#allocation83_spill] sm:$0xff]  ;;  %2910 = vmax.xlane.f32.xlu0 %v6070_v52 }
 0x539   :  { %v2165_v41 = vadd.f32 %v2133_v50, %v1941_v54  ;;  %v1689_v32 = vsel %vm1529_vm4, %v7039_v37, 0.0  ;;  %vm1531_vm0 = vcmp.eq.s32.totalorder %v6035_v45, 1  ;;  %v2357_v29 = vsel %vm2197_vm15, %v7040_v17, 0.0  ;;  %v7042_v54 = vld [vmem:[#allocation85_spill] sm:$0xff]  ;;  %v6127_v48 = vpop.permute.xlu0 %2540 }
 0x53a   :  { %v1943_v63 = vadd.f32 %v1911_v26, %v1719_v47  ;;  %v1721_v6 = vadd.f32 %v1689_v32, %v1497_v60  ;;  %v1499_v59 = vadd.f32 %v1467_v19, %v5523_v8  ;;  %v1490_v44 = vadd.f32 %v5978_v62, %v7041_v34  ;;  %v7043_v47 = vld [vmem:[#allocation100_spill] sm:$0xff]  ;;  %v6104_v60 = vpop.permute.xlu1 %2096  ;;  %v7044_v19 = vld [vmem:[#allocation129_spill] sm:$0xff] }
 0x53b   :  { %v1682_v0 = vsel %vm1522_vm6, %v7042_v54, 0.0  ;;  %vm2199_vm8 = vcmp.eq.s32.totalorder %v5954_v9, 4  ;;  %v1913_v37 = vsel %vm1753_vm7, %v5466_v57, 0.0  ;;  %v2833_v17 = vadd.f32 %v2801_v28, %v2609_v1  ;;  %v7045_v28 = vld [vmem:[#allocation110_spill] sm:$0xff] }
 0x53c   :  { %v2579_v8 = vsel %vm2419_vm13, %v7043_v47, 0.0  ;;  %vm1977_vm10 = vcmp.eq.s32.totalorder %v5997_v38, 3  ;;  %vm1755_vm15 = vcmp.eq.s32.totalorder %v6035_v45, 2  ;;  %vm1524_vm1 = vcmp.eq.s32.totalorder %v6048_v11, 1 }
 0x53d   :  { %v2611_v62 = vadd.f32 %v2579_v8, %v2387_v36  ;;  %v2389_v26 = vadd.f32 %v2357_v29, %v2165_v41  ;;  %v2135_v57 = vsel %vm1975_vm12, %v7044_v19, 0.0  ;;  %v1691_v1 = vsel %vm1531_vm0, %v5579_v10, 0.0  ;;  %v7046_v36 = vld [vmem:[#allocation140_spill] sm:$0xff]  ;;  %v7047_v8 = vld [vmem:[#allocation115_spill] sm:$0xff] }
 0x53e   :  { %v2803_v50 = vsel %vm2643_vm11, %v7045_v28, 0.0  ;;  %v2167_v32 = vadd.f32 %v2135_v57, %v1943_v63  ;;  %v1945_v34 = vadd.f32 %v1913_v37, %v1721_v6  ;;  %v1723_v54 = vadd.f32 %v1691_v1, %v1499_v59  ;;  %v7049_v59 = vld [vmem:[#allocation145_spill] sm:$0xff]  ;;  %v7050_v37 = vld [vmem:[#allocation126_spill] sm:$0xff] }
 0x53f   :  { %v1714_v47 = vadd.f32 %v1682_v0, %v1490_v44  ;;  %vm2645_vm6 = vcmp.eq.s32.totalorder %v5902_v15, 6  ;;  %v2359_v41 = vsel %vm2199_vm8, %v7046_v36, 0.0  ;;  %v1915_v29 = vsel %vm1755_vm15, %v5871_v35, 0.0  ;;  %v6138_v0 = vpop.permute.xlu1 %2544 }
 0x540   :  { %v2581_v10 = vsel %vm2421_vm9, %v7047_v8, 0.0  ;;  %vm2423_vm13 = vcmp.eq.s32.totalorder %v5954_v9, 5  ;;  %vm2201_vm11 = vcmp.eq.s32.totalorder %v5997_v38, 4  ;;  %v6131_v63 = vsel %vm7048_vm5, %v2833_v17, -inf  ;;  %v6154_v8 = vld [vmem:[%s6726_s0 + $0x98] sm:$0xff] }
 0x541   :  { %vm2194_vm12 = vcmp.eq.s32.totalorder %v5836_v20, 4  ;;  %v2835_v6 = vadd.f32 %v2803_v50, %v2611_v62  ;;  %v2613_v35 = vadd.f32 %v2581_v10, %v2389_v26  ;;  %v2137_v44 = vsel %vm1977_vm10, %v7049_v59, 0.0  ;;  %v7051_v26 = vld [vmem:[#allocation87_spill] sm:$0xff]  ;;  %v7052_v50 = vld [vmem:[#allocation88_spill] sm:$0xff]  ;;  %2914 = vmax.xlane.f32.xlu0 %v6131_v63  ;;  %vm7054_vm10 = vmmov %vm7048_vm5  ;;  %v6189_v59 = vpop.permute.xlu0 %1432 }
 0x542   :  { %vm1979_vm9 = vcmp.eq.s32.totalorder %v6035_v45, 3  ;;  %vm1748_vm4 = vcmp.eq.s32.totalorder %v6048_v11, 2  ;;  %v2805_v19 = vsel %vm2645_vm6, %v7050_v37, 0.0  ;;  %v2391_v17 = vadd.f32 %v2359_v41, %v2167_v32  ;;  %v7053_v32 = vld [vmem:[#allocation131_spill] sm:$0xff]  ;;  %v6186_v41 = vld [vmem:[%s6726_s0 + $0xa8] sm:$0xff]  ;;  %2886 = vmax.xlane.f32.xlu1 %v5567_v12 }
 0x543   :  { %v2169_v57 = vadd.f32 %v2137_v44, %v1945_v34  ;;  %v1947_v1 = vadd.f32 %v1915_v29, %v1723_v54  ;;  %v1938_v62 = vadd.f32 %v6027_v39, %v1714_v47  ;;  %v2130_v28 = vsel %vm1970_vm14, %v7051_v26, 0.0  ;;  %v6162_v39 = vld [vmem:[%s6726_s0 + $0xd0] sm:$0xff]  ;;  %v7055_v44 = vld [vmem:[#allocation97_spill] sm:$0xff]  ;;  %v7056_v37 = vld [vmem:[#allocation142_spill] sm:$0xff] }
 0x544   :  { %v1460_v36 = vsel %vm1300_vm3, %v7052_v50, 0.0  ;;  %v2361_v15 = vsel %vm2201_vm11, %v5521_v30, 0.0  ;;  %vm2647_vm2 = vcmp.eq.s32.totalorder %v5954_v9, 6  ;;  %vm2425_vm14 = vcmp.eq.s32.totalorder %v5997_v38, 5 }
 0x545   :  { %vm2203_vm3 = vcmp.eq.s32.totalorder %v6035_v45, 4  ;;  %vm1309_vm7 = vcmp.eq.s32.totalorder %v6162_v39, 0  ;;  %vm2418_vm0 = vcmp.eq.s32.totalorder %v5836_v20, 5  ;;  %vm1972_vm8 = vcmp.eq.s32.totalorder %v6048_v11, 3 }
 0x546   :  { %v2837_v30 = vadd.f32 %v2805_v19, %v2613_v35  ;;  %v2583_v34 = vsel %vm2423_vm13, %v7053_v32, 0.0  ;;  %v2139_v54 = vsel %vm1979_vm9, %v5632_v27, 0.0  ;;  %v6179_v47 = vsel %vm7054_vm10, %v2835_v6, -inf  ;;  %v1421_v27 = vpop.permute.xlu1 %1420  ;;  %2892 = vmax.xlane.f32.xlu1 %v5585_v33 }
 0x547   :  { %vm1302_vm15 = vcmp.eq.s32.totalorder %v6154_v8, 0  ;;  %vm1526_vm6 = vcmp.eq.s32.totalorder %v6154_v8, 1  ;;  %v2615_v29 = vadd.f32 %v2583_v34, %v2391_v17  ;;  %v2393_v10 = vadd.f32 %v2361_v15, %v2169_v57  ;;  %2918 = vmax.xlane.f32.xlu0 %v6179_v47  ;;  %v7057_v57 = vld [vmem:[#allocation99_spill] sm:$0xff] }
 0x548   :  { %v2171_v35 = vadd.f32 %v2139_v54, %v1947_v1  ;;  %vm1533_vm13 = vcmp.eq.s32.totalorder %v6162_v39, 1  ;;  %v1492_v6 = vadd.f32 %v1460_v36, %v7055_v44  ;;  %v2807_v19 = vsel %vm2647_vm2, %v7056_v37, 0.0 }
 0x549   :  { %v2363_v26 = vsel %vm2203_vm3, %v5924_v2, 0.0  ;;  %v1469_v17 = vsel %vm1309_vm7, %v1421_v27, 0.0  ;;  %v1684_v1 = vsel %vm1524_vm1, %v7057_v57, 0.0  ;;  %vm2649_vm11 = vcmp.eq.s32.totalorder %v5997_v38, 6  ;;  %vm7058_vm3 = vmmov %vm7054_vm10  ;;  %v6232_v38 = vpop.permute.xlu0 %1880  ;;  %v7062_v57 = vld [vmem:[#allocation89_spill] sm:$0xff] }
 0x54a   :  { %vm2427_vm5 = vcmp.eq.s32.totalorder %v6035_v45, 5  ;;  %v1501_v9 = vadd.f32 %v1469_v17, %v5983_v13  ;;  %vm1304_vm9 = vcmp.eq.s32.totalorder %v6186_v41, 0  ;;  %v2585_v2 = vsel %vm2425_vm14, %v5342_v56, 0.0  ;;  %2896 = vmax.xlane.f32.xlu1 %v5772_v42 }
 0x54b   :  { %v1693_v50 = vsel %vm1533_vm13, %v6043_v53, 0.0  ;;  %vm1757_vm2 = vcmp.eq.s32.totalorder %v6162_v39, 2  ;;  %v6215_v36 = vsel %vm7058_vm3, %v2837_v30, -inf  ;;  %vm2642_vm1 = vcmp.eq.s32.totalorder %v5836_v20, 6  ;;  %v1869_v53 = vpop.permute.xlu1 %1868 }
 0x54c   :  { %v2839_v15 = vadd.f32 %v2807_v19, %v2615_v29  ;;  %v2617_v32 = vadd.f32 %v2585_v2, %v2393_v10  ;;  %v2395_v34 = vadd.f32 %v2363_v26, %v2171_v35  ;;  %v1725_v13 = vadd.f32 %v1693_v50, %v1501_v9  ;;  %2922 = vmax.xlane.f32.xlu0 %v6215_v36  ;;  %v7059_v29 = vld [vmem:[#allocation77_spill] sm:$0xff] }
 0x54d   :  { %v2162_v54 = vadd.f32 %v2130_v28, %v1938_v62  ;;  %v1716_v27 = vadd.f32 %v1684_v1, %v1492_v6  ;;  %v2809_v56 = vsel %vm2649_vm11, %v5577_v25, 0.0  ;;  %vm1981_vm14 = vcmp.eq.s32.totalorder %v6162_v39, 3  ;;  %v7060_v62 = vld [vmem:[#allocation90_spill] sm:$0xff]  ;;  %v7063_v1 = vld [vmem:[#allocation101_spill] sm:$0xff] }
 0x54e   :  { %v2608_v30 = vadd.f32 %v6017_v5, %v6008_v18  ;;  %v2354_v10 = vsel %vm2194_vm12, %v7059_v29, 0.0  ;;  %vm2196_vm7 = vcmp.eq.s32.totalorder %v6048_v11, 4  ;;  %vm1750_vm10 = vcmp.eq.s32.totalorder %v6154_v8, 2  ;;  %2900 = vmax.xlane.f32.xlu1 %v5851_v23 }
 0x54f   :  { %vm2651_vm13 = vcmp.eq.s32.totalorder %v6035_v45, 6  ;;  %v1917_v25 = vsel %vm1757_vm2, %v1869_v53, 0.0  ;;  %v1908_v28 = vsel %vm1748_vm4, %v7060_v62, 0.0  ;;  %v2587_v18 = vsel %vm2427_vm5, %v5687_v58, 0.0  ;;  %vm7061_vm2 = vmmov %vm7058_vm3  ;;  %v2317_v2 = vpop.permute.xlu1 %2316  ;;  %v7065_v45 = vld [vmem:[#allocation114_spill] sm:$0xff] }
 0x550   :  { %v1949_v5 = vadd.f32 %v1917_v25, %v1725_v13  ;;  %vm2205_vm12 = vcmp.eq.s32.totalorder %v6162_v39, 4  ;;  %vm1974_vm11 = vcmp.eq.s32.totalorder %v6154_v8, 3  ;;  %v2841_v35 = vadd.f32 %v2809_v56, %v2617_v32  ;;  %v7066_v13 = vld [vmem:[#allocation112_spill] sm:$0xff]  ;;  %v6276_v56 = vpop.permute.xlu0 %2328 }
 0x551   :  { %v2619_v44 = vadd.f32 %v2587_v18, %v2395_v34  ;;  %v2141_v6 = vsel %vm1981_vm14, %v6089_v22, 0.0  ;;  %v6250_v37 = vsel %vm7061_vm2, %v2839_v15, -inf  ;;  %v2386_v19 = vadd.f32 %v2354_v10, %v2162_v54  ;;  %v7064_v15 = vld [vmem:[#allocation102_spill] sm:$0xff]  ;;  %v6287_v10 = vld [vmem:[%s6726_s0 + $0xb8] sm:$0xff] }
 0x552   :  { %v1940_v26 = vadd.f32 %v1908_v28, %v1716_v27  ;;  %vm2420_vm4 = vcmp.eq.s32.totalorder %v6048_v11, 5  ;;  %v2811_v58 = vsel %vm2651_vm13, %v5970_v61, 0.0  ;;  %2926 = vmax.xlane.f32.xlu0 %v6250_v37  ;;  %v2173_v17 = vadd.f32 %v2141_v6, %v1949_v5  ;;  %v7068_v28 = vld [vmem:[#allocation117_spill] sm:$0xff]  ;;  %v7069_v5 = vld [vmem:[#allocation130_spill] sm:$0xff]  ;;  %v7070_v6 = vld [vmem:[#allocation79_spill] sm:$0xff]  ;;  %2904 = vmax.xlane.f32.xlu1 %v5882_v7 }
 0x553   :  { %v2578_v22 = vsel %vm2418_vm0, %v7062_v57, 0.0  ;;  %v2132_v9 = vsel %vm1972_vm8, %v7063_v1, 0.0  ;;  %vm2429_vm5 = vcmp.eq.s32.totalorder %v6162_v39, 5  ;;  %v2832_v50 = vadd.f32 %v5948_v51, %v2608_v30  ;;  %vm7067_vm8 = vmmov %vm7061_vm2  ;;  %v7074_v57 = vld [vmem:[#allocation91_spill] sm:$0xff]  ;;  %v7075_v1 = vld [vmem:[#allocation104_spill] sm:$0xff] }
 0x554   :  { %v1462_v61 = vsel %vm1302_vm15, %v7064_v15, 0.0  ;;  %v1686_v32 = vsel %vm1526_vm6, %v7065_v45, 0.0  ;;  %vm1528_vm3 = vcmp.eq.s32.totalorder %v6186_v41, 1  ;;  %v2365_v34 = vsel %vm2205_vm12, %v2317_v2, 0.0  ;;  %vm7072_vm13 = vmmov %vm7061_vm2  ;;  %v6329_v45 = vld [vmem:[%s6726_s0 + $0xc8] sm:$0xff] }
 0x555   :  { %vm2644_vm0 = vcmp.eq.s32.totalorder %v6048_v11, 6  ;;  %v1494_v54 = vadd.f32 %v1462_v61, %v7066_v13  ;;  %v2843_v27 = vadd.f32 %v2811_v58, %v2619_v44  ;;  %v2397_v51 = vadd.f32 %v2365_v34, %v2173_v17  ;;  %v2765_v58 = vpop.permute.xlu1 %2764  ;;  %v7076_v13 = vld [vmem:[#allocation116_spill] sm:$0xff] }
 0x556   :  { %v6281_v53 = vsel %vm7067_vm8, %v2841_v35, -inf  ;;  %v2610_v30 = vadd.f32 %v2578_v22, %v2386_v19  ;;  %v2164_v29 = vadd.f32 %v2132_v9, %v1940_v26  ;;  %vm2198_vm15 = vcmp.eq.s32.totalorder %v6154_v8, 4  ;;  %2908 = vmax.xlane.f32.xlu1 %v5959_v49 }
 0x557   :  { %v2589_v25 = vsel %vm2429_vm5, %v6127_v48, 0.0  ;;  %2930 = vmax.xlane.f32.xlu0 %v6281_v53  ;;  %vm2653_vm6 = vcmp.eq.s32.totalorder %v6162_v39, 6  ;;  %v1718_v62 = vadd.f32 %v1686_v32, %v1494_v54  ;;  %v1464_v18 = vsel %vm1304_vm9, %v7068_v28, 0.0  ;;  %v7071_v48 = vld [vmem:[#allocation128_spill] sm:$0xff]  ;;  %v6331_v32 = vpop.permute.xlu0 %2776  ;;  %v7080_v28 = vld [vmem:[#allocation119_spill] sm:$0xff] }
 0x558   :  { %v1688_v35 = vsel %vm1528_vm3, %v7069_v5, 0.0  ;;  %v2621_v44 = vadd.f32 %v2589_v25, %v2397_v51  ;;  %v2802_v19 = vsel %vm2642_vm1, %v7070_v6, 0.0  ;;  %vm1752_vm14 = vcmp.eq.s32.totalorder %v6186_v41, 2  ;;  %vm7073_vm1 = vmmov %vm7067_vm8  ;;  %v7081_v5 = vld [vmem:[#allocation144_spill] sm:$0xff] }
 0x559   :  { %v1496_v26 = vadd.f32 %v1464_v18, %v7071_v48  ;;  %v6307_v39 = vsel %vm7072_vm13, %v2832_v50, -inf  ;;  %vm2422_vm9 = vcmp.eq.s32.totalorder %v6154_v8, 5  ;;  %vm1306_vm12 = vcmp.eq.s32.totalorder %v6287_v10, 0  ;;  %v6364_v6 = vld [vmem:[%s6726_s0 + $0xd8] sm:$0xff] }
 0x55a   :  { %vm1530_vm2 = vcmp.eq.s32.totalorder %v6287_v10, 1  ;;  %v2813_v17 = vsel %vm2653_vm6, %v2765_v58, 0.0  ;;  %v6315_v20 = vsel %vm7073_vm1, %v2843_v27, -inf  ;;  %v2356_v22 = vsel %vm2196_vm7, %v7074_v57, 0.0  ;;  %v7077_v27 = vld [vmem:[#allocation133_spill] sm:$0xff]  ;;  %vm7078_vm7 = vmmov %vm7073_vm1  ;;  %v7082_v48 = vld [vmem:[#allocation132_spill] sm:$0xff]  ;;  %2912 = vmax.xlane.f32.xlu1 %v6307_v39 }
 0x55b   :  { %v1910_v9 = vsel %vm1750_vm10, %v7075_v1, 0.0  ;;  %vm2200_vm5 = vcmp.eq.s32.totalorder %v6186_v41, 4  ;;  %v1720_v2 = vadd.f32 %v1688_v35, %v1496_v26  ;;  %v2845_v50 = vadd.f32 %v2813_v17, %v2621_v44  ;;  %2934 = vmax.xlane.f32.xlu0 %v6315_v20  ;;  %v6354_v44 = vpop.permute.xlu1 %1270  ;;  %v7083_v17 = vld [vmem:[#allocation93_spill] sm:$0xff] }
 0x55c   :  { %v2388_v15 = vadd.f32 %v2356_v22, %v2164_v29  ;;  %v1942_v61 = vadd.f32 %v1910_v9, %v1718_v62  ;;  %vm1976_vm3 = vcmp.eq.s32.totalorder %v6186_v41, 3  ;;  %v2834_v34 = vadd.f32 %v2802_v19, %v2610_v30  ;;  %v7079_v62 = vld [vmem:[#allocation103_spill] sm:$0xff]  ;;  %v7085_v9 = vld [vmem:[#allocation105_spill] sm:$0xff] }
 0x55d   :  { %v2134_v54 = vsel %vm1974_vm11, %v7076_v13, 0.0  ;;  %v1466_v51 = vsel %vm1306_vm12, %v7077_v27, 0.0  ;;  %v1690_v29 = vsel %vm1530_vm2, %v5340_v43, 0.0  ;;  %v6344_v25 = vsel %vm7078_vm7, %v2845_v50, -inf  ;;  %vm7084_vm12 = vmmov %vm7073_vm1  ;;  %v6385_v13 = vpop.permute.xlu0 %1265 }
 0x55e   :  { %v2580_v30 = vsel %vm2420_vm4, %v7079_v62, 0.0  ;;  %v1912_v18 = vsel %vm1752_vm14, %v7080_v28, 0.0  ;;  %vm2424_vm10 = vcmp.eq.s32.totalorder %v6186_v41, 5  ;;  %v1498_v35 = vadd.f32 %v1466_v51, %v7081_v5  ;;  %v6399_v51 = vld [vmem:[%s6726_s0 + $0xe8] sm:$0xff] }
 0x55f   :  { %vm2646_vm11 = vcmp.eq.s32.totalorder %v6154_v8, 6  ;;  %v1944_v43 = vadd.f32 %v1912_v18, %v1720_v2  ;;  %vm1754_vm8 = vcmp.eq.s32.totalorder %v6287_v10, 2  ;;  %vm1308_vm6 = vcmp.eq.s32.totalorder %v6329_v45, 0  ;;  %2938 = vmax.xlane.f32.xlu0 %v6344_v25  ;;  %v7088_v18 = vld [vmem:[#allocation121_spill] sm:$0xff] }
 0x560   :  { %vm1532_vm4 = vcmp.eq.s32.totalorder %v6329_v45, 1  ;;  %v2166_v19 = vadd.f32 %v2134_v54, %v1942_v61  ;;  %v2136_v26 = vsel %vm1976_vm3, %v7082_v48, 0.0  ;;  %vm2202_vm14 = vcmp.eq.s32.totalorder %v6287_v10, 4 }
 0x561   :  { %v1722_v58 = vadd.f32 %v1690_v29, %v1498_v35  ;;  %v2804_v57 = vsel %vm2644_vm0, %v7083_v17, 0.0  ;;  %v2612_v22 = vadd.f32 %v2580_v30, %v2388_v15  ;;  %vm1978_vm13 = vcmp.eq.s32.totalorder %v6287_v10, 3  ;;  %v7086_v15 = vld [vmem:[#allocation135_spill] sm:$0xff]  ;;  %v7087_v29 = vld [vmem:[#allocation118_spill] sm:$0xff] }
 0x562   :  { %v6377_v1 = vsel %vm7084_vm12, %v2834_v34, -inf  ;;  %v2358_v2 = vsel %vm2198_vm15, %v7085_v9, 0.0  ;;  %v1468_v50 = vsel %vm1308_vm6, %v5360_v55, 0.0  ;;  %v1692_v61 = vsel %vm1532_vm4, %v5680_v14, 0.0  ;;  %v1657_v55 = vpop.permute.xlu1 %1656  ;;  %vm7090_vm4 = vmmov %vm7084_vm12 }
 0x563   :  { %vm1310_vm2 = vcmp.eq.s32.totalorder %v6364_v6, 0  ;;  %vm2648_vm0 = vcmp.eq.s32.totalorder %v6186_v41, 6  ;;  %v2168_v11 = vadd.f32 %v2136_v26, %v1944_v43  ;;  %v1914_v34 = vsel %vm1754_vm8, %v7086_v15, 0.0  ;;  %v7089_v26 = vld [vmem:[#allocation134_spill] sm:$0xff]  ;;  %2916 = vmax.xlane.f32.xlu1 %v6377_v1 }
 0x564   :  { %v1500_v54 = vadd.f32 %v1468_v50, %v5630_v16  ;;  %vm1534_vm15 = vcmp.eq.s32.totalorder %v6364_v6, 1  ;;  %v2390_v27 = vadd.f32 %v2358_v2, %v2166_v19  ;;  %v1946_v14 = vadd.f32 %v1914_v34, %v1722_v58  ;;  %v7091_v2 = vld [vmem:[#allocation107_spill] sm:$0xff] }
 0x565   :  { %vm2426_vm1 = vcmp.eq.s32.totalorder %v6287_v10, 5  ;;  %vm1756_vm3 = vcmp.eq.s32.totalorder %v6329_v45, 2  ;;  %v2582_v62 = vsel %vm2422_vm9, %v7087_v29, 0.0  ;;  %v2138_v16 = vsel %vm1978_vm13, %v5358_v4, 0.0  ;;  %v7094_v29 = vld [vmem:[#allocation9_spill] sm:$0xff] }
 0x566   :  { %vm2204_vm7 = vcmp.eq.s32.totalorder %v6329_v45, 4  ;;  %v1724_v30 = vadd.f32 %v1692_v61, %v1500_v54  ;;  %v2836_v28 = vadd.f32 %v2804_v57, %v2612_v22  ;;  %v2360_v5 = vsel %vm2200_vm5, %v7088_v18, 0.0  ;;  %v2105_v57 = vpop.permute.xlu1 %2104  ;;  %v7092_v61 = vld [vmem:[#allocation7_spill] sm:$0xff]  ;;  %v7093_v54 = vld [vmem:[#allocation137_spill] sm:$0xff] }
 0x567   :  { %vm1980_vm8 = vcmp.eq.s32.totalorder %v6329_v45, 3  ;;  %v1470_v35 = vsel %vm1310_vm2, %v5742_v31, 0.0  ;;  %v1694_v43 = vsel %vm1534_vm15, %v6065_v40, 0.0  ;;  %v2392_v19 = vadd.f32 %v2360_v5, %v2168_v11  ;;  %v1653_v40 = vpop.permute.xlu0 %1652 }
 0x568   :  { %v1502_v4 = vadd.f32 %v1470_v35, %v6022_v24  ;;  %vm1312_vm9 = vcmp.eq.s32.totalorder %v6399_v51, 0  ;;  %vm1536_vm6 = vcmp.eq.s32.totalorder %v6399_v51, 1  ;;  %v2614_v48 = vadd.f32 %v2582_v62, %v2390_v27  ;;  %v7096_v35 = vld [vmem:[#allocation123_spill] sm:$0xff] }
 0x569   :  { %v2584_v58 = vsel %vm2424_vm10, %v7089_v26, 0.0  ;;  %v2170_v17 = vadd.f32 %v2138_v16, %v1946_v14  ;;  %v1916_v31 = vsel %vm1756_vm3, %v5378_v3, 0.0  ;;  %vm1758_vm5 = vcmp.eq.s32.totalorder %v6364_v6, 2  ;;  %v7097_v26 = vld [vmem:[#allocation147_spill] sm:$0xff] }
 0x56a   :  { %v1948_v22 = vadd.f32 %v1916_v31, %v1724_v30  ;;  %v1726_v24 = vadd.f32 %v1694_v43, %v1502_v4  ;;  %v6429_v9 = vsel %vm7090_vm4, %v2836_v28, -inf  ;;  %v2806_v50 = vsel %vm2646_vm11, %v7091_v2, 0.0  ;;  %v7095_v30 = vld [vmem:[#allocation146_spill] sm:$0xff]  ;;  %v2553_v5 = vpop.permute.xlu1 %2552  ;;  %v6461_v4 = vld [vmem:[%s6726_s0 + $0xe0] sm:$0xff]  ;;  %v7099_v2 = vld [vmem:[#allocation11_spill] sm:$0xff] }
 0x56b   :  { %v2140_v11 = vsel %vm1980_vm8, %v7092_v61, 0.0  ;;  %v1472_v3 = vsel %vm1312_vm9, %v6189_v59, 0.0  ;;  %v1696_v15 = vsel %vm1536_vm6, %v1657_v55, 0.0  ;;  %v2616_v34 = vadd.f32 %v2584_v58, %v2392_v19  ;;  %v2101_v19 = vpop.permute.xlu0 %2100  ;;  %2920 = vmax.xlane.f32.xlu1 %v6429_v9 }
 0x56c   :  { %v2362_v27 = vsel %vm2202_vm14, %v7093_v54, 0.0  ;;  %vm1982_vm10 = vcmp.eq.s32.totalorder %v6364_v6, 3  ;;  %v1504_v14 = vadd.f32 %v1472_v3, %v6354_v44  ;;  %v1918_v62 = vsel %vm1758_vm5, %v7094_v29, 0.0  ;;  %v7102_v54 = vld [vmem:[#allocation15_spill] sm:$0xff] }
 0x56d   :  { %v2394_v8 = vadd.f32 %v2362_v27, %v2170_v17  ;;  %vm1760_vm11 = vcmp.eq.s32.totalorder %v6399_v51, 2  ;;  %v2838_v16 = vadd.f32 %v2806_v50, %v2614_v48  ;;  %v2586_v59 = vsel %vm2426_vm1, %v7095_v30, 0.0  ;;  %vm7098_vm1 = vmmov %vm7090_vm4 }
 0x56e   :  { %v2172_v55 = vadd.f32 %v2140_v11, %v1948_v22  ;;  %v1950_v28 = vadd.f32 %v1918_v62, %v1726_v24  ;;  %v1728_v18 = vadd.f32 %v1696_v15, %v1504_v14  ;;  %v2808_v43 = vsel %vm2648_vm0, %v7096_v35, 0.0  ;;  %v1429_v11 = vpop.permute.xlu1 %1428  ;;  %vm7101_vm9 = vmmov %vm7098_vm1 }
 0x56f   :  { %vm2650_vm14 = vcmp.eq.s32.totalorder %v6287_v10, 6  ;;  %vm2652_vm13 = vcmp.eq.s32.totalorder %v6329_v45, 6  ;;  %v2142_v44 = vsel %vm1982_vm10, %v6104_v60, 0.0  ;;  %vm2428_vm12 = vcmp.eq.s32.totalorder %v6329_v45, 5  ;;  %v2549_v14 = vpop.permute.xlu0 %2548 }
 0x570   :  { %vm2206_vm2 = vcmp.eq.s32.totalorder %v6364_v6, 4  ;;  %vm1984_vm0 = vcmp.eq.s32.totalorder %v6399_v51, 3  ;;  %v2840_v41 = vadd.f32 %v2808_v43, %v2616_v34  ;;  %v2618_v48 = vadd.f32 %v2586_v59, %v2394_v8 }
 0x571   :  { %v2364_v60 = vsel %vm2204_vm7, %v7097_v26, 0.0  ;;  %v1920_v58 = vsel %vm1760_vm11, %v6232_v38, 0.0  ;;  %vm1311_vm15 = vcmp.eq.s32.totalorder %v6461_v4, 0  ;;  %v2174_v31 = vadd.f32 %v2142_v44, %v1950_v28  ;;  %v7100_v38 = vld [vmem:[#allocation139_spill] sm:$0xff]  ;;  %vm7104_vm11 = vmmov %vm7098_vm1 }
 0x572   :  { %v2396_v17 = vadd.f32 %v2364_v60, %v2172_v55  ;;  %v1952_v22 = vadd.f32 %v1920_v58, %v1728_v18  ;;  %v6473_v24 = vsel %vm7098_vm1, %v2838_v16, -inf  ;;  %v2588_v50 = vsel %vm2428_vm12, %v7099_v2, 0.0  ;;  %v7103_v55 = vld [vmem:[#allocation148_spill] sm:$0xff]  ;;  %v7105_v58 = vld [vmem:[#allocation27_spill] sm:$0xff] }
 0x573   :  { %vm2430_vm3 = vcmp.eq.s32.totalorder %v6364_v6, 5  ;;  %vm1535_vm8 = vcmp.eq.s32.totalorder %v6461_v4, 1  ;;  %v2144_v61 = vsel %vm1984_vm0, %v2105_v57, 0.0  ;;  %2924 = vmax.xlane.f32.xlu1 %v6473_v24  ;;  %v2810_v3 = vsel %vm2650_vm14, %v7100_v38, 0.0  ;;  %v1441_v26 = vpop.permute.xlu0 %1440 }
 0x574   :  { %vm2208_vm7 = vcmp.eq.s32.totalorder %v6399_v51, 4  ;;  %v1471_v15 = vsel %vm1311_vm15, %v1429_v11, 0.0  ;;  %v6485_v34 = vsel %vm7101_vm9, %v2840_v41, -inf  ;;  %v2366_v27 = vsel %vm2206_vm2, %v7102_v54, 0.0  ;;  %vm7106_vm2 = vmmov %vm7098_vm1 }
 0x575   :  { %v1503_v57 = vadd.f32 %v1471_v15, %v6385_v13  ;;  %vm1759_vm6 = vcmp.eq.s32.totalorder %v6461_v4, 2  ;;  %v2842_v8 = vadd.f32 %v2810_v3, %v2618_v48  ;;  %v2620_v29 = vadd.f32 %v2588_v50, %v2396_v17  ;;  %v1877_v13 = vpop.permute.xlu1 %1876  ;;  %vm7107_vm15 = vmmov %vm7098_vm1 }
 0x576   :  { %v2398_v10 = vadd.f32 %v2366_v27, %v2174_v31  ;;  %v1695_v62 = vsel %vm1535_vm8, %v1653_v40, 0.0  ;;  %v2176_v16 = vadd.f32 %v2144_v61, %v1952_v22  ;;  %v2590_v30 = vsel %vm2430_vm3, %v6138_v0, 0.0  ;;  %v1122_v27 = vld [vmem:[%s6726_s0 + $0xf8] sm:$0xff]  ;;  %vm7108_vm3 = vmmov %vm7098_vm1 }
 0x577   :  { %2928 = vmax.xlane.f32.xlu1 %v6485_v34  ;;  %v1727_v59 = vadd.f32 %v1695_v62, %v1503_v57  ;;  %vm2654_vm5 = vcmp.eq.s32.totalorder %v6364_v6, 6  ;;  %vm1983_vm4 = vcmp.eq.s32.totalorder %v6461_v4, 3  ;;  %vm2432_vm10 = vcmp.eq.s32.totalorder %v6399_v51, 5  ;;  %v1889_v61 = vpop.permute.xlu0 %1888 }
 0x578   :  { %v2812_v28 = vsel %vm2652_vm13, %v7103_v55, 0.0  ;;  %v2368_v40 = vsel %vm2208_vm7, %v6276_v56, 0.0  ;;  %v1919_v18 = vsel %vm1759_vm6, %v1877_v13, 0.0  ;;  %v6507_v0 = vsel %vm7104_vm11, %v2842_v8, -inf }
 0x579   :  { %v2622_v35 = vadd.f32 %v2590_v30, %v2398_v10  ;;  %v2400_v43 = vadd.f32 %v2368_v40, %v2176_v16  ;;  %v1951_v44 = vadd.f32 %v1919_v18, %v1727_v59  ;;  %v2844_v41 = vadd.f32 %v2812_v28, %v2620_v29  ;;  %v2325_v17 = vpop.permute.xlu1 %2324 }
 0x57a   :  { %v2143_v48 = vsel %vm1983_vm4, %v2101_v19, 0.0  ;;  %v2592_v60 = vsel %vm2432_vm10, %v2553_v5, 0.0  ;;  %vm2207_vm14 = vcmp.eq.s32.totalorder %v6461_v4, 4  ;;  %v2814_v56 = vsel %vm2654_vm5, %v7105_v58, 0.0 }
 0x57b   :  { %2932 = vmax.xlane.f32.xlu1 %v6507_v0  ;;  %v2175_v45 = vadd.f32 %v2143_v48, %v1951_v44  ;;  %vm2656_vm13 = vcmp.eq.s32.totalorder %v6399_v51, 6  ;;  %vm2431_vm12 = vcmp.eq.s32.totalorder %v6461_v4, 5  ;;  %v2624_v31 = vadd.f32 %v2592_v60, %v2400_v43  ;;  %v1121_v48 = vld [vmem:[%s6726_s0 + $0xf0] sm:$0xff]  ;;  %s3903_s0 = smov [#allocation2]  }
 0x57c   :  { %v2367_v22 = vsel %vm2207_vm14, %v2325_v17, 0.0  ;;  %v6518_v19 = vsel %vm7106_vm2, %v2844_v41, -inf  ;;  %v2846_v5 = vadd.f32 %v2814_v56, %v2622_v35  ;;  %v2591_v50 = vsel %vm2431_vm12, %v2549_v14, 0.0  ;;  %v2337_v14 = vpop.permute.xlu0 %2336  ;;  %s3211_s20 = sshll.u32 %s3903_s0, 4  ;;  %s3212_s20 = int_to_ptr.vmem [resolvable:$true] %s3211_s20 }
 0x57d   :  { %v2399_v2 = vadd.f32 %v2367_v22, %v2175_v45  ;;  %vm2655_vm0 = vcmp.eq.s32.totalorder %v6461_v4, 6  ;;  %v2816_v6 = vsel %vm2656_vm13, %v6331_v32, 0.0  ;;  %v2773_v38 = vpop.permute.xlu1 %2772  ;;  %vm1314_vm8 = vcmp.eq.s32.totalorder %v1122_v27, 0  ;;  %vm7109_vm13 = vmmov %vm7098_vm1  ;;  %s3869_s21 = scalar_lea.vmem %s3212_s20, 4096  ;;  %p3874_p1 = scmp.lt.s32.totalorder %s3212_s20, %s3212_s20 }
 0x57e   :  { %v2848_v11 = vadd.f32 %v2816_v6, %v2624_v31  ;;  %v6525_v3 = vsel %vm7107_vm15, %v2846_v5, -inf  ;;  %v2815_v15 = vsel %vm2655_vm0, %v2773_v38, 0.0  ;;  %vm1538_vm7 = vcmp.eq.s32.totalorder %v1122_v27, 1  ;;  %p3870_p0 = scmp.ne.s32.totalorder %s3212_s20, %s3869_s21  ;;  %p3875_p2 = scmp.lt.s32.totalorder %s3869_s21, %s3869_s21 }
 0x57f   :  { %2936 = vmax.xlane.f32.xlu1 %v6518_v19  ;;  %v2623_v51 = vadd.f32 %v2591_v50, %v2399_v2  ;;  %v1474_v8 = vsel %vm1314_vm8, %v1441_v26, 0.0  ;;  %vm1762_vm9 = vcmp.eq.s32.totalorder %v1122_v27, 2  ;;  %vm1986_vm6 = vcmp.eq.s32.totalorder %v1122_v27, 3 }
 0x580   :  { %v6533_v4 = vsel %vm7098_vm1, %v2848_v11, -inf  ;;  %v2785_v62 = vpop.permute.xlu0 %2784  ;;  %v1922_v59 = vsel %vm1762_vm9, %v1889_v61, 0.0  ;;  %vm2210_vm5 = vcmp.eq.s32.totalorder %v1122_v27, 4  ;;  %vm2434_vm4 = vcmp.eq.s32.totalorder %v1122_v27, 5  ;;  %p3876_p3 = por %p3875_p2, %p3874_p1 }
 0x581   :  { %v2847_v54 = vadd.f32 %v2815_v15, %v2623_v51  ;;  %v1281_v57 = vpop.permute.xlu1 %1280  ;;  %v2370_v35 = vsel %vm2210_vm5, %v2337_v14, 0.0  ;;  %vm2658_vm10 = vcmp.eq.s32.totalorder %v1122_v27, 6  ;;  %vm1313_vm11 = vcmp.eq.s32.totalorder %v1121_v48, 0 }
 0x582   :  { %v1506_v29 = vadd.f32 %v1474_v8, %v1281_v57  ;;  %v2818_v60 = vsel %vm2658_vm10, %v2785_v62, 0.0  ;;  %vm1537_vm14 = vcmp.eq.s32.totalorder %v1121_v48, 1  ;;  %vm1761_vm12 = vcmp.eq.s32.totalorder %v1121_v48, 2  ;;  %p3877_p4 = pnand %p3876_p3, %p3870_p0 }
 0x583   :  { %2940 = vmax.xlane.f32.xlu1 %v6525_v3  ;;  %v6537_v32 = vsel %vm7108_vm3, %v2847_v54, -inf  ;;  %vm1985_vm2 = vcmp.eq.s32.totalorder %v1121_v48, 3  ;;  %vm2209_vm0 = vcmp.eq.s32.totalorder %v1121_v48, 4  ;;  %vm2433_vm15 = vcmp.eq.s32.totalorder %v1121_v48, 5 }
 0x584   :  { %2942 = vmax.xlane.f32.xlu0 %v6537_v32  ;;  %v1276_v40 = vpop.permute.xlu0 %1275  ;;  %vm2657_vm1 = vcmp.eq.s32.totalorder %v1121_v48, 6 }
 0x585   :  { %v1665_v10 = vpop.permute.xlu1 %1664 }
 0x586   :  { %v1698_v16 = vsel %vm1538_vm7, %v1665_v10, 0.0 }
 0x587   :  { %2944 = vmax.xlane.f32.xlu1 %v6533_v4  ;;  %v1730_v30 = vadd.f32 %v1698_v16, %v1506_v29 }
 0x588   :  { %v1661_v45 = vpop.permute.xlu0 %1660 }
 0x589   :  { %v1954_v13 = vadd.f32 %v1922_v59, %v1730_v30  ;;  %v2113_v55 = vpop.permute.xlu1 %2112  ;;  %v1697_v5 = vsel %vm1537_vm14, %v1661_v45, 0.0  ;;  %v7110_v59 = vld [vmem:[#allocation149_spill] sm:$0xff] }
 0x58a   :  { %v2146_v28 = vsel %vm1986_vm6, %v2113_v55, 0.0 }
 0x58b   :  { %v2178_v18 = vadd.f32 %v2146_v28, %v1954_v13 }
 0x58c   :  { %v2109_v2 = vpop.permute.xlu0 %2108 }
 0x58d   :  { %v2402_v43 = vadd.f32 %v2370_v35, %v2178_v18  ;;  %v2561_v44 = vpop.permute.xlu1 %2560  ;;  %v2145_v11 = vsel %vm1985_vm2, %v2109_v2, 0.0 }
 0x58e   :  { %v2594_v41 = vsel %vm2434_vm4, %v2561_v44, 0.0 }
 0x58f   :  { %v2626_v26 = vadd.f32 %v2594_v41, %v2402_v43  ;;  %v7111_v41 = vld [vmem:[#allocation5_spill] sm:$0xff] }
 0x590   :  { %v2557_v15 = vpop.permute.xlu0 %2556 }
 0x591   :  { %v2850_v58 = vadd.f32 %v2818_v60, %v2626_v26  ;;  %v1437_v56 = vpop.permute.xlu1 %1436  ;;  %v2593_v57 = vsel %vm2433_vm15, %v2557_v15, 0.0 }
 0x592   :  { %v1473_v17 = vsel %vm1313_vm11, %v1437_v56, 0.0  ;;  %v7112_v56 = vld [vmem:[#allocation14_spill] sm:$0xff] }
 0x593   :  { %v6546_v31 = vsel %vm7109_vm13, %v2850_v58, -inf  ;;  %v1505_v22 = vadd.f32 %v1473_v17, %v1276_v40 }
 0x594   :  { %2948 = vmax.xlane.f32.xlu1 %v6546_v31 }
 0x595   :  { %v1729_v50 = vadd.f32 %v1697_v5, %v1505_v22  ;;  %v1885_v6 = vpop.permute.xlu1 %1884 }
 0x596   :  { %v1921_v61 = vsel %vm1761_vm12, %v1885_v6, 0.0  ;;  %v7113_v6 = vld [vmem:[#allocation19_spill] sm:$0xff] }
 0x597   :  { %v1953_v51 = vadd.f32 %v1921_v61, %v1729_v50 }
 0x599   :  { %v2177_v38 = vadd.f32 %v2145_v11, %v1953_v51  ;;  %v2333_v54 = vpop.permute.xlu1 %2332 }
 0x59a   :  { %v2369_v27 = vsel %vm2209_vm0, %v2333_v54, 0.0  ;;  %v7114_v54 = vld [vmem:[#allocation25_spill] sm:$0xff] }
 0x59b   :  { %v2401_v14 = vadd.f32 %v2369_v27, %v2177_v38 }
 0x59d   :  { %v2625_v8 = vadd.f32 %v2593_v57, %v2401_v14  ;;  %v2781_v29 = vpop.permute.xlu1 %2780 }
 0x59e   :  { %v2817_v10 = vsel %vm2657_vm1, %v2781_v29, 0.0 }
 0x59f   :  { %v2849_v62 = vadd.f32 %v2817_v10, %v2625_v8 }
 0x5a1   :  { %v6551_v16 = vsel %vm7108_vm3, %v2849_v62, -inf }
 0x5a2   :  { %2946 = vmax.xlane.f32.xlu0 %v6551_v16 }
 0x5ac   :  { %v2889_v30 = vpop.xlane.xlu0 %2888 }
 0x5ad   :  { %v2951_v13 = vsub.f32 %v7110_v59, %v2889_v30 }
 0x5af   :  { %v2984_v55 = vmul.f32 1.442695, %v2951_v13 }
 0x5b0   :  { %v2891_v28 = vpop.xlane.xlu0 %2890 }
 0x5b1   :  { %3741 = vpow2.f32 %v2984_v55  ;;  %v2952_v21 = vsub.f32 %v7111_v41, %v2891_v28 }
 0x5b3   :  { %v2986_v58 = vmul.f32 1.442695, %v2952_v21 }
 0x5b4   :  { %v2895_v40 = vpop.xlane.xlu0 %2894 }
 0x5b5   :  { %v2954_v17 = vsub.f32 %v7112_v56, %v2895_v40 }
 0x5b7   :  { %v2990_v50 = vmul.f32 1.442695, %v2954_v17 }
 0x5b8   :  { %v2899_v35 = vpop.xlane.xlu0 %2898 }
 0x5b9   :  { %v2956_v61 = vsub.f32 %v7113_v6, %v2899_v35 }
 0x5bb   :  { %v6555_v18 = vpop.eup %3741  ;;  %v2994_v15 = vmul.f32 1.442695, %v2956_v61 }
 0x5bc   :  { %3048 = vadd.xlane.f32.xlu1 %v6555_v18  ;;  %v2903_v43 = vpop.xlane.xlu0 %2902 }
 0x5bd   :  { %v2958_v27 = vsub.f32 %v7114_v54, %v2903_v43 }
 0x5bf   :  { %v2998_v10 = vmul.f32 1.442695, %v2958_v27 }
 0x5c0   :  { %v2907_v44 = vpop.xlane.xlu0 %2906 }
 0x5c1   :  { %v2960_v62 = vsub.f32 %v5987_v46, %v2907_v44 }
 0x5c5   :  { %v2911_v60 = vpop.xlane.xlu0 %2910 }
 0x5c6   :  { %v2962_v28 = vsub.f32 %v6070_v52, %v2911_v60 }
 0x5c8   :  { %v3006_v41 = vmul.f32 1.442695, %v2962_v28 }
 0x5ce   :  { %v2915_v11 = vpop.xlane.xlu0 %2914 }
 0x5cf   :  { %v2887_v48 = vpop.xlane.xlu1 %2886  ;;  %v2964_v21 = vsub.f32 %v6131_v63, %v2915_v11 }
 0x5d0   :  { %v2950_v26 = vsub.f32 %v5567_v12, %v2887_v48 }
 0x5d2   :  { %v2982_v45 = vmul.f32 1.442695, %v2950_v26 }
 0x5d3   :  { %v2893_v22 = vpop.xlane.xlu1 %2892 }
 0x5d4   :  { %3743 = vpow2.f32 %v2982_v45  ;;  %v2953_v5 = vsub.f32 %v5585_v33, %v2893_v22  ;;  %v2919_v8 = vpop.xlane.xlu0 %2918 }
 0x5d5   :  { %3745 = vpow2.f32 %v2986_v58  ;;  %v3010_v58 = vmul.f32 1.442695, %v2964_v21  ;;  %v2966_v56 = vsub.f32 %v6179_v47, %v2919_v8 }
 0x5d6   :  { %v2988_v2 = vmul.f32 1.442695, %v2953_v5 }
 0x5d7   :  { %v2897_v51 = vpop.xlane.xlu1 %2896 }
 0x5d8   :  { %3747 = vpow2.f32 %v2988_v2  ;;  %v2955_v38 = vsub.f32 %v5772_v42, %v2897_v51  ;;  %v3014_v2 = vmul.f32 1.442695, %v2966_v56 }
 0x5d9   :  { %3749 = vpow2.f32 %v2990_v50  ;;  %v2923_v46 = vpop.xlane.xlu0 %2922 }
 0x5da   :  { %v2992_v12 = vmul.f32 1.442695, %v2955_v38  ;;  %v2968_v50 = vsub.f32 %v6215_v36, %v2923_v46 }
 0x5db   :  { %v2901_v14 = vpop.xlane.xlu1 %2900 }
 0x5dc   :  { %3751 = vpow2.f32 %v2992_v12  ;;  %v2957_v57 = vsub.f32 %v5851_v23, %v2901_v14  ;;  %v3002_v23 = vmul.f32 1.442695, %v2960_v62  ;;  %v3018_v38 = vmul.f32 1.442695, %v2968_v50 }
 0x5dd   :  { %3753 = vpow2.f32 %v2994_v15 }
 0x5de   :  { %v6566_v33 = vpop.eup %3743  ;;  %v2996_v29 = vmul.f32 1.442695, %v2957_v57 }
 0x5df   :  { %v2905_v30 = vpop.xlane.xlu1 %2904  ;;  %3046 = vadd.xlane.f32.xlu0 %v6566_v33  ;;  %v6571_v59 = vpop.eup %3745 }
 0x5e0   :  { %3755 = vpow2.f32 %v2996_v29  ;;  %v2959_v42 = vsub.f32 %v5882_v7, %v2905_v30  ;;  %v2927_v60 = vpop.xlane.xlu0 %2926 }
 0x5e1   :  { %3757 = vpow2.f32 %v2998_v10  ;;  %v2970_v12 = vsub.f32 %v6250_v37, %v2927_v60 }
 0x5e2   :  { %v6573_v13 = vpop.eup %3747  ;;  %v3000_v55 = vmul.f32 1.442695, %v2959_v42 }
 0x5e3   :  { %v2909_v40 = vpop.xlane.xlu1 %2908  ;;  %3052 = vadd.xlane.f32.xlu1 %v6573_v13  ;;  %3050 = vadd.xlane.f32.xlu0 %v6571_v59  ;;  %v6579_v43 = vpop.eup %3749  ;;  %v3022_v57 = vmul.f32 1.442695, %v2970_v12 }
 0x5e4   :  { %3759 = vpow2.f32 %v3000_v55  ;;  %v2961_v35 = vsub.f32 %v5959_v49, %v2909_v40  ;;  %v2931_v47 = vpop.xlane.xlu0 %2930 }
 0x5e5   :  { %3761 = vpow2.f32 %v3002_v23  ;;  %v2972_v8 = vsub.f32 %v6281_v53, %v2931_v47 }
 0x5e6   :  { %v6581_v7 = vpop.eup %3751  ;;  %v3004_v44 = vmul.f32 1.442695, %v2961_v35 }
 0x5e7   :  { %v2913_v48 = vpop.xlane.xlu1 %2912  ;;  %3056 = vadd.xlane.f32.xlu1 %v6581_v7  ;;  %3054 = vadd.xlane.f32.xlu0 %v6579_v43  ;;  %v6587_v26 = vpop.eup %3753  ;;  %v3026_v30 = vmul.f32 1.442695, %v2972_v8 }
 0x5e8   :  { %3763 = vpow2.f32 %v3004_v44  ;;  %v2963_v52 = vsub.f32 %v6307_v39, %v2913_v48  ;;  %v2935_v27 = vpop.xlane.xlu0 %2934 }
 0x5e9   :  { %3765 = vpow2.f32 %v3006_v41  ;;  %v2974_v42 = vsub.f32 %v6315_v20, %v2935_v27 }
 0x5ea   :  { %v6589_v49 = vpop.eup %3755  ;;  %v3008_v45 = vmul.f32 1.442695, %v2963_v52 }
 0x5eb   :  { %3060 = vadd.xlane.f32.xlu1 %v6589_v49  ;;  %3058 = vadd.xlane.f32.xlu0 %v6587_v26  ;;  %v6595_v22 = vpop.eup %3757  ;;  %v3030_v46 = vmul.f32 1.442695, %v2974_v42 }
 0x5ec   :  { %3767 = vpow2.f32 %v3008_v45  ;;  %v2939_v53 = vpop.xlane.xlu0 %2938 }
 0x5ed   :  { %3769 = vpow2.f32 %v3010_v58  ;;  %v2976_v35 = vsub.f32 %v6344_v25, %v2939_v53 }
 0x5ee   :  { %v6597_v39 = vpop.eup %3759 }
 0x5ef   :  { %3064 = vadd.xlane.f32.xlu1 %v6597_v39  ;;  %3062 = vadd.xlane.f32.xlu0 %v6595_v22  ;;  %v6603_v51 = vpop.eup %3761  ;;  %v3034_v48 = vmul.f32 1.442695, %v2976_v35 }
 0x5f0   :  { %v2917_v17 = vpop.xlane.xlu1 %2916 }
 0x5f1   :  { %v2965_v63 = vsub.f32 %v6377_v1, %v2917_v17 }
 0x5f2   :  { %v6605_v1 = vpop.eup %3763 }
 0x5f3   :  { %v3012_v5 = vmul.f32 1.442695, %v2965_v63  ;;  %3068 = vadd.xlane.f32.xlu1 %v6605_v1  ;;  %3066 = vadd.xlane.f32.xlu0 %v6603_v51  ;;  %v6611_v54 = vpop.eup %3765 }
 0x5f5   :  { %3771 = vpow2.f32 %v3012_v5 }
 0x5f6   :  { %3773 = vpow2.f32 %v3014_v2 }
 0x5f7   :  { %3070 = vadd.xlane.f32.xlu0 %v6611_v54 }
 0x5f8   :  { %v2921_v6 = vpop.xlane.xlu1 %2920 }
 0x5f9   :  { %v2967_v61 = vsub.f32 %v6429_v9, %v2921_v6  ;;  %v6613_v9 = vpop.eup %3767 }
 0x5fa   :  { %3072 = vadd.xlane.f32.xlu1 %v6613_v9  ;;  %v6619_v10 = vpop.eup %3769 }
 0x5fb   :  { %v3016_v11 = vmul.f32 1.442695, %v2967_v61  ;;  %3074 = vadd.xlane.f32.xlu0 %v6619_v10 }
 0x5fd   :  { %3775 = vpow2.f32 %v3016_v11 }
 0x5fe   :  { %3777 = vpow2.f32 %v3018_v38 }
 0x600   :  { %v2925_v15 = vpop.xlane.xlu1 %2924 }
 0x601   :  { %v2969_v36 = vsub.f32 %v6473_v24, %v2925_v15  ;;  %v6621_v24 = vpop.eup %3771 }
 0x602   :  { %3076 = vadd.xlane.f32.xlu1 %v6621_v24  ;;  %v6627_v28 = vpop.eup %3773 }
 0x603   :  { %v3020_v14 = vmul.f32 1.442695, %v2969_v36  ;;  %3078 = vadd.xlane.f32.xlu0 %v6627_v28 }
 0x604   :  { %v2929_v29 = vpop.xlane.xlu1 %2928 }
 0x605   :  { %3779 = vpow2.f32 %v3020_v14  ;;  %v2971_v37 = vsub.f32 %v6485_v34, %v2929_v29 }
 0x606   :  { %3781 = vpow2.f32 %v3022_v57 }
 0x607   :  { %v3024_v62 = vmul.f32 1.442695, %v2971_v37  ;;  %v6629_v34 = vpop.eup %3775 }
 0x608   :  { %v2933_v55 = vpop.xlane.xlu1 %2932  ;;  %3080 = vadd.xlane.f32.xlu1 %v6629_v34  ;;  %v6635_v41 = vpop.eup %3777 }
 0x609   :  { %3783 = vpow2.f32 %v3024_v62  ;;  %v2973_v23 = vsub.f32 %v6507_v0, %v2933_v55  ;;  %3082 = vadd.xlane.f32.xlu0 %v6635_v41 }
 0x60a   :  { %3785 = vpow2.f32 %v3026_v30 }
 0x60b   :  { %v3028_v40 = vmul.f32 1.442695, %v2973_v23 }
 0x60c   :  { %v2937_v44 = vpop.xlane.xlu1 %2936 }
 0x60d   :  { %3787 = vpow2.f32 %v3028_v40  ;;  %v2975_v20 = vsub.f32 %v6518_v19, %v2937_v44 }
 0x60e   :  { %3789 = vpow2.f32 %v3030_v46 }
 0x60f   :  { %v6637_v0 = vpop.eup %3779  ;;  %v3032_v21 = vmul.f32 1.442695, %v2975_v20 }
 0x610   :  { %v2941_v52 = vpop.xlane.xlu1 %2940  ;;  %3084 = vadd.xlane.f32.xlu1 %v6637_v0  ;;  %v6642_v60 = vpop.eup %3781 }
 0x611   :  { %3791 = vpow2.f32 %v3032_v21  ;;  %v2977_v25 = vsub.f32 %v6525_v3, %v2941_v52  ;;  %3086 = vadd.xlane.f32.xlu0 %v6642_v60  ;;  %v2943_v56 = vpop.xlane.xlu0 %2942 }
 0x612   :  { %3793 = vpow2.f32 %v3034_v48  ;;  %v2978_v63 = vsub.f32 %v6537_v32, %v2943_v56 }
 0x613   :  { %v6644_v45 = vpop.eup %3783  ;;  %v3036_v19 = vmul.f32 1.442695, %v2977_v25 }
 0x614   :  { %v2945_v58 = vpop.xlane.xlu1 %2944  ;;  %3088 = vadd.xlane.f32.xlu1 %v6644_v45  ;;  %v6650_v5 = vpop.eup %3785  ;;  %v3038_v50 = vmul.f32 1.442695, %v2978_v63 }
 0x615   :  { %3795 = vpow2.f32 %v3036_v19  ;;  %v2979_v17 = vsub.f32 %v6533_v4, %v2945_v58  ;;  %3090 = vadd.xlane.f32.xlu0 %v6650_v5 }
 0x617   :  { %v6652_v3 = vpop.eup %3787  ;;  %v3040_v2 = vmul.f32 1.442695, %v2979_v17 }
 0x618   :  { %3092 = vadd.xlane.f32.xlu1 %v6652_v3  ;;  %v6656_v6 = vpop.eup %3789 }
 0x619   :  { %3797 = vpow2.f32 %v3040_v2  ;;  %3094 = vadd.xlane.f32.xlu0 %v6656_v6 }
 0x61a   :  { %3799 = vpow2.f32 %v3038_v50 }
 0x61b   :  { %v6658_v47 = vpop.eup %3791 }
 0x61c   :  { %3096 = vadd.xlane.f32.xlu1 %v6658_v47  ;;  %v6662_v4 = vpop.eup %3793 }
 0x61d   :  { %3098 = vadd.xlane.f32.xlu0 %v6662_v4 }
 0x61f   :  { %v6664_v32 = vpop.eup %3795 }
 0x620   :  { %3100 = vadd.xlane.f32.xlu1 %v6664_v32 }
 0x621   :  { %v2949_v38 = vpop.xlane.xlu1 %2948 }
 0x622   :  { %v2981_v12 = vsub.f32 %v6546_v31, %v2949_v38 }
 0x623   :  { %v6668_v61 = vpop.eup %3797 }
 0x624   :  { %v6670_v11 = vpop.eup %3799  ;;  %3104 = vadd.xlane.f32.xlu1 %v6668_v61  ;;  %v3044_v15 = vmul.f32 1.442695, %v2981_v12 }
 0x625   :  { %3102 = vadd.xlane.f32.xlu0 %v6670_v11 }
 0x626   :  { %3801 = vpow2.f32 %v3044_v15 }
 0x62f   :  { %v2947_v27 = vpop.xlane.xlu0 %2946 }
 0x630   :  { %v6675_v36 = vpop.eup %3801  ;;  %v2980_v14 = vsub.f32 %v6551_v16, %v2947_v27 }
 0x631   :  { %3108 = vadd.xlane.f32.xlu1 %v6675_v36 }
 0x632   :  { %v3042_v57 = vmul.f32 1.442695, %v2980_v14 }
 0x634   :  { %3803 = vpow2.f32 %v3042_v57 }
 0x63e   :  { %v6679_v8 = vpop.eup %3803 }
 0x63f   :  { %3106 = vadd.xlane.f32.xlu0 %v6679_v8 }
 0x649   :  { %v3049_v29 = vpop.xlane.xlu1 %3048 }
 0x64a   :  { %3805 = vrcp.f32 %v3049_v29 }
 0x654   :  { %v3806_v37 = vpop.eup %3805 }
 0x655   :  { %v3143_v31 = vmul.f32 %v3806_v37, %v6555_v18 }
 0x657   :  { %3175 = vst [vmem:[#allocation2 + $0x8] sm:$0xff] %v3143_v31 }
 0x66c   :  { %v3047_v62 = vpop.xlane.xlu0 %3046 }
 0x66d   :  { %3807 = vrcp.f32 %v3047_v62 }
 0x670   :  { %v3053_v30 = vpop.xlane.xlu1 %3052  ;;  %v3051_v42 = vpop.xlane.xlu0 %3050 }
 0x671   :  { %3809 = vrcp.f32 %v3053_v30 }
 0x672   :  { %3811 = vrcp.f32 %v3051_v42 }
 0x674   :  { %v3057_v55 = vpop.xlane.xlu1 %3056  ;;  %v3055_v16 = vpop.xlane.xlu0 %3054 }
 0x675   :  { %3813 = vrcp.f32 %v3057_v55 }
 0x676   :  { %3815 = vrcp.f32 %v3055_v16 }
 0x677   :  { %v3808_v53 = vpop.eup %3807 }
 0x678   :  { %v3142_v23 = vmul.f32 %v3808_v53, %v6566_v33  ;;  %v3061_v40 = vpop.xlane.xlu1 %3060  ;;  %v3059_v46 = vpop.xlane.xlu0 %3058 }
 0x679   :  { %3817 = vrcp.f32 %v3061_v40 }
 0x67a   :  { %3174 = vst [vmem:[#allocation2] sm:$0xff] %v3142_v23  ;;  %3819 = vrcp.f32 %v3059_v46 }
 0x67b   :  { %v3810_v18 = vpop.eup %3809 }
 0x67c   :  { %v3812_v35 = vpop.eup %3811  ;;  %v3145_v44 = vmul.f32 %v3810_v18, %v6573_v13  ;;  %v3065_v20 = vpop.xlane.xlu1 %3064 }
 0x67d   :  { %v3063_v21 = vpop.xlane.xlu0 %3062  ;;  %v3144_v48 = vmul.f32 %v3812_v35, %v6571_v59  ;;  %3821 = vrcp.f32 %v3065_v20 }
 0x67e   :  { %3177 = vst [vmem:[#allocation2 + $0x18] sm:$0xff] %v3145_v44  ;;  %3823 = vrcp.f32 %v3063_v21 }
 0x67f   :  { %v3814_v52 = vpop.eup %3813  ;;  %3176 = vst [vmem:[#allocation2 + $0x10] sm:$0xff] %v3144_v48 }
 0x680   :  { %v3816_v25 = vpop.eup %3815  ;;  %v3147_v33 = vmul.f32 %v3814_v52, %v6581_v7  ;;  %v3069_v19 = vpop.xlane.xlu1 %3068 }
 0x681   :  { %v3067_v58 = vpop.xlane.xlu0 %3066  ;;  %v3146_v56 = vmul.f32 %v3816_v25, %v6579_v43  ;;  %3825 = vrcp.f32 %v3069_v19 }
 0x682   :  { %3179 = vst [vmem:[#allocation2 + $0x28] sm:$0xff] %v3147_v33  ;;  %3827 = vrcp.f32 %v3067_v58 }
 0x683   :  { %v3818_v13 = vpop.eup %3817  ;;  %3178 = vst [vmem:[#allocation2 + $0x20] sm:$0xff] %v3146_v56 }
 0x684   :  { %v3820_v17 = vpop.eup %3819  ;;  %v3149_v59 = vmul.f32 %v3818_v13, %v6589_v49 }
 0x685   :  { %v3071_v2 = vpop.xlane.xlu0 %3070  ;;  %v3148_v50 = vmul.f32 %v3820_v17, %v6587_v26 }
 0x686   :  { %3181 = vst [vmem:[#allocation2 + $0x38] sm:$0xff] %v3149_v59 }
 0x687   :  { %v3073_v63 = vpop.xlane.xlu1 %3072  ;;  %v3822_v7 = vpop.eup %3821  ;;  %3180 = vst [vmem:[#allocation2 + $0x30] sm:$0xff] %v3148_v50 }
 0x688   :  { %3829 = vrcp.f32 %v3073_v63  ;;  %v3824_v38 = vpop.eup %3823  ;;  %v3151_v43 = vmul.f32 %v3822_v7, %v6597_v39 }
 0x689   :  { %3831 = vrcp.f32 %v3071_v2  ;;  %v3075_v15 = vpop.xlane.xlu0 %3074  ;;  %v3150_v27 = vmul.f32 %v3824_v38, %v6595_v22 }
 0x68a   :  { %3183 = vst [vmem:[#allocation2 + $0x48] sm:$0xff] %v3151_v43 }
 0x68b   :  { %v3826_v49 = vpop.eup %3825  ;;  %3182 = vst [vmem:[#allocation2 + $0x40] sm:$0xff] %v3150_v27 }
 0x68c   :  { %v3828_v14 = vpop.eup %3827  ;;  %v3153_v26 = vmul.f32 %v3826_v49, %v6605_v1 }
 0x68d   :  { %v3152_v37 = vmul.f32 %v3828_v14, %v6603_v51 }
 0x68e   :  { %3185 = vst [vmem:[#allocation2 + $0x58] sm:$0xff] %v3153_v26 }
 0x68f   :  { %v3077_v12 = vpop.xlane.xlu1 %3076  ;;  %3184 = vst [vmem:[#allocation2 + $0x50] sm:$0xff] %v3152_v37 }
 0x690   :  { %3833 = vrcp.f32 %v3077_v12  ;;  %v3079_v29 = vpop.xlane.xlu0 %3078 }
 0x691   :  { %3835 = vrcp.f32 %v3075_v15 }
 0x692   :  { %v3830_v39 = vpop.eup %3829 }
 0x693   :  { %v3832_v31 = vpop.eup %3831  ;;  %v3155_v22 = vmul.f32 %v3830_v39, %v6613_v9 }
 0x694   :  { %v3154_v42 = vmul.f32 %v3832_v31, %v6611_v54 }
 0x695   :  { %v3081_v57 = vpop.xlane.xlu1 %3080  ;;  %3187 = vst [vmem:[#allocation2 + $0x68] sm:$0xff] %v3155_v22 }
 0x696   :  { %3837 = vrcp.f32 %v3081_v57  ;;  %v3083_v30 = vpop.xlane.xlu0 %3082  ;;  %3186 = vst [vmem:[#allocation2 + $0x60] sm:$0xff] %v3154_v42 }
 0x697   :  { %3839 = vrcp.f32 %v3079_v29 }
 0x69a   :  { %v3834_v1 = vpop.eup %3833 }
 0x69b   :  { %v3836_v55 = vpop.eup %3835  ;;  %v3157_v51 = vmul.f32 %v3834_v1, %v6621_v24 }
 0x69c   :  { %v3156_v23 = vmul.f32 %v3836_v55, %v6619_v10 }
 0x69d   :  { %v3085_v62 = vpop.xlane.xlu1 %3084  ;;  %3189 = vst [vmem:[#allocation2 + $0x78] sm:$0xff] %v3157_v51 }
 0x69e   :  { %3841 = vrcp.f32 %v3085_v62  ;;  %v3087_v53 = vpop.xlane.xlu0 %3086  ;;  %3188 = vst [vmem:[#allocation2 + $0x70] sm:$0xff] %v3156_v23 }
 0x69f   :  { %3843 = vrcp.f32 %v3083_v30 }
 0x6a0   :  { %v3838_v9 = vpop.eup %3837 }
 0x6a1   :  { %v3089_v16 = vpop.xlane.xlu1 %3088  ;;  %v3840_v40 = vpop.eup %3839  ;;  %v3159_v54 = vmul.f32 %v3838_v9, %v6629_v34 }
 0x6a2   :  { %3845 = vrcp.f32 %v3089_v16  ;;  %v3091_v18 = vpop.xlane.xlu0 %3090  ;;  %v3158_v35 = vmul.f32 %v3840_v40, %v6627_v28 }
 0x6a3   :  { %3847 = vrcp.f32 %v3087_v53  ;;  %3191 = vst [vmem:[#allocation2 + $0x88] sm:$0xff] %v3159_v54 }
 0x6a4   :  { %3190 = vst [vmem:[#allocation2 + $0x80] sm:$0xff] %v3158_v35 }
 0x6a5   :  { %v3093_v46 = vpop.xlane.xlu1 %3092 }
 0x6a6   :  { %3849 = vrcp.f32 %v3093_v46  ;;  %v3095_v21 = vpop.xlane.xlu0 %3094 }
 0x6a7   :  { %3851 = vrcp.f32 %v3091_v18 }
 0x6a8   :  { %v3842_v24 = vpop.eup %3841 }
 0x6a9   :  { %v3844_v44 = vpop.eup %3843  ;;  %v3161_v10 = vmul.f32 %v3842_v24, %v6637_v0  ;;  %v3097_v20 = vpop.xlane.xlu1 %3096 }
 0x6aa   :  { %v3160_v48 = vmul.f32 %v3844_v44, %v6635_v41  ;;  %3853 = vrcp.f32 %v3097_v20  ;;  %v3099_v33 = vpop.xlane.xlu0 %3098 }
 0x6ab   :  { %3193 = vst [vmem:[#allocation2 + $0x98] sm:$0xff] %v3161_v10  ;;  %3855 = vrcp.f32 %v3095_v21 }
 0x6ac   :  { %v3846_v34 = vpop.eup %3845  ;;  %3192 = vst [vmem:[#allocation2 + $0x90] sm:$0xff] %v3160_v48 }
 0x6ad   :  { %v3848_v52 = vpop.eup %3847  ;;  %v3163_v28 = vmul.f32 %v3846_v34, %v6644_v45  ;;  %v3101_v25 = vpop.xlane.xlu1 %3100 }
 0x6ae   :  { %v3162_v19 = vmul.f32 %v3848_v52, %v6642_v60  ;;  %3857 = vrcp.f32 %v3101_v25 }
 0x6af   :  { %3195 = vst [vmem:[#allocation2 + $0xa8] sm:$0xff] %v3163_v28  ;;  %3859 = vrcp.f32 %v3099_v33 }
 0x6b0   :  { %v3850_v0 = vpop.eup %3849  ;;  %3194 = vst [vmem:[#allocation2 + $0xa0] sm:$0xff] %v3162_v19 }
 0x6b1   :  { %v3852_v58 = vpop.eup %3851  ;;  %v3165_v41 = vmul.f32 %v3850_v0, %v6652_v3  ;;  %v3105_v56 = vpop.xlane.xlu1 %3104 }
 0x6b2   :  { %v3164_v13 = vmul.f32 %v3852_v58, %v6650_v5  ;;  %3861 = vrcp.f32 %v3105_v56  ;;  %v3103_v17 = vpop.xlane.xlu0 %3102 }
 0x6b3   :  { %3197 = vst [vmem:[#allocation2 + $0xb8] sm:$0xff] %v3165_v41  ;;  %3863 = vrcp.f32 %v3103_v17 }
 0x6b4   :  { %v3854_v45 = vpop.eup %3853  ;;  %3196 = vst [vmem:[#allocation2 + $0xb0] sm:$0xff] %v3164_v13 }
 0x6b5   :  { %v3856_v59 = vpop.eup %3855  ;;  %v3167_v60 = vmul.f32 %v3854_v45, %v6658_v47 }
 0x6b6   :  { %v3166_v63 = vmul.f32 %v3856_v59, %v6656_v6 }
 0x6b7   :  { %3199 = vst [vmem:[#allocation2 + $0xc8] sm:$0xff] %v3167_v60 }
 0x6b8   :  { %v3858_v2 = vpop.eup %3857  ;;  %3198 = vst [vmem:[#allocation2 + $0xc0] sm:$0xff] %v3166_v63 }
 0x6b9   :  { %v3860_v50 = vpop.eup %3859  ;;  %v3169_v3 = vmul.f32 %v3858_v2, %v6664_v32 }
 0x6ba   :  { %v3168_v7 = vmul.f32 %v3860_v50, %v6662_v4 }
 0x6bb   :  { %3201 = vst [vmem:[#allocation2 + $0xd8] sm:$0xff] %v3169_v3 }
 0x6bc   :  { %v3862_v5 = vpop.eup %3861  ;;  %3200 = vst [vmem:[#allocation2 + $0xd0] sm:$0xff] %v3168_v7 }
 0x6bd   :  { %v3864_v38 = vpop.eup %3863  ;;  %v3171_v43 = vmul.f32 %v3862_v5, %v6668_v61 }
 0x6be   :  { %v3170_v12 = vmul.f32 %v3864_v38, %v6670_v11  ;;  %v3109_v47 = vpop.xlane.xlu1 %3108 }
 0x6bf   :  { %3203 = vst [vmem:[#allocation2 + $0xe8] sm:$0xff] %v3171_v43  ;;  %3865 = vrcp.f32 %v3109_v47 }
 0x6c0   :  { %3202 = vst [vmem:[#allocation2 + $0xe0] sm:$0xff] %v3170_v12 }
 0x6c9   :  { %v3866_v6 = vpop.eup %3865 }
 0x6ca   :  { %v3173_v15 = vmul.f32 %v3866_v6, %v6675_v36 }
 0x6cc   :  { %3205 = vst [vmem:[#allocation2 + $0xf8] sm:$0xff] %v3173_v15  ;;  %v3107_v27 = vpop.xlane.xlu0 %3106 }
 0x6cd   :  { %3867 = vrcp.f32 %v3107_v27 }
 0x6d7   :  { %v3868_v4 = vpop.eup %3867 }
 0x6d8   :  { %v3172_v32 = vmul.f32 %v3868_v4, %v6679_v8 }
 0x6da   :  { %3204 = vst [vmem:[#allocation2 + $0xf0] sm:$0xff] %v3172_v32 }
 0x6db   :  { %3880 = shalt.err (!%p3877_p4)
}
 0x6dc   :  { %s3881_s23 = scalar_lea.hbm %s6733_s7, 4096 }
 0x6dd   :  { %p3882_p5 = scmp.ne.s32.totalorder %s6733_s7, %s3881_s23  ;;  %p3885_p6 = scmp.lt.u32.totalorder %s3881_s23, %s6733_s7 }
 0x6df   :  { %p3887_p7 = pnand %p3885_p6, %p3882_p5 }
 0x6e1   :  { %3890 = shalt.err (!%p3887_p7)
}
 0x6e2   :  { %s3904_s27 = smov 128   ;;  %s3905_s28 = smov 8  }
 0x6e3   :  { %3217 = dma.vmem_to_hbm [thread:$0]  %s3212_s20, 4096, %s6733_s7, [#allocation3], %s3904_s27, %s3904_s27, %s3905_s28  }
 0x6e4   :  { %3891 = dma.done.wait [#allocation3], 4096  }
 0x6e5   :  { %3892 = vsyncadd [#allocation3], 4294963200 }
 0x6e6   :  { %3221 = vsyncpa [#allocation3], 1 }

</bundles_post_ra>
